<compile_context>
chip_gen: v6e
topology: v6e:2x2x1
jax: 0.10.0
libtpu: 0.0.40
codegen_flags: <defaults>
</compile_context>

<pallas_src>
import functools

import numpy as np

import jax
import jax.numpy as jnp
from jax import lax
from jax.experimental import pallas as pl
from jax.experimental.pallas import tpu as pltpu


_DEFAULT_TM = 256          # flattened rows per in-kernel chunk (multiple of 8)


def _round_up(x, m):
    return ((x + m - 1) // m) * m


def _cdiv(a, b):
    return (a + b - 1) // b


@functools.lru_cache(maxsize=None)
def _vmem_limit_bytes():
    cap = None
    try:
        info = pltpu.get_tpu_info()
        cap = getattr(info, "vmem_capacity_bytes", None)
    except Exception:
        cap = None
    if not cap:
        cap = 64 * 1024 * 1024            # conservative: v7x per-core VMEM
    return int(min(int(0.7 * cap), 100 * 1024 * 1024))


# -----------------------------------------------------------------------------
# Slab geometry / layout helpers
#
# slab[n, lead + h*Wp + w, c] == zero-padded image [n, h, w, c]
#   Wp   = round_up(Wo + 2*pad, 8)       (width padded for sublane alignment)
#   lead = Wp                            (one guard row so all tap offsets >= 0)
# Everything outside the valid interior (borders, width padding, tail) is ZERO,
# so a conv's output slab is directly a valid input slab for the next conv.
# -----------------------------------------------------------------------------
def _slab_geom(Ho, Wo, pad=1, tm=_DEFAULT_TM):
    Wp = _round_up(Wo + 2 * pad, 8)
    lead = Wp
    interior = Ho * Wp
    tm = min(tm, _round_up(interior, 8))
    n_chunks = _cdiv(interior, tm)
    store_base = lead + pad * Wp                      # multiple of 8
    required = lead + n_chunks * tm + 2 * Wp + 1      # max read extent + 1
    L = Wp * _cdiv(required, Wp)                      # multiple of Wp (and 8)
    return dict(Ho=Ho, Wo=Wo, pad=pad, Wp=Wp, lead=lead, tm=tm,
                n_chunks=n_chunks, store_base=store_base, L=L)


def _to_slab(x_nhwc, geom, dtype):
    """NHWC -> zero-padded flattened slab (single jnp.pad + free reshape)."""
    N, H, W, C = x_nhwc.shape
    assert H == geom["Ho"] and W == geom["Wo"]
    Wp, L, pad = geom["Wp"], geom["L"], geom["pad"]
    rows_total = L // Wp
    top = pad + geom["lead"] // Wp
    bottom = rows_total - H - top
    right = Wp - W - pad
    xs = jnp.pad(x_nhwc.astype(dtype),
                 ((0, 0), (top, bottom), (pad, right), (0, 0)))
    return xs.reshape(N, L, C)


def _from_slab(slab, geom):
    """Slab -> dense NHWC (one slice; only done on the block output)."""
    N, L, C = slab.shape
    Wp, pad = geom["Wp"], geom["pad"]
    rows_total = L // Wp
    top = pad + geom["lead"] // Wp
    img = slab.reshape(N, rows_total, Wp, C)
    return img[:, top:top + geom["Ho"], pad:pad + geom["Wo"], :]


def _interior_mask(geom):
    """0/1 f32 mask over the chunk-store range (baked numpy constant)."""
    Wp, lead, pad = geom["Wp"], geom["lead"], geom["pad"]
    m_idx = geom["store_base"] + np.arange(geom["n_chunks"] * geom["tm"])
    q = m_idx - lead
    h, w = q // Wp, q % Wp
    valid = ((h >= pad) & (h < pad + geom["Ho"]) &
             (w >= pad) & (w < pad + geom["Wo"]))
    return jnp.asarray(valid.astype(np.float32)[:, None])      # (Lm, 1)


# -----------------------------------------------------------------------------
# Pallas kernel: fused 3x3 conv (9 shifted MXU matmuls over the slab, M-chunked)
#                + folded-BN bias + junk-zero mask + optional fused skip + ReLU.
# -----------------------------------------------------------------------------
def _conv_bn_kernel(x_ref, w_ref, b_ref, mask_ref, *rest,
                    tap_offsets, tm, n_chunks, store_base, tail_len,
                    skip_mode, apply_relu, compute_dtype):
    if skip_mode == "conv":
        xs_ref, ws_ref, out_ref = rest
    elif skip_mode == "add":
        res_ref, out_ref = rest
    else:
        (out_ref,) = rest
    ct = out_ref.shape[-1]

    # Zero the output-slab border rows not covered by the chunk loop, so the
    # result is a valid zero-padded input slab for a chained next conv.
    out_ref[pl.ds(0, store_base), :] = jnp.zeros((store_base, ct),
                                                 out_ref.dtype)
    tail_off = store_base + n_chunks * tm
    out_ref[pl.ds(tail_off, tail_len), :] = jnp.zeros((tail_len, ct),
                                                      out_ref.dtype)

    bias = b_ref[...].astype(jnp.float32)               # (1, ct)

    def chunk(k, carry):
        s0 = pl.multiple_of(store_base + k * tm, 8)      # aligned chunk store
        acc = jnp.zeros((tm, ct), jnp.float32)
        for t, off in enumerate(tap_offsets):            # static unroll: 9 taps
            ro = k * tm + off
            if off % 8 == 0:                             # middle-column taps
                ro = pl.multiple_of(ro, 8)
            xt = x_ref[pl.ds(ro, tm), :].astype(compute_dtype)
            acc = acc + jnp.dot(xt, w_ref[t].astype(compute_dtype),
                                preferred_element_type=jnp.float32)
        if skip_mode == "conv":                          # fused 1x1 skip conv
            xs = xs_ref[pl.ds(s0, tm), :].astype(compute_dtype)
            acc = acc + jnp.dot(xs, ws_ref[...].astype(compute_dtype),
                                preferred_element_type=jnp.float32)
        acc = acc + bias                                 # folded BN bias(es)
        acc = acc * mask_ref[pl.ds(k * tm, tm), :]       # zero junk positions
        if skip_mode == "add":                           # identity residual
            acc = acc + res_ref[pl.ds(s0, tm), :].astype(jnp.float32)
        if apply_relu:
            acc = jnp.maximum(acc, 0.0)
        out_ref[pl.ds(s0, tm), :] = acc.astype(out_ref.dtype)
        return carry

    lax.fori_loop(0, n_chunks, chunk, 0)


# -----------------------------------------------------------------------------
# Conv wrapper (slab in -> slab out)
# -----------------------------------------------------------------------------
def conv_bn_slab(x_slab, geom, w_hwio, scale, bias, *, apply_relu,
                 skip_conv=None, residual_slab=None,
                 compute_dtype=jnp.bfloat16, out_dtype=jnp.float32):
    """Stride-1 'same' 3x3 conv + folded (eval) BN + fused skip + optional ReLU.

    x_slab:        (N, L, Cin) zero-padded slab (see _slab_geom / _to_slab).
    skip_conv:     optional (xs_slab, ws(Cs,Cout), scale_s, bias_s) fused 1x1
                   conv skip; xs_slab must use the same slab geometry.
    residual_slab: optional (N, L, Cout) slab added before the final ReLU.
    Returns (N, L, Cout) output slab (zero borders) in out_dtype.
    """
    N, L, Cin = x_slab.shape
    KH, KW, wcin, Cout = w_hwio.shape
    assert wcin == Cin and L == geom["L"]
    Wp, lead, pad = geom["Wp"], geom["lead"], geom["pad"]
    tm, n_chunks, store_base = geom["tm"], geom["n_chunks"], geom["store_base"]

    # Fold BN scale into the weights (once, f32), then cast for the MXU.
    wf = (w_hwio.astype(jnp.float32) * scale[None, None, None, :])
    wf = wf.reshape(KH * KW, Cin, Cout).astype(compute_dtype)
    b_total = bias.astype(jnp.float32)

    # Tap offsets relative to the chunk store position (all >= 0 thanks to the
    # lead guard row); j==pad taps are 8-aligned because Wp % 8 == 0.
    tap_offsets = tuple(lead + i * Wp + (j - pad)
                        for i in range(KH) for j in range(KW))
    mask = _interior_mask(geom)

    ct = 128 if (Cout % 128 == 0) else Cout
    nc = Cout // ct

    extra_specs, extra_args = [], []
    skip_mode = "none"
    flops = 2 * N * geom["Ho"] * geom["Wo"] * KH * KW * Cin * Cout
    if skip_conv is not None:
        skip_mode = "conv"
        xs_slab, ws, scale_s, bias_s = skip_conv
        Cs = xs_slab.shape[-1]
        ws_f = (ws.astype(jnp.float32) * scale_s[None, :]).astype(compute_dtype)
        b_total = b_total + bias_s.astype(jnp.float32)   # fold both biases
        extra_specs = [
            pl.BlockSpec((None, xs_slab.shape[1], Cs), lambda n, c: (n, 0, 0)),
            pl.BlockSpec((Cs, ct), lambda n, c: (0, c)),
        ]
        extra_args = [xs_slab.astype(compute_dtype), ws_f]
        flops += 2 * N * geom["Ho"] * geom["Wo"] * Cs * Cout
    elif residual_slab is not None:
        skip_mode = "add"
        assert residual_slab.shape[-1] == Cout
        extra_specs = [
            pl.BlockSpec((None, residual_slab.shape[1], ct),
                         lambda n, c: (n, 0, c)),
        ]
        extra_args = [residual_slab]

    in_specs = [
        pl.BlockSpec((None, L, Cin), lambda n, c: (n, 0, 0)),
        pl.BlockSpec((KH * KW, Cin, ct), lambda n, c: (0, 0, c)),
        pl.BlockSpec((1, ct), lambda n, c: (0, c)),
        pl.BlockSpec((n_chunks * tm, 1), lambda n, c: (0, 0)),
    ] + extra_specs
    args = [x_slab, wf, b_total.reshape(1, Cout), mask] + extra_args

    tail_len = L - (store_base + n_chunks * tm)
    kernel = functools.partial(
        _conv_bn_kernel, tap_offsets=tap_offsets, tm=tm, n_chunks=n_chunks,
        store_base=store_base, tail_len=tail_len, skip_mode=skip_mode,
        apply_relu=apply_relu, compute_dtype=compute_dtype)

    bytes_accessed = sum(int(np.prod(a.shape)) * a.dtype.itemsize for a in args)
    bytes_accessed += N * L * Cout * jnp.dtype(out_dtype).itemsize
    cost = pl.CostEstimate(flops=int(flops), transcendentals=0,
                           bytes_accessed=int(bytes_accessed))

    return pl.pallas_call(
        kernel,
        out_shape=jax.ShapeDtypeStruct((N, L, Cout), out_dtype),
        grid=(N, nc),
        in_specs=in_specs,
        out_specs=pl.BlockSpec((None, L, ct), lambda n, c: (n, 0, c)),
        compiler_params=pltpu.CompilerParams(
            dimension_semantics=("parallel", "parallel"),
            vmem_limit_bytes=_vmem_limit_bytes()),
        cost_estimate=cost,
    )(*args)


# -----------------------------------------------------------------------------
# ResBlock wrappers
# -----------------------------------------------------------------------------
def _bn_fold(bn, eps=1e-5):
    gamma, beta, mean, var = bn
    scale = gamma / jnp.sqrt(var + eps)
    return scale, beta - mean * scale


def resblock_forward_nhwc(x_nhwc, params, stride, compute_dtype=jnp.bfloat16):
    """ResBlock forward, NHWC in / NHWC out."""
    N, H, W, Cin = x_nhwc.shape
    Cout = params["w1"].shape[-1]
    s1, b1 = _bn_fold(params["bn1"])
    s2, b2 = _bn_fold(params["bn2"])

    # One pad pass over the block input; this slab is reused for conv1, the
    # identity residual, and (stride==1) the 1x1-conv skip input.
    g1 = _slab_geom(H, W)
    x_slab = _to_slab(x_nhwc, g1, compute_dtype)

    # conv1 (3x3) + bn1 + relu -> output already in conv2's input slab layout.
    h1_slab = conv_bn_slab(x_slab, g1, params["w1"], s1, b1, apply_relu=True,
                           compute_dtype=compute_dtype, out_dtype=compute_dtype)

    if stride > 1:
        # TODO(synk): in-kernel strided taps; for now subsample the full-res
        # result once and rebuild the (stride^2-smaller) slab for conv2.
        h1 = _from_slab(h1_slab, g1)[:, ::stride, ::stride, :]
        Ho, Wo = h1.shape[1], h1.shape[2]
        g2 = _slab_geom(Ho, Wo)
        h1_slab = _to_slab(h1, g2, compute_dtype)
    else:
        g2 = g1

    # conv2 (3x3) + bn2 + fused skip + relu : one kernel launch, no HBM
    # relayout of h1 (it is consumed directly in slab form).
    if params.get("w_skip") is not None:
        ss, bs = _bn_fold(params["bn_skip"])
        ws = params["w_skip"].reshape(Cin, Cout)
        if stride == 1:
            xs_slab = x_slab                      # shared: zero extra HBM work
        else:
            xs_slab = _to_slab(x_nhwc[:, ::stride, ::stride, :], g2,
                               compute_dtype)
        out_slab = conv_bn_slab(h1_slab, g2, params["w2"], s2, b2,
                                apply_relu=True,
                                skip_conv=(xs_slab, ws, ss, bs),
                                compute_dtype=compute_dtype,
                                out_dtype=jnp.float32)
    else:
        if stride != 1 or Cin != Cout:
            raise ValueError("identity skip requires stride == 1 and "
                             "in_channels == out_channels")
        out_slab = conv_bn_slab(h1_slab, g2, params["w2"], s2, b2,
                                apply_relu=True,
                                residual_slab=x_slab,   # reused slab, no pad
                                compute_dtype=compute_dtype,
                                out_dtype=jnp.float32)
    return _from_slab(out_slab, g2)


@functools.partial(jax.jit, static_argnames=("stride", "compute_dtype"))
def resblock_forward(x_nchw, params, stride, compute_dtype=jnp.bfloat16):
    """Pallas ResBlock forward, NCHW in/out (PyTorch convention)."""
    x = jnp.transpose(x_nchw, (0, 2, 3, 1))
    out = resblock_forward_nhwc(x, params, stride, compute_dtype)
    return jnp.transpose(out, (0, 3, 1, 2))


# -----------------------------------------------------------------------------
# Pure-JAX reference (correctness check)
# -----------------------------------------------------------------------------
def resblock_reference(x_nchw, params, stride, eps=1e-5):
    x = jnp.transpose(x_nchw, (0, 2, 3, 1))

    def conv(inp, w, s, pad):
        return jax.lax.conv_general_dilated(
            inp, w, (s, s), [(pad, pad), (pad, pad)],
            dimension_numbers=("NHWC", "HWIO", "NHWC"))

    def bn(inp, p):
        g, b, m, v = p
        return g * (inp - m) / jnp.sqrt(v + eps) + b

    out = jnp.maximum(bn(conv(x, params["w1"], stride, 1), params["bn1"]), 0.0)
    out = bn(conv(out, params["w2"], 1, 1), params["bn2"])
    if params.get("w_skip") is not None:
        identity = bn(conv(x, params["w_skip"], stride, 0), params["bn_skip"])
    else:
        identity = x
    out = jnp.maximum(out + identity, 0.0)
    return jnp.transpose(out, (0, 3, 1, 2))


# -----------------------------------------------------------------------------
def make_params(key, in_channels, out_channels, stride):
    ks = jax.random.split(key, 6)

    def bn_params(k, c):
        k0, k1, k2, k3 = jax.random.split(k, 4)
        gamma = 1.0 + 0.1 * jax.random.normal(k0, (c,), jnp.float32)
        beta = 0.1 * jax.random.normal(k1, (c,), jnp.float32)
        mean = 0.1 * jax.random.normal(k2, (c,), jnp.float32)
        var = 0.5 + jnp.abs(jax.random.normal(k3, (c,), jnp.float32))
        return (gamma, beta, mean, var)

    params = {
        # conv weights stored HWIO (kh, kw, cin, cout)
        "w1": 0.1 * jax.random.normal(ks[0], (3, 3, in_channels, out_channels),
                                      jnp.float32),
        "bn1": bn_params(ks[1], out_channels),
        "w2": 0.1 * jax.random.normal(ks[2], (3, 3, out_channels, out_channels),
                                      jnp.float32),
        "bn2": bn_params(ks[3], out_channels),
        "w_skip": None,
        "bn_skip": None,
    }
    if stride != 1 or in_channels != out_channels:
        params["w_skip"] = 0.1 * jax.random.normal(
            ks[4], (1, 1, in_channels, out_channels), jnp.float32)
        params["bn_skip"] = bn_params(ks[5], out_channels)
    return params


if __name__ == "__main__":
    key = jax.random.PRNGKey(0)
    k_x, k_p, k_p2, k_x2 = jax.random.split(key, 4)

    # Case 1: stride=1, Cin != Cout  ->  fused 1x1-conv/BN skip path (f32).
    N, Cin, H, W = 2, 4, 16, 16
    Cout, stride = 8, 1
    x = jax.random.normal(k_x, (N, Cin, H, W), jnp.float32)       # NCHW
    params = make_params(k_p, Cin, Cout, stride)

    out = jax.block_until_ready(
        resblock_forward(x, params, stride=stride, compute_dtype=jnp.float32))
    ref = jax.block_until_ready(resblock_reference(x, params, stride))
    assert out.shape == ref.shape == (N, Cout, H, W)
    assert jnp.allclose(out, ref, atol=2e-4, rtol=2e-4), \
        float(jnp.max(jnp.abs(out - ref)))

    # Case 2: same block with the default bf16 MXU path (f32 acc) -- loose check.
    out_bf16 = jax.block_until_ready(resblock_forward(x, params, stride=stride))
    assert jnp.allclose(out_bf16, ref, atol=1e-1, rtol=1e-1), \
        float(jnp.max(jnp.abs(out_bf16 - ref)))

    # Case 3: stride=2 downsampling block (skip conv), f32.
    params_s2 = make_params(k_p2, Cin, Cout, 2)
    out_s2 = jax.block_until_ready(
        resblock_forward(x, params_s2, stride=2, compute_dtype=jnp.float32))
    ref_s2 = jax.block_until_ready(resblock_reference(x, params_s2, 2))
    assert out_s2.shape == ref_s2.shape == (N, Cout, H // 2, W // 2)
    assert jnp.allclose(out_s2, ref_s2, atol=2e-4, rtol=2e-4), \
        float(jnp.max(jnp.abs(out_s2 - ref_s2)))

    # Case 4: identity skip (Cin == Cout, stride=1), f32.
    x_id = jax.random.normal(k_x2, (N, Cout, H, W), jnp.float32)
    params_id = make_params(k_p, Cout, Cout, 1)
    out_id = jax.block_until_ready(
        resblock_forward(x_id, params_id, stride=1, compute_dtype=jnp.float32))
    ref_id = jax.block_until_ready(resblock_reference(x_id, params_id, 1))
    assert out_id.shape == ref_id.shape == (N, Cout, H, W)
    assert jnp.allclose(out_id, ref_id, atol=2e-4, rtol=2e-4), \
        float(jnp.max(jnp.abs(out_id - ref_id)))

    print("KERNEL_OK")
</pallas_src>

<mosaic_0001>
module attributes {stable_mosaic.version = 11 : i64} {
  func.func @_conv_bn_kernel(%arg0: i32, %arg1: i32, %arg2: memref<1x600x8xf32, #tpu.memory_space<vmem>>, %arg3: memref<9x8x8xf32, #tpu.memory_space<vmem>>, %arg4: memref<1x8xf32, #tpu.memory_space<vmem>>, %arg5: memref<512x1xf32, #tpu.memory_space<vmem>>, %arg6: memref<1x600x4xf32, #tpu.memory_space<vmem>>, %arg7: memref<4x8xf32, #tpu.memory_space<vmem>>, %arg8: memref<1x600x8xf32, #tpu.memory_space<vmem>>) attributes {dimension_semantics = [#tpu.dimension_semantics<parallel>, #tpu.dimension_semantics<parallel>], iteration_bounds = array<i64: 2, 1>, scalar_prefetch = 0 : i64, scratch_operands = 0 : i64, tpu.core_type = #tpu.core_type<tc>, window_params = [{transform_indices = @transform_0, window_bounds = array<i64: 1, 600, 8>}, {transform_indices = @transform_1, window_bounds = array<i64: 9, 8, 8>}, {transform_indices = @transform_2, window_bounds = array<i64: 1, 8>}, {pipeline_mode = #tpu.pipeline_mode<synchronous>, transform_indices = @transform_3, window_bounds = array<i64: 512, 1>}, {transform_indices = @transform_4, window_bounds = array<i64: 1, 600, 4>}, {transform_indices = @transform_5, window_bounds = array<i64: 4, 8>}, {transform_indices = @transform_6, window_bounds = array<i64: 1, 600, 8>}]} {
    %cst = arith.constant 0.000000e+00 : f32
    %0 = vector.broadcast %cst : f32 to vector<48x8xf32>
    %c0 = arith.constant 0 : index
    %c0_0 = arith.constant 0 : index
    %c0_1 = arith.constant 0 : index
    %1 = vector.load %arg8[%c0, %c0_0, %c0_1] : memref<1x600x8xf32, #tpu.memory_space<vmem>>, vector<1x48x8xf32>
    %2 = vector.shape_cast %1 : vector<1x48x8xf32> to vector<48x8xf32>
    %3 = vector.shape_cast %0 : vector<48x8xf32> to vector<1x48x8xf32>
    tpu.vector_store %arg8[%c0, %c0_0, %c0_1], %3 {strides = array<i32>} : memref<1x600x8xf32, #tpu.memory_space<vmem>>, vector<1x48x8xf32>,
    %cst_2 = arith.constant 0.000000e+00 : f32
    %4 = vector.broadcast %cst_2 : f32 to vector<40x8xf32>
    %c0_3 = arith.constant 0 : index
    %c560 = arith.constant 560 : index
    %c0_4 = arith.constant 0 : index
    %5 = vector.load %arg8[%c0_3, %c560, %c0_4] : memref<1x600x8xf32, #tpu.memory_space<vmem>>, vector<1x40x8xf32>
    %6 = vector.shape_cast %5 : vector<1x40x8xf32> to vector<40x8xf32>
    %7 = vector.shape_cast %4 : vector<40x8xf32> to vector<1x40x8xf32>
    tpu.vector_store %arg8[%c0_3, %c560, %c0_4], %7 {strides = array<i32>} : memref<1x600x8xf32, #tpu.memory_space<vmem>>, vector<1x40x8xf32>,
    %c0_5 = arith.constant 0 : index
    %c0_6 = arith.constant 0 : index
    %8 = vector.load %arg4[%c0_5, %c0_6] : memref<1x8xf32, #tpu.memory_space<vmem>>, vector<1x8xf32>
    %c0_i32 = arith.constant 0 : i32
    %c2_i32 = arith.constant 2 : i32
    %9 = arith.addi %c0_i32, %c2_i32 : i32
    %c1_i32 = arith.constant 1 : i32
    scf.for %arg9 = %c0_i32 to %9 step %c1_i32  : i32 {
      %c256_i32 = arith.constant 256 : i32
      %10 = arith.muli %arg9, %c256_i32 : i32
      %c48_i32 = arith.constant 48 : i32
      %11 = arith.addi %c48_i32, %10 : i32
      %12 = tpu.assume_multiple %11, 8 : i32
      %cst_8 = arith.constant 0.000000e+00 : f32
      %13 = vector.broadcast %cst_8 : f32 to vector<256x8xf32>
      %c256_i32_9 = arith.constant 256 : i32
      %14 = arith.muli %arg9, %c256_i32_9 : i32
      %c23_i32 = arith.constant 23 : i32
      %15 = arith.addi %14, %c23_i32 : i32
      %c0_10 = arith.constant 0 : index
      %16 = arith.index_cast %15 : i32 to index
      %c0_11 = arith.constant 0 : index
      %17 = vector.load %arg2[%c0_10, %16, %c0_11] : memref<1x600x8xf32, #tpu.memory_space<vmem>>, vector<1x256x8xf32>
      %18 = vector.shape_cast %17 : vector<1x256x8xf32> to vector<256x8xf32>
      %c0_12 = arith.constant 0 : index
      %c0_13 = arith.constant 0 : index
      %c0_14 = arith.constant 0 : index
      %19 = vector.load %arg3[%c0_12, %c0_13, %c0_14] : memref<9x8x8xf32, #tpu.memory_space<vmem>>, vector<1x8x8xf32>
      %20 = vector.shape_cast %19 : vector<1x8x8xf32> to vector<8x8xf32>
      %cst_15 = arith.constant dense<0.000000e+00> : vector<256x8xf32>
      %21 = tpu.matmul %18, %20, %cst_15 {dimension_numbers = #tpu.dot_dimension_numbers<[1], [0], [0], [1], [0, 0, 1, 1], [], []>} : vector<256x8xf32>, vector<8x8xf32>, vector<256x8xf32> -> vector<256x8xf32>
      %22 = arith.addf %13, %21 : vector<256x8xf32>
      %c256_i32_16 = arith.constant 256 : i32
      %23 = arith.muli %arg9, %c256_i32_16 : i32
      %c24_i32 = arith.constant 24 : i32
      %24 = arith.addi %23, %c24_i32 : i32
      %25 = tpu.assume_multiple %24, 8 : i32
      %c0_17 = arith.constant 0 : index
      %26 = arith.index_cast %25 : i32 to index
      %c0_18 = arith.constant 0 : index
      %27 = vector.load %arg2[%c0_17, %26, %c0_18] : memref<1x600x8xf32, #tpu.memory_space<vmem>>, vector<1x256x8xf32>
      %28 = vector.shape_cast %27 : vector<1x256x8xf32> to vector<256x8xf32>
      %c1 = arith.constant 1 : index
      %c0_19 = arith.constant 0 : index
      %c0_20 = arith.constant 0 : index
      %29 = vector.load %arg3[%c1, %c0_19, %c0_20] : memref<9x8x8xf32, #tpu.memory_space<vmem>>, vector<1x8x8xf32>
      %30 = vector.shape_cast %29 : vector<1x8x8xf32> to vector<8x8xf32>
      %cst_21 = arith.constant dense<0.000000e+00> : vector<256x8xf32>
      %31 = tpu.matmul %28, %30, %cst_21 {dimension_numbers = #tpu.dot_dimension_numbers<[1], [0], [0], [1], [0, 0, 1, 1], [], []>} : vector<256x8xf32>, vector<8x8xf32>, vector<256x8xf32> -> vector<256x8xf32>
      %32 = arith.addf %22, %31 : vector<256x8xf32>
      %c256_i32_22 = arith.constant 256 : i32
      %33 = arith.muli %arg9, %c256_i32_22 : i32
      %c25_i32 = arith.constant 25 : i32
      %34 = arith.addi %33, %c25_i32 : i32
      %c0_23 = arith.constant 0 : index
      %35 = arith.index_cast %34 : i32 to index
      %c0_24 = arith.constant 0 : index
      %36 = vector.load %arg2[%c0_23, %35, %c0_24] : memref<1x600x8xf32, #tpu.memory_space<vmem>>, vector<1x256x8xf32>
      %37 = vector.shape_cast %36 : vector<1x256x8xf32> to vector<256x8xf32>
      %c2 = arith.constant 2 : index
      %c0_25 = arith.constant 0 : index
      %c0_26 = arith.constant 0 : index
      %38 = vector.load %arg3[%c2, %c0_25, %c0_26] : memref<9x8x8xf32, #tpu.memory_space<vmem>>, vector<1x8x8xf32>
      %39 = vector.shape_cast %38 : vector<1x8x8xf32> to vector<8x8xf32>
      %cst_27 = arith.constant dense<0.000000e+00> : vector<256x8xf32>
      %40 = tpu.matmul %37, %39, %cst_27 {dimension_numbers = #tpu.dot_dimension_numbers<[1], [0], [0], [1], [0, 0, 1, 1], [], []>} : vector<256x8xf32>, vector<8x8xf32>, vector<256x8xf32> -> vector<256x8xf32>
      %41 = arith.addf %32, %40 : vector<256x8xf32>
      %c256_i32_28 = arith.constant 256 : i32
      %42 = arith.muli %arg9, %c256_i32_28 : i32
      %c47_i32 = arith.constant 47 : i32
      %43 = arith.addi %42, %c47_i32 : i32
      %c0_29 = arith.constant 0 : index
      %44 = arith.index_cast %43 : i32 to index
      %c0_30 = arith.constant 0 : index
      %45 = vector.load %arg2[%c0_29, %44, %c0_30] : memref<1x600x8xf32, #tpu.memory_space<vmem>>, vector<1x256x8xf32>
      %46 = vector.shape_cast %45 : vector<1x256x8xf32> to vector<256x8xf32>
      %c3 = arith.constant 3 : index
      %c0_31 = arith.constant 0 : index
      %c0_32 = arith.constant 0 : index
      %47 = vector.load %arg3[%c3, %c0_31, %c0_32] : memref<9x8x8xf32, #tpu.memory_space<vmem>>, vector<1x8x8xf32>
      %48 = vector.shape_cast %47 : vector<1x8x8xf32> to vector<8x8xf32>
      %cst_33 = arith.constant dense<0.000000e+00> : vector<256x8xf32>
      %49 = tpu.matmul %46, %48, %cst_33 {dimension_numbers = #tpu.dot_dimension_numbers<[1], [0], [0], [1], [0, 0, 1, 1], [], []>} : vector<256x8xf32>, vector<8x8xf32>, vector<256x8xf32> -> vector<256x8xf32>
      %50 = arith.addf %41, %49 : vector<256x8xf32>
      %c256_i32_34 = arith.constant 256 : i32
      %51 = arith.muli %arg9, %c256_i32_34 : i32
      %c48_i32_35 = arith.constant 48 : i32
      %52 = arith.addi %51, %c48_i32_35 : i32
      %53 = tpu.assume_multiple %52, 8 : i32
      %c0_36 = arith.constant 0 : index
      %54 = arith.index_cast %53 : i32 to index
      %c0_37 = arith.constant 0 : index
      %55 = vector.load %arg2[%c0_36, %54, %c0_37] : memref<1x600x8xf32, #tpu.memory_space<vmem>>, vector<1x256x8xf32>
      %56 = vector.shape_cast %55 : vector<1x256x8xf32> to vector<256x8xf32>
      %c4 = arith.constant 4 : index
      %c0_38 = arith.constant 0 : index
      %c0_39 = arith.constant 0 : index
      %57 = vector.load %arg3[%c4, %c0_38, %c0_39] : memref<9x8x8xf32, #tpu.memory_space<vmem>>, vector<1x8x8xf32>
      %58 = vector.shape_cast %57 : vector<1x8x8xf32> to vector<8x8xf32>
      %cst_40 = arith.constant dense<0.000000e+00> : vector<256x8xf32>
      %59 = tpu.matmul %56, %58, %cst_40 {dimension_numbers = #tpu.dot_dimension_numbers<[1], [0], [0], [1], [0, 0, 1, 1], [], []>} : vector<256x8xf32>, vector<8x8xf32>, vector<256x8xf32> -> vector<256x8xf32>
      %60 = arith.addf %50, %59 : vector<256x8xf32>
      %c256_i32_41 = arith.constant 256 : i32
      %61 = arith.muli %arg9, %c256_i32_41 : i32
      %c49_i32 = arith.constant 49 : i32
      %62 = arith.addi %61, %c49_i32 : i32
      %c0_42 = arith.constant 0 : index
      %63 = arith.index_cast %62 : i32 to index
      %c0_43 = arith.constant 0 : index
      %64 = vector.load %arg2[%c0_42, %63, %c0_43] : memref<1x600x8xf32, #tpu.memory_space<vmem>>, vector<1x256x8xf32>
      %65 = vector.shape_cast %64 : vector<1x256x8xf32> to vector<256x8xf32>
      %c5 = arith.constant 5 : index
      %c0_44 = arith.constant 0 : index
      %c0_45 = arith.constant 0 : index
      %66 = vector.load %arg3[%c5, %c0_44, %c0_45] : memref<9x8x8xf32, #tpu.memory_space<vmem>>, vector<1x8x8xf32>
      %67 = vector.shape_cast %66 : vector<1x8x8xf32> to vector<8x8xf32>
      %cst_46 = arith.constant dense<0.000000e+00> : vector<256x8xf32>
      %68 = tpu.matmul %65, %67, %cst_46 {dimension_numbers = #tpu.dot_dimension_numbers<[1], [0], [0], [1], [0, 0, 1, 1], [], []>} : vector<256x8xf32>, vector<8x8xf32>, vector<256x8xf32> -> vector<256x8xf32>
      %69 = arith.addf %60, %68 : vector<256x8xf32>
      %c256_i32_47 = arith.constant 256 : i32
      %70 = arith.muli %arg9, %c256_i32_47 : i32
      %c71_i32 = arith.constant 71 : i32
      %71 = arith.addi %70, %c71_i32 : i32
      %c0_48 = arith.constant 0 : index
      %72 = arith.index_cast %71 : i32 to index
      %c0_49 = arith.constant 0 : index
      %73 = vector.load %arg2[%c0_48, %72, %c0_49] : memref<1x600x8xf32, #tpu.memory_space<vmem>>, vector<1x256x8xf32>
      %74 = vector.shape_cast %73 : vector<1x256x8xf32> to vector<256x8xf32>
      %c6 = arith.constant 6 : index
      %c0_50 = arith.constant 0 : index
      %c0_51 = arith.constant 0 : index
      %75 = vector.load %arg3[%c6, %c0_50, %c0_51] : memref<9x8x8xf32, #tpu.memory_space<vmem>>, vector<1x8x8xf32>
      %76 = vector.shape_cast %75 : vector<1x8x8xf32> to vector<8x8xf32>
      %cst_52 = arith.constant dense<0.000000e+00> : vector<256x8xf32>
      %77 = tpu.matmul %74, %76, %cst_52 {dimension_numbers = #tpu.dot_dimension_numbers<[1], [0], [0], [1], [0, 0, 1, 1], [], []>} : vector<256x8xf32>, vector<8x8xf32>, vector<256x8xf32> -> vector<256x8xf32>
      %78 = arith.addf %69, %77 : vector<256x8xf32>
      %c256_i32_53 = arith.constant 256 : i32
      %79 = arith.muli %arg9, %c256_i32_53 : i32
      %c72_i32 = arith.constant 72 : i32
      %80 = arith.addi %79, %c72_i32 : i32
      %81 = tpu.assume_multiple %80, 8 : i32
      %c0_54 = arith.constant 0 : index
      %82 = arith.index_cast %81 : i32 to index
      %c0_55 = arith.constant 0 : index
      %83 = vector.load %arg2[%c0_54, %82, %c0_55] : memref<1x600x8xf32, #tpu.memory_space<vmem>>, vector<1x256x8xf32>
      %84 = vector.shape_cast %83 : vector<1x256x8xf32> to vector<256x8xf32>
      %c7 = arith.constant 7 : index
      %c0_56 = arith.constant 0 : index
      %c0_57 = arith.constant 0 : index
      %85 = vector.load %arg3[%c7, %c0_56, %c0_57] : memref<9x8x8xf32, #tpu.memory_space<vmem>>, vector<1x8x8xf32>
      %86 = vector.shape_cast %85 : vector<1x8x8xf32> to vector<8x8xf32>
      %cst_58 = arith.constant dense<0.000000e+00> : vector<256x8xf32>
      %87 = tpu.matmul %84, %86, %cst_58 {dimension_numbers = #tpu.dot_dimension_numbers<[1], [0], [0], [1], [0, 0, 1, 1], [], []>} : vector<256x8xf32>, vector<8x8xf32>, vector<256x8xf32> -> vector<256x8xf32>
      %88 = arith.addf %78, %87 : vector<256x8xf32>
      %c256_i32_59 = arith.constant 256 : i32
      %89 = arith.muli %arg9, %c256_i32_59 : i32
      %c73_i32 = arith.constant 73 : i32
      %90 = arith.addi %89, %c73_i32 : i32
      %c0_60 = arith.constant 0 : index
      %91 = arith.index_cast %90 : i32 to index
      %c0_61 = arith.constant 0 : index
      %92 = vector.load %arg2[%c0_60, %91, %c0_61] : memref<1x600x8xf32, #tpu.memory_space<vmem>>, vector<1x256x8xf32>
      %93 = vector.shape_cast %92 : vector<1x256x8xf32> to vector<256x8xf32>
      %c8 = arith.constant 8 : index
      %c0_62 = arith.constant 0 : index
      %c0_63 = arith.constant 0 : index
      %94 = vector.load %arg3[%c8, %c0_62, %c0_63] : memref<9x8x8xf32, #tpu.memory_space<vmem>>, vector<1x8x8xf32>
      %95 = vector.shape_cast %94 : vector<1x8x8xf32> to vector<8x8xf32>
      %cst_64 = arith.constant dense<0.000000e+00> : vector<256x8xf32>
      %96 = tpu.matmul %93, %95, %cst_64 {dimension_numbers = #tpu.dot_dimension_numbers<[1], [0], [0], [1], [0, 0, 1, 1], [], []>} : vector<256x8xf32>, vector<8x8xf32>, vector<256x8xf32> -> vector<256x8xf32>
      %97 = arith.addf %88, %96 : vector<256x8xf32>
      %c0_65 = arith.constant 0 : index
      %98 = arith.index_cast %12 : i32 to index
      %c0_66 = arith.constant 0 : index
      %99 = vector.load %arg6[%c0_65, %98, %c0_66] : memref<1x600x4xf32, #tpu.memory_space<vmem>>, vector<1x256x4xf32>
      %100 = vector.shape_cast %99 : vector<1x256x4xf32> to vector<256x4xf32>
      %c0_67 = arith.constant 0 : index
      %c0_68 = arith.constant 0 : index
      %101 = vector.load %arg7[%c0_67, %c0_68] : memref<4x8xf32, #tpu.memory_space<vmem>>, vector<4x8xf32>
      %cst_69 = arith.constant dense<0.000000e+00> : vector<256x8xf32>
      %102 = tpu.matmul %100, %101, %cst_69 {dimension_numbers = #tpu.dot_dimension_numbers<[1], [0], [0], [1], [0, 0, 1, 1], [], []>} : vector<256x4xf32>, vector<4x8xf32>, vector<256x8xf32> -> vector<256x8xf32>
      %103 = arith.addf %97, %102 : vector<256x8xf32>
      %104 = vector.broadcast %8 : vector<1x8xf32> to vector<256x8xf32>
      %105 = arith.addf %103, %104 : vector<256x8xf32>
      %c256_i32_70 = arith.constant 256 : i32
      %106 = arith.muli %arg9, %c256_i32_70 : i32
      %107 = arith.index_cast %106 : i32 to index
      %c0_71 = arith.constant 0 : index
      %108 = vector.load %arg5[%107, %c0_71] : memref<512x1xf32, #tpu.memory_space<vmem>>, vector<256x1xf32>
      %109 = vector.broadcast %108 : vector<256x1xf32> to vector<256x8xf32>
      %110 = arith.mulf %105, %109 : vector<256x8xf32>
      %cst_72 = arith.constant 0.000000e+00 : f32
      %111 = vector.broadcast %cst_72 : f32 to vector<256x8xf32>
      %112 = arith.maximumf %110, %111 : vector<256x8xf32>
      %c0_73 = arith.constant 0 : index
      %113 = arith.index_cast %12 : i32 to index
      %c0_74 = arith.constant 0 : index
      %114 = vector.load %arg8[%c0_73, %113, %c0_74] : memref<1x600x8xf32, #tpu.memory_space<vmem>>, vector<1x256x8xf32>
      %115 = vector.shape_cast %114 : vector<1x256x8xf32> to vector<256x8xf32>
      %116 = vector.shape_cast %112 : vector<256x8xf32> to vector<1x256x8xf32>
      tpu.vector_store %arg8[%c0_73, %113, %c0_74], %116 {strides = array<i32>} : memref<1x600x8xf32, #tpu.memory_space<vmem>>, vector<1x256x8xf32>,
    }
    %c2_i32_7 = arith.constant 2 : i32
    return
  }
  func.func @transform_0(%arg0: i32, %arg1: i32) -> (i32, i32, i32) {
    %c0_i32 = arith.constant 0 : i32
    %c0_i32_0 = arith.constant 0 : i32
    %c0_i32_1 = arith.constant 0 : i32
    return %arg0, %c0_i32, %c0_i32_0 : i32, i32, i32
  }
  func.func @transform_1(%arg0: i32, %arg1: i32) -> (i32, i32, i32) {
    %c0_i32 = arith.constant 0 : i32
    %c0_i32_0 = arith.constant 0 : i32
    %c0_i32_1 = arith.constant 0 : i32
    return %c0_i32, %c0_i32_0, %arg1 : i32, i32, i32
  }
  func.func @transform_2(%arg0: i32, %arg1: i32) -> (i32, i32) {
    %c0_i32 = arith.constant 0 : i32
    %c0_i32_0 = arith.constant 0 : i32
    return %c0_i32, %arg1 : i32, i32
  }
  func.func @transform_3(%arg0: i32, %arg1: i32) -> (i32, i32) {
    %c0_i32 = arith.constant 0 : i32
    %c0_i32_0 = arith.constant 0 : i32
    %c0_i32_1 = arith.constant 0 : i32
    return %c0_i32, %c0_i32_0 : i32, i32
  }
  func.func @transform_4(%arg0: i32, %arg1: i32) -> (i32, i32, i32) {
    %c0_i32 = arith.constant 0 : i32
    %c0_i32_0 = arith.constant 0 : i32
    %c0_i32_1 = arith.constant 0 : i32
    return %arg0, %c0_i32, %c0_i32_0 : i32, i32, i32
  }
  func.func @transform_5(%arg0: i32, %arg1: i32) -> (i32, i32) {
    %c0_i32 = arith.constant 0 : i32
    %c0_i32_0 = arith.constant 0 : i32
    return %c0_i32, %arg1 : i32, i32
  }
  func.func @transform_6(%arg0: i32, %arg1: i32) -> (i32, i32, i32) {
    %c0_i32 = arith.constant 0 : i32
    %c0_i32_0 = arith.constant 0 : i32
    return %arg0, %c0_i32, %arg1 : i32, i32, i32
  }
}

module attributes {stable_mosaic.version = 11 : i64} {
  func.func @_conv_bn_kernel(%arg0: i32, %arg1: i32, %arg2: memref<1x600x4xf32, #tpu.memory_space<vmem>>, %arg3: memref<9x4x8xf32, #tpu.memory_space<vmem>>, %arg4: memref<1x8xf32, #tpu.memory_space<vmem>>, %arg5: memref<512x1xf32, #tpu.memory_space<vmem>>, %arg6: memref<1x600x8xf32, #tpu.memory_space<vmem>>) attributes {dimension_semantics = [#tpu.dimension_semantics<parallel>, #tpu.dimension_semantics<parallel>], iteration_bounds = array<i64: 2, 1>, scalar_prefetch = 0 : i64, scratch_operands = 0 : i64, tpu.core_type = #tpu.core_type<tc>, window_params = [{transform_indices = @transform_0, window_bounds = array<i64: 1, 600, 4>}, {transform_indices = @transform_1, window_bounds = array<i64: 9, 4, 8>}, {transform_indices = @transform_2, window_bounds = array<i64: 1, 8>}, {pipeline_mode = #tpu.pipeline_mode<synchronous>, transform_indices = @transform_3, window_bounds = array<i64: 512, 1>}, {transform_indices = @transform_4, window_bounds = array<i64: 1, 600, 8>}]} {
    %cst = arith.constant 0.000000e+00 : f32
    %0 = vector.broadcast %cst : f32 to vector<48x8xf32>
    %c0 = arith.constant 0 : index
    %c0_0 = arith.constant 0 : index
    %c0_1 = arith.constant 0 : index
    %1 = vector.load %arg6[%c0, %c0_0, %c0_1] : memref<1x600x8xf32, #tpu.memory_space<vmem>>, vector<1x48x8xf32>
    %2 = vector.shape_cast %1 : vector<1x48x8xf32> to vector<48x8xf32>
    %3 = vector.shape_cast %0 : vector<48x8xf32> to vector<1x48x8xf32>
    tpu.vector_store %arg6[%c0, %c0_0, %c0_1], %3 {strides = array<i32>} : memref<1x600x8xf32, #tpu.memory_space<vmem>>, vector<1x48x8xf32>,
    %cst_2 = arith.constant 0.000000e+00 : f32
    %4 = vector.broadcast %cst_2 : f32 to vector<40x8xf32>
    %c0_3 = arith.constant 0 : index
    %c560 = arith.constant 560 : index
    %c0_4 = arith.constant 0 : index
    %5 = vector.load %arg6[%c0_3, %c560, %c0_4] : memref<1x600x8xf32, #tpu.memory_space<vmem>>, vector<1x40x8xf32>
    %6 = vector.shape_cast %5 : vector<1x40x8xf32> to vector<40x8xf32>
    %7 = vector.shape_cast %4 : vector<40x8xf32> to vector<1x40x8xf32>
    tpu.vector_store %arg6[%c0_3, %c560, %c0_4], %7 {strides = array<i32>} : memref<1x600x8xf32, #tpu.memory_space<vmem>>, vector<1x40x8xf32>,
    %c0_5 = arith.constant 0 : index
    %c0_6 = arith.constant 0 : index
    %8 = vector.load %arg4[%c0_5, %c0_6] : memref<1x8xf32, #tpu.memory_space<vmem>>, vector<1x8xf32>
    %c0_i32 = arith.constant 0 : i32
    %c2_i32 = arith.constant 2 : i32
    %9 = arith.addi %c0_i32, %c2_i32 : i32
    %c1_i32 = arith.constant 1 : i32
    scf.for %arg7 = %c0_i32 to %9 step %c1_i32  : i32 {
      %c256_i32 = arith.constant 256 : i32
      %10 = arith.muli %arg7, %c256_i32 : i32
      %c48_i32 = arith.constant 48 : i32
      %11 = arith.addi %c48_i32, %10 : i32
      %12 = tpu.assume_multiple %11, 8 : i32
      %cst_8 = arith.constant 0.000000e+00 : f32
      %13 = vector.broadcast %cst_8 : f32 to vector<256x8xf32>
      %c256_i32_9 = arith.constant 256 : i32
      %14 = arith.muli %arg7, %c256_i32_9 : i32
      %c23_i32 = arith.constant 23 : i32
      %15 = arith.addi %14, %c23_i32 : i32
      %c0_10 = arith.constant 0 : index
      %16 = arith.index_cast %15 : i32 to index
      %c0_11 = arith.constant 0 : index
      %17 = vector.load %arg2[%c0_10, %16, %c0_11] : memref<1x600x4xf32, #tpu.memory_space<vmem>>, vector<1x256x4xf32>
      %18 = vector.shape_cast %17 : vector<1x256x4xf32> to vector<256x4xf32>
      %c0_12 = arith.constant 0 : index
      %c0_13 = arith.constant 0 : index
      %c0_14 = arith.constant 0 : index
      %19 = vector.load %arg3[%c0_12, %c0_13, %c0_14] : memref<9x4x8xf32, #tpu.memory_space<vmem>>, vector<1x4x8xf32>
      %20 = vector.shape_cast %19 : vector<1x4x8xf32> to vector<4x8xf32>
      %cst_15 = arith.constant dense<0.000000e+00> : vector<256x8xf32>
      %21 = tpu.matmul %18, %20, %cst_15 {dimension_numbers = #tpu.dot_dimension_numbers<[1], [0], [0], [1], [0, 0, 1, 1], [], []>} : vector<256x4xf32>, vector<4x8xf32>, vector<256x8xf32> -> vector<256x8xf32>
      %22 = arith.addf %13, %21 : vector<256x8xf32>
      %c256_i32_16 = arith.constant 256 : i32
      %23 = arith.muli %arg7, %c256_i32_16 : i32
      %c24_i32 = arith.constant 24 : i32
      %24 = arith.addi %23, %c24_i32 : i32
      %25 = tpu.assume_multiple %24, 8 : i32
      %c0_17 = arith.constant 0 : index
      %26 = arith.index_cast %25 : i32 to index
      %c0_18 = arith.constant 0 : index
      %27 = vector.load %arg2[%c0_17, %26, %c0_18] : memref<1x600x4xf32, #tpu.memory_space<vmem>>, vector<1x256x4xf32>
      %28 = vector.shape_cast %27 : vector<1x256x4xf32> to vector<256x4xf32>
      %c1 = arith.constant 1 : index
      %c0_19 = arith.constant 0 : index
      %c0_20 = arith.constant 0 : index
      %29 = vector.load %arg3[%c1, %c0_19, %c0_20] : memref<9x4x8xf32, #tpu.memory_space<vmem>>, vector<1x4x8xf32>
      %30 = vector.shape_cast %29 : vector<1x4x8xf32> to vector<4x8xf32>
      %cst_21 = arith.constant dense<0.000000e+00> : vector<256x8xf32>
      %31 = tpu.matmul %28, %30, %cst_21 {dimension_numbers = #tpu.dot_dimension_numbers<[1], [0], [0], [1], [0, 0, 1, 1], [], []>} : vector<256x4xf32>, vector<4x8xf32>, vector<256x8xf32> -> vector<256x8xf32>
      %32 = arith.addf %22, %31 : vector<256x8xf32>
      %c256_i32_22 = arith.constant 256 : i32
      %33 = arith.muli %arg7, %c256_i32_22 : i32
      %c25_i32 = arith.constant 25 : i32
      %34 = arith.addi %33, %c25_i32 : i32
      %c0_23 = arith.constant 0 : index
      %35 = arith.index_cast %34 : i32 to index
      %c0_24 = arith.constant 0 : index
      %36 = vector.load %arg2[%c0_23, %35, %c0_24] : memref<1x600x4xf32, #tpu.memory_space<vmem>>, vector<1x256x4xf32>
      %37 = vector.shape_cast %36 : vector<1x256x4xf32> to vector<256x4xf32>
      %c2 = arith.constant 2 : index
      %c0_25 = arith.constant 0 : index
      %c0_26 = arith.constant 0 : index
      %38 = vector.load %arg3[%c2, %c0_25, %c0_26] : memref<9x4x8xf32, #tpu.memory_space<vmem>>, vector<1x4x8xf32>
      %39 = vector.shape_cast %38 : vector<1x4x8xf32> to vector<4x8xf32>
      %cst_27 = arith.constant dense<0.000000e+00> : vector<256x8xf32>
      %40 = tpu.matmul %37, %39, %cst_27 {dimension_numbers = #tpu.dot_dimension_numbers<[1], [0], [0], [1], [0, 0, 1, 1], [], []>} : vector<256x4xf32>, vector<4x8xf32>, vector<256x8xf32> -> vector<256x8xf32>
      %41 = arith.addf %32, %40 : vector<256x8xf32>
      %c256_i32_28 = arith.constant 256 : i32
      %42 = arith.muli %arg7, %c256_i32_28 : i32
      %c47_i32 = arith.constant 47 : i32
      %43 = arith.addi %42, %c47_i32 : i32
      %c0_29 = arith.constant 0 : index
      %44 = arith.index_cast %43 : i32 to index
      %c0_30 = arith.constant 0 : index
      %45 = vector.load %arg2[%c0_29, %44, %c0_30] : memref<1x600x4xf32, #tpu.memory_space<vmem>>, vector<1x256x4xf32>
      %46 = vector.shape_cast %45 : vector<1x256x4xf32> to vector<256x4xf32>
      %c3 = arith.constant 3 : index
      %c0_31 = arith.constant 0 : index
      %c0_32 = arith.constant 0 : index
      %47 = vector.load %arg3[%c3, %c0_31, %c0_32] : memref<9x4x8xf32, #tpu.memory_space<vmem>>, vector<1x4x8xf32>
      %48 = vector.shape_cast %47 : vector<1x4x8xf32> to vector<4x8xf32>
      %cst_33 = arith.constant dense<0.000000e+00> : vector<256x8xf32>
      %49 = tpu.matmul %46, %48, %cst_33 {dimension_numbers = #tpu.dot_dimension_numbers<[1], [0], [0], [1], [0, 0, 1, 1], [], []>} : vector<256x4xf32>, vector<4x8xf32>, vector<256x8xf32> -> vector<256x8xf32>
      %50 = arith.addf %41, %49 : vector<256x8xf32>
      %c256_i32_34 = arith.constant 256 : i32
      %51 = arith.muli %arg7, %c256_i32_34 : i32
      %c48_i32_35 = arith.constant 48 : i32
      %52 = arith.addi %51, %c48_i32_35 : i32
      %53 = tpu.assume_multiple %52, 8 : i32
      %c0_36 = arith.constant 0 : index
      %54 = arith.index_cast %53 : i32 to index
      %c0_37 = arith.constant 0 : index
      %55 = vector.load %arg2[%c0_36, %54, %c0_37] : memref<1x600x4xf32, #tpu.memory_space<vmem>>, vector<1x256x4xf32>
      %56 = vector.shape_cast %55 : vector<1x256x4xf32> to vector<256x4xf32>
      %c4 = arith.constant 4 : index
      %c0_38 = arith.constant 0 : index
      %c0_39 = arith.constant 0 : index
      %57 = vector.load %arg3[%c4, %c0_38, %c0_39] : memref<9x4x8xf32, #tpu.memory_space<vmem>>, vector<1x4x8xf32>
      %58 = vector.shape_cast %57 : vector<1x4x8xf32> to vector<4x8xf32>
      %cst_40 = arith.constant dense<0.000000e+00> : vector<256x8xf32>
      %59 = tpu.matmul %56, %58, %cst_40 {dimension_numbers = #tpu.dot_dimension_numbers<[1], [0], [0], [1], [0, 0, 1, 1], [], []>} : vector<256x4xf32>, vector<4x8xf32>, vector<256x8xf32> -> vector<256x8xf32>
      %60 = arith.addf %50, %59 : vector<256x8xf32>
      %c256_i32_41 = arith.constant 256 : i32
      %61 = arith.muli %arg7, %c256_i32_41 : i32
      %c49_i32 = arith.constant 49 : i32
      %62 = arith.addi %61, %c49_i32 : i32
      %c0_42 = arith.constant 0 : index
      %63 = arith.index_cast %62 : i32 to index
      %c0_43 = arith.constant 0 : index
      %64 = vector.load %arg2[%c0_42, %63, %c0_43] : memref<1x600x4xf32, #tpu.memory_space<vmem>>, vector<1x256x4xf32>
      %65 = vector.shape_cast %64 : vector<1x256x4xf32> to vector<256x4xf32>
      %c5 = arith.constant 5 : index
      %c0_44 = arith.constant 0 : index
      %c0_45 = arith.constant 0 : index
      %66 = vector.load %arg3[%c5, %c0_44, %c0_45] : memref<9x4x8xf32, #tpu.memory_space<vmem>>, vector<1x4x8xf32>
      %67 = vector.shape_cast %66 : vector<1x4x8xf32> to vector<4x8xf32>
      %cst_46 = arith.constant dense<0.000000e+00> : vector<256x8xf32>
      %68 = tpu.matmul %65, %67, %cst_46 {dimension_numbers = #tpu.dot_dimension_numbers<[1], [0], [0], [1], [0, 0, 1, 1], [], []>} : vector<256x4xf32>, vector<4x8xf32>, vector<256x8xf32> -> vector<256x8xf32>
      %69 = arith.addf %60, %68 : vector<256x8xf32>
      %c256_i32_47 = arith.constant 256 : i32
      %70 = arith.muli %arg7, %c256_i32_47 : i32
      %c71_i32 = arith.constant 71 : i32
      %71 = arith.addi %70, %c71_i32 : i32
      %c0_48 = arith.constant 0 : index
      %72 = arith.index_cast %71 : i32 to index
      %c0_49 = arith.constant 0 : index
      %73 = vector.load %arg2[%c0_48, %72, %c0_49] : memref<1x600x4xf32, #tpu.memory_space<vmem>>, vector<1x256x4xf32>
      %74 = vector.shape_cast %73 : vector<1x256x4xf32> to vector<256x4xf32>
      %c6 = arith.constant 6 : index
      %c0_50 = arith.constant 0 : index
      %c0_51 = arith.constant 0 : index
      %75 = vector.load %arg3[%c6, %c0_50, %c0_51] : memref<9x4x8xf32, #tpu.memory_space<vmem>>, vector<1x4x8xf32>
      %76 = vector.shape_cast %75 : vector<1x4x8xf32> to vector<4x8xf32>
      %cst_52 = arith.constant dense<0.000000e+00> : vector<256x8xf32>
      %77 = tpu.matmul %74, %76, %cst_52 {dimension_numbers = #tpu.dot_dimension_numbers<[1], [0], [0], [1], [0, 0, 1, 1], [], []>} : vector<256x4xf32>, vector<4x8xf32>, vector<256x8xf32> -> vector<256x8xf32>
      %78 = arith.addf %69, %77 : vector<256x8xf32>
      %c256_i32_53 = arith.constant 256 : i32
      %79 = arith.muli %arg7, %c256_i32_53 : i32
      %c72_i32 = arith.constant 72 : i32
      %80 = arith.addi %79, %c72_i32 : i32
      %81 = tpu.assume_multiple %80, 8 : i32
      %c0_54 = arith.constant 0 : index
      %82 = arith.index_cast %81 : i32 to index
      %c0_55 = arith.constant 0 : index
      %83 = vector.load %arg2[%c0_54, %82, %c0_55] : memref<1x600x4xf32, #tpu.memory_space<vmem>>, vector<1x256x4xf32>
      %84 = vector.shape_cast %83 : vector<1x256x4xf32> to vector<256x4xf32>
      %c7 = arith.constant 7 : index
      %c0_56 = arith.constant 0 : index
      %c0_57 = arith.constant 0 : index
      %85 = vector.load %arg3[%c7, %c0_56, %c0_57] : memref<9x4x8xf32, #tpu.memory_space<vmem>>, vector<1x4x8xf32>
      %86 = vector.shape_cast %85 : vector<1x4x8xf32> to vector<4x8xf32>
      %cst_58 = arith.constant dense<0.000000e+00> : vector<256x8xf32>
      %87 = tpu.matmul %84, %86, %cst_58 {dimension_numbers = #tpu.dot_dimension_numbers<[1], [0], [0], [1], [0, 0, 1, 1], [], []>} : vector<256x4xf32>, vector<4x8xf32>, vector<256x8xf32> -> vector<256x8xf32>
      %88 = arith.addf %78, %87 : vector<256x8xf32>
      %c256_i32_59 = arith.constant 256 : i32
      %89 = arith.muli %arg7, %c256_i32_59 : i32
      %c73_i32 = arith.constant 73 : i32
      %90 = arith.addi %89, %c73_i32 : i32
      %c0_60 = arith.constant 0 : index
      %91 = arith.index_cast %90 : i32 to index
      %c0_61 = arith.constant 0 : index
      %92 = vector.load %arg2[%c0_60, %91, %c0_61] : memref<1x600x4xf32, #tpu.memory_space<vmem>>, vector<1x256x4xf32>
      %93 = vector.shape_cast %92 : vector<1x256x4xf32> to vector<256x4xf32>
      %c8 = arith.constant 8 : index
      %c0_62 = arith.constant 0 : index
      %c0_63 = arith.constant 0 : index
      %94 = vector.load %arg3[%c8, %c0_62, %c0_63] : memref<9x4x8xf32, #tpu.memory_space<vmem>>, vector<1x4x8xf32>
      %95 = vector.shape_cast %94 : vector<1x4x8xf32> to vector<4x8xf32>
      %cst_64 = arith.constant dense<0.000000e+00> : vector<256x8xf32>
      %96 = tpu.matmul %93, %95, %cst_64 {dimension_numbers = #tpu.dot_dimension_numbers<[1], [0], [0], [1], [0, 0, 1, 1], [], []>} : vector<256x4xf32>, vector<4x8xf32>, vector<256x8xf32> -> vector<256x8xf32>
      %97 = arith.addf %88, %96 : vector<256x8xf32>
      %98 = vector.broadcast %8 : vector<1x8xf32> to vector<256x8xf32>
      %99 = arith.addf %97, %98 : vector<256x8xf32>
      %c256_i32_65 = arith.constant 256 : i32
      %100 = arith.muli %arg7, %c256_i32_65 : i32
      %101 = arith.index_cast %100 : i32 to index
      %c0_66 = arith.constant 0 : index
      %102 = vector.load %arg5[%101, %c0_66] : memref<512x1xf32, #tpu.memory_space<vmem>>, vector<256x1xf32>
      %103 = vector.broadcast %102 : vector<256x1xf32> to vector<256x8xf32>
      %104 = arith.mulf %99, %103 : vector<256x8xf32>
      %cst_67 = arith.constant 0.000000e+00 : f32
      %105 = vector.broadcast %cst_67 : f32 to vector<256x8xf32>
      %106 = arith.maximumf %104, %105 : vector<256x8xf32>
      %c0_68 = arith.constant 0 : index
      %107 = arith.index_cast %12 : i32 to index
      %c0_69 = arith.constant 0 : index
      %108 = vector.load %arg6[%c0_68, %107, %c0_69] : memref<1x600x8xf32, #tpu.memory_space<vmem>>, vector<1x256x8xf32>
      %109 = vector.shape_cast %108 : vector<1x256x8xf32> to vector<256x8xf32>
      %110 = vector.shape_cast %106 : vector<256x8xf32> to vector<1x256x8xf32>
      tpu.vector_store %arg6[%c0_68, %107, %c0_69], %110 {strides = array<i32>} : memref<1x600x8xf32, #tpu.memory_space<vmem>>, vector<1x256x8xf32>,
    }
    %c2_i32_7 = arith.constant 2 : i32
    return
  }
  func.func @transform_0(%arg0: i32, %arg1: i32) -> (i32, i32, i32) {
    %c0_i32 = arith.constant 0 : i32
    %c0_i32_0 = arith.constant 0 : i32
    %c0_i32_1 = arith.constant 0 : i32
    return %arg0, %c0_i32, %c0_i32_0 : i32, i32, i32
  }
  func.func @transform_1(%arg0: i32, %arg1: i32) -> (i32, i32, i32) {
    %c0_i32 = arith.constant 0 : i32
    %c0_i32_0 = arith.constant 0 : i32
    %c0_i32_1 = arith.constant 0 : i32
    return %c0_i32, %c0_i32_0, %arg1 : i32, i32, i32
  }
  func.func @transform_2(%arg0: i32, %arg1: i32) -> (i32, i32) {
    %c0_i32 = arith.constant 0 : i32
    %c0_i32_0 = arith.constant 0 : i32
    return %c0_i32, %arg1 : i32, i32
  }
  func.func @transform_3(%arg0: i32, %arg1: i32) -> (i32, i32) {
    %c0_i32 = arith.constant 0 : i32
    %c0_i32_0 = arith.constant 0 : i32
    %c0_i32_1 = arith.constant 0 : i32
    return %c0_i32, %c0_i32_0 : i32, i32
  }
  func.func @transform_4(%arg0: i32, %arg1: i32) -> (i32, i32, i32) {
    %c0_i32 = arith.constant 0 : i32
    %c0_i32_0 = arith.constant 0 : i32
    return %arg0, %c0_i32, %arg1 : i32, i32, i32
  }
}

</mosaic_0001>

<bundles_post_ra>
// kernel: resblock_forward.2
= control target key start
LH: loop header
LB: loop body
LE: loop exit
PB: predicated region body
PF: predicated region fallthrough
CT: control target
= control target key end

     0   :  { %s5697_s15 = smov 0   ;;  %s5699_s16 = smov 0   ;;  %s7392_s0 = inlined_call_operand.vmem [shape: f32[2,600,4], index: 0, kind: input, shape index: {}]   ;;  %s7393_s1 = inlined_call_operand.vmem [shape: f32[9,4,8], index: 1, kind: input, shape index: {}]   ;;  %s7394_s2 = inlined_call_operand.vmem [shape: f32[1,8], index: 2, kind: input, shape index: {}]   ;;  %s7395_s3 = inlined_call_operand.vmem [shape: f32[512,1], index: 3, kind: input, shape index: {}]   ;;  %s7396_s4 = inlined_call_operand.vmem [shape: f32[2,600,8], index: 4, kind: output, shape index: {}]  }
   0x1   :  { %s5701_s17 = smov 0  }
   0x2 LB: > { %s26_s18 = sadd.s32 1, %s5660_s16  ;;  %p4210_p0 = scmp.ge.s32.totalorder %s5664_s17, 1  ;;  %s5664_s17 = sphi %s5701_s17, %s14_s17   ;;  %s5660_s16 = sphi %s5699_s16, %s7631_s16   ;;  %s5656_s15 = sphi %s5697_s15, %s7630_s15  }
   0x3   : > { %p28_p1 = scmp.ge.s32.totalorder %s26_s18, 2  ;;  %p193_p2 = scmp.lt.s32.totalorder %s5664_s17, 3 }
   0x5   : > { %s7633_s18 = smov (%p28_p1, %s26_s18), 0  ;;  %p194_p3 = pnand %p4210_p0, %p193_p2 }
   0x6   : > { %p229_p4 = scmp.lt.s32.totalorder (!%p194_p3), %s5656_s15, 1  ;;  %s5752_s28 = smov (!%p194_p3), 0  }
   0x7   : > { %197 = sbr.rel (%p194_p3) target bundleno = 517 (0x205), region = 36 }
   0xc   : > { %v5718_v0 = vld [vmem:[%s7394_s2] ss:$0 sm:$0xff]  ;;  %s7635_s15 = smov (!%p229_p4, %s5656_s15), 1  ;;  %vm249_vm0 = vcmask 64512   ;;  %v5670_v1 = vmov 0.0  }
   0xd   : > { %7450 = vst [vmem:[#allocation2_spill] sm:$0xff] %v5718_v0  ;;  %s5601_s21 = smul.u32 600, %s7635_s15 }
   0xf   : > { %s5723_s24 = scalar_lea.vmem %s7392_s0, %s5601_s21  ;;  %s5728_s27 = scalar_lea.vmem %s7396_s4, %s5601_s21 }
  0x10   : > { %250 = vst.msk [vmem:[%s5728_s27] sm:$0xff] %vm249_vm0, %v5670_v1  ;;  %251 = vst.msk [vmem:[%s5728_s27 + $0x8] sm:$0xff] %vm249_vm0, %v5670_v1 }
  0x11   : > { %252 = vst.msk [vmem:[%s5728_s27 + $0x10] sm:$0xff] %vm249_vm0, %v5670_v1  ;;  %253 = vst.msk [vmem:[%s5728_s27 + $0x18] sm:$0xff] %vm249_vm0, %v5670_v1 }
  0x12   : > { %254 = vst.msk [vmem:[%s5728_s27 + $0x20] sm:$0xff] %vm249_vm0, %v5670_v1  ;;  %255 = vst.msk [vmem:[%s5728_s27 + $0x28] sm:$0xff] %vm249_vm0, %v5670_v1 }
  0x13   : > { %256 = vst.msk [vmem:[%s5728_s27 + $0x230] sm:$0xff] %vm249_vm0, %v5670_v1  ;;  %257 = vst.msk [vmem:[%s5728_s27 + $0x238] sm:$0xff] %vm249_vm0, %v5670_v1 }
  0x14   : > { %258 = vst.msk [vmem:[%s5728_s27 + $0x240] sm:$0xff] %vm249_vm0, %v5670_v1  ;;  %259 = vst.msk [vmem:[%s5728_s27 + $0x248] sm:$0xff] %vm249_vm0, %v5670_v1 }
  0x15   : > { %260 = vst.msk [vmem:[%s5728_s27 + $0x250] sm:$0xff] %vm249_vm0, %v5670_v1 }
  0x16 LB: >> { %v4280_v2 = vld [vmem:[%s7393_s1 + $0x4] sm:$0xf]  ;;  %vm438_vm1 = vcmask 1043456   ;;  %v304_v3 = vld [vmem:[%s7393_s1] sm:$0xf]  ;;  %s5771_s9 = sshll.u32 %s5668_s28, 8  ;;  %s5668_s28 = sphi %s5752_s28, %s267_s28  }
  0x17   : >> { %5599 = vmatprep.subr.msk.mxu1 %vm438_vm1, %v4280_v2  ;;  %5149 = vmatprep.subr.msk.mxu0 %vm438_vm1, %v4280_v2  ;;  %v4380_v4 = vld [vmem:[%s7393_s1 + $0x8] sm:$0xf]  ;;  %vm341_vm2 = vcmask 31744   ;;  %s5775_s10 = scalar_lea.vmem %s5723_s24, %s5771_s9  ;;  %v5800_v11 = vld [vmem:[%s7393_s1 + $0xc] sm:$0xf]  ;;  %s6324_s5 = scalar_lea.vmem %s7395_s3, %s5771_s9 }
  0x18   : >> { %5600 = vmatpush3.msk.msra.mxu1 %vm438_vm1, %v4280_v2  ;;  %5150 = vmatpush3.msk.msra.mxu0 %vm438_vm1, %v4280_v2  ;;  %v4248_v5 = vld [vmem:[%s5775_s10 + $0x18] sm:$0xff]  ;;  %v4249_v7 = vld [vmem:[%s5775_s10 + $0x20] sm:$0xff]  ;;  %v4250_v9 = vld [vmem:[%s5775_s10 + $0x28] sm:$0xff]  ;;  %s7169_s6 = scalar_lea.vmem %s5728_s27, %s5771_s9  ;;  %s267_s28 = sadd.s32 1, %s5668_s28  }
  0x19   : >> { %5199 = vmatprep.subr.msk.mxu1 %vm438_vm1, %v304_v3  ;;  %5249 = vmatprep.subr.msk.mxu0 %vm438_vm1, %v4380_v4  ;;  %v5781_v6 = vld [vmem:[%s5775_s10 + $0x98] sm:$0xff]  ;;  %v5788_v8 = vld [vmem:[%s5775_s10 + $0xa0] sm:$0xff]  ;;  %v5792_v10 = vld [vmem:[%s5775_s10 + $0xa8] sm:$0xff]  ;;  %p264_p5 = scmp.ge.s32.totalorder %s267_s28, 2  }
  0x1a   : >> { %5151 = vmatprep.mubr.msk.f32.mxu0 %vm341_vm2, %v4248_v5  ;;  %5175 = vmatprep.mubr.msk.f32.mxu1 %vm341_vm2, %v5781_v6  ;;  %v5805_v12 = vld [vmem:[%s7393_s1 + $0x10] sm:$0xf]  ;;  %v5819_v15 = vld [vmem:[%s5775_s10 + $0x38] sm:$0xff]  ;;  %v5837_v17 = vld [vmem:[%s5775_s10 + $0x40] sm:$0xff] }
  0x1b   : >> { %5152 = vmatmul.mubr.msk.f32.vlgmr.msra.gmra.mxu0 %vm341_vm2, %v4249_v7  ;;  %5176 = vmatmul.mubr.msk.f32.vlgmr.msra.gmra.mxu1 %vm341_vm2, %v5788_v8  ;;  %v5810_v13 = vld [vmem:[%s5775_s10 + $0x30] sm:$0xff]  ;;  %v5822_v16 = vld [vmem:[%s5775_s10 + $0xb8] sm:$0xff]  ;;  %v5840_v18 = vld [vmem:[%s5775_s10 + $0xc0] sm:$0xff] }
  0x1c   : >> { %5200 = vmatpush3.msk.msra.mxu1 %vm438_vm1, %v304_v3  ;;  %5250 = vmatpush3.msk.msra.mxu0 %vm438_vm1, %v4380_v4  ;;  %v5813_v14 = vld [vmem:[%s5775_s10 + $0xb0] sm:$0xff]  ;;  %v5843_v19 = vld [vmem:[%s5775_s10 + $0x48] sm:$0xff]  ;;  %v5863_v23 = vld [vmem:[%s5775_s10 + $0x58] sm:$0xff] }
  0x1d   : >> { %5154 = vmatprep.mubr.msk.f32.mxu0 %vm341_vm2, %v4250_v9  ;;  %5178 = vmatprep.mubr.msk.f32.mxu1 %vm341_vm2, %v5792_v10  ;;  %v5846_v20 = vld [vmem:[%s5775_s10 + $0xc8] sm:$0xff]  ;;  %v5857_v21 = vld [vmem:[%s5775_s10 + $0x50] sm:$0xff]  ;;  %v5866_v24 = vld [vmem:[%s5775_s10 + $0xd8] sm:$0xff] }
  0x1e   : >> { %5299 = vmatprep.subr.msk.mxu1 %vm438_vm1, %v5800_v11  ;;  %5349 = vmatprep.subr.msk.mxu0 %vm438_vm1, %v5805_v12  ;;  %v5860_v22 = vld [vmem:[%s5775_s10 + $0xd0] sm:$0xff]  ;;  %v5877_v25 = vld [vmem:[%s5775_s10 + $0x60] sm:$0xff]  ;;  %v5883_v27 = vld [vmem:[%s5775_s10 + $0x68] sm:$0xff] }
  0x1f   : >> { %5155 = vmatmul.mubr.msk.f32.gmra.mxu0 %vm341_vm2, %v5810_v13  ;;  %5179 = vmatmul.mubr.msk.f32.gmra.mxu1 %vm341_vm2, %v5813_v14  ;;  %v5880_v26 = vld [vmem:[%s5775_s10 + $0xe0] sm:$0xff]  ;;  %v5886_v28 = vld [vmem:[%s5775_s10 + $0xe8] sm:$0xff]  ;;  %v5897_v29 = vld [vmem:[%s5775_s10 + $0x70] sm:$0xff] }
  0x20   : >> { %5157 = vmatprep.mubr.msk.f32.mxu0 %vm341_vm2, %v5819_v15  ;;  %5181 = vmatprep.mubr.msk.f32.mxu1 %vm341_vm2, %v5822_v16  ;;  %v5900_v30 = vld [vmem:[%s5775_s10 + $0xf0] sm:$0xff]  ;;  %v5903_v31 = vld [vmem:[%s5775_s10 + $0x78] sm:$0xff]  ;;  %v5917_v33 = vld [vmem:[%s5775_s10 + $0x80] sm:$0xff] }
  0x21   : >> { %v5906_v32 = vld [vmem:[%s5775_s10 + $0xf8] sm:$0xff]  ;;  %v5920_v34 = vld [vmem:[%s5775_s10 + $0x100] sm:$0xff]  ;;  %v5923_v35 = vld [vmem:[%s5775_s10 + $0x88] sm:$0xff] }
  0x22   : >> { %v5926_v36 = vld [vmem:[%s5775_s10 + $0x108] sm:$0xff]  ;;  %v5937_v37 = vld [vmem:[%s5775_s10 + $0x90] sm:$0xff]  ;;  %v4348_v40 = vld [vmem:[%s5775_s10 + $0x19] sm:$0xff] }
  0x23   : >> { %5158 = vmatmul.mubr.msk.f32.gmra.mxu0 %vm341_vm2, %v5837_v17  ;;  %5182 = vmatmul.mubr.msk.f32.gmra.mxu1 %vm341_vm2, %v5840_v18  ;;  %v5940_v38 = vld [vmem:[%s5775_s10 + $0x110] sm:$0xff]  ;;  %v4216_v41 = vld [vmem:[%s5775_s10 + $0x1f] sm:$0xff]  ;;  %v4217_v43 = vld [vmem:[%s5775_s10 + $0x27] sm:$0xff] }
  0x24   : >> { %5160 = vmatprep.mubr.msk.f32.mxu0 %vm341_vm2, %v5843_v19  ;;  %5184 = vmatprep.mubr.msk.f32.mxu1 %vm341_vm2, %v5846_v20  ;;  %v4215_v39 = vld [vmem:[%s5775_s10 + $0x17] sm:$0xff]  ;;  %v4349_v42 = vld [vmem:[%s5775_s10 + $0x21] sm:$0xff]  ;;  %v4350_v44 = vld [vmem:[%s5775_s10 + $0x29] sm:$0xff] }
  0x25   : >> { %v5959_v45 = vld [vmem:[%s7393_s1 + $0x14] sm:$0xf]  ;;  %v5964_v46 = vld [vmem:[%s7393_s1 + $0x18] sm:$0xf]  ;;  %v5997_v51 = vld [vmem:[%s5775_s10 + $0x3f] sm:$0xff] }
  0x26   : >> { %v5971_v47 = vld [vmem:[%s5775_s10 + $0x2f] sm:$0xff]  ;;  %v5979_v49 = vld [vmem:[%s5775_s10 + $0x37] sm:$0xff]  ;;  %v6000_v52 = vld [vmem:[%s5775_s10 + $0x41] sm:$0xff] }
  0x27   : >> { %5161 = vmatmul.mubr.msk.f32.gmra.mxu0 %vm341_vm2, %v5857_v21  ;;  %5185 = vmatmul.mubr.msk.f32.gmra.mxu1 %vm341_vm2, %v5860_v22  ;;  %v5974_v48 = vld [vmem:[%s5775_s10 + $0x31] sm:$0xff]  ;;  %v5982_v50 = vld [vmem:[%s5775_s10 + $0x39] sm:$0xff]  ;;  %7452 = vst [vmem:[#allocation4_spill] sm:$0xff] %v6000_v52  ;;  %v6003_v53 = vld [vmem:[%s5775_s10 + $0x47] sm:$0xff] }
  0x28   : >> { %5163 = vmatprep.mubr.msk.f32.mxu0 %vm341_vm2, %v5863_v23  ;;  %5187 = vmatprep.mubr.msk.f32.mxu1 %vm341_vm2, %v5866_v24  ;;  %7451 = vst [vmem:[#allocation3_spill] sm:$0xff] %v5982_v50  ;;  %v6006_v54 = vld [vmem:[%s5775_s10 + $0x49] sm:$0xff]  ;;  %v6020_v56 = vld [vmem:[%s5775_s10 + $0x51] sm:$0xff]  ;;  %v6026_v58 = vld [vmem:[%s5775_s10 + $0x59] sm:$0xff] }
  0x29   : >> { %7453 = vst [vmem:[#allocation5_spill] sm:$0xff] %v6006_v54  ;;  %v6017_v55 = vld [vmem:[%s5775_s10 + $0x4f] sm:$0xff]  ;;  %7454 = vst [vmem:[#allocation6_spill] sm:$0xff] %v6020_v56  ;;  %v6023_v57 = vld [vmem:[%s5775_s10 + $0x57] sm:$0xff] }
  0x2a   : >> { %7455 = vst [vmem:[#allocation7_spill] sm:$0xff] %v6026_v58  ;;  %v6037_v59 = vld [vmem:[%s5775_s10 + $0x5f] sm:$0xff]  ;;  %v6043_v61 = vld [vmem:[%s5775_s10 + $0x67] sm:$0xff]  ;;  %v6057_v63 = vld [vmem:[%s5775_s10 + $0x6f] sm:$0xff] }
  0x2b   : >> { %5164 = vmatmul.mubr.msk.f32.gmra.mxu0 %vm341_vm2, %v5877_v25  ;;  %5188 = vmatmul.mubr.msk.f32.gmra.mxu1 %vm341_vm2, %v5880_v26  ;;  %v6040_v60 = vld [vmem:[%s5775_s10 + $0x61] sm:$0xff]  ;;  %v6046_v62 = vld [vmem:[%s5775_s10 + $0x69] sm:$0xff]  ;;  %v6060_v1 = vld [vmem:[%s5775_s10 + $0x71] sm:$0xff] }
  0x2c   : >> { %5166 = vmatprep.mubr.msk.f32.mxu0 %vm341_vm2, %v5883_v27  ;;  %5190 = vmatprep.mubr.msk.f32.mxu1 %vm341_vm2, %v5886_v28  ;;  %7456 = vst [vmem:[#allocation8_spill] sm:$0xff] %v6040_v60  ;;  %7457 = vst [vmem:[#allocation9_spill] sm:$0xff] %v6046_v62  ;;  %v6063_v2 = vld [vmem:[%s5775_s10 + $0x77] sm:$0xff]  ;;  %v6077_v4 = vld [vmem:[%s5775_s10 + $0x7f] sm:$0xff] }
  0x2d   : >> { %7458 = vst [vmem:[#allocation10_spill] sm:$0xff] %v6060_v1  ;;  %v6066_v3 = vld [vmem:[%s5775_s10 + $0x79] sm:$0xff]  ;;  %v6080_v5 = vld [vmem:[%s5775_s10 + $0x81] sm:$0xff]  ;;  %v6086_v9 = vld [vmem:[%s5775_s10 + $0x89] sm:$0xff] }
  0x2e   : >> { %7459 = vst [vmem:[#allocation11_spill] sm:$0xff] %v6066_v3  ;;  %7460 = vst [vmem:[#allocation12_spill] sm:$0xff] %v6080_v5  ;;  %v6083_v7 = vld [vmem:[%s5775_s10 + $0x87] sm:$0xff]  ;;  %v6137_v0 = vld [vmem:[%s5775_s10 + $0xaf] sm:$0xff] }
  0x2f   : >> { %5167 = vmatmul.mubr.msk.f32.gmra.mxu0 %vm341_vm2, %v5897_v29  ;;  %5191 = vmatmul.mubr.msk.f32.gmra.mxu1 %vm341_vm2, %v5900_v30  ;;  %7461 = vst [vmem:[#allocation13_spill] sm:$0xff] %v6086_v9 }
  0x30   : >> { %5169 = vmatprep.mubr.msk.f32.mxu0 %vm341_vm2, %v5903_v31  ;;  %5193 = vmatprep.mubr.msk.f32.mxu1 %vm341_vm2, %v5906_v32 }
  0x33   : >> { %5170 = vmatmul.mubr.msk.f32.gmra.mxu0 %vm341_vm2, %v5917_v33  ;;  %5194 = vmatmul.mubr.msk.f32.gmra.mxu1 %vm341_vm2, %v5920_v34 }
  0x34   : >> { %5172 = vmatprep.mubr.msk.f32.mxu0 %vm341_vm2, %v5923_v35  ;;  %5196 = vmatprep.mubr.msk.f32.mxu1 %vm341_vm2, %v5926_v36 }
  0x37   : >> { %5173 = vmatmul.mubr.msk.f32.gmra.mxu0 %vm341_vm2, %v5937_v37  ;;  %5197 = vmatmul.mubr.msk.f32.gmra.mxu1 %vm341_vm2, %v5940_v38 }
  0x38   : >> { %5201 = vmatprep.mubr.msk.f32.mxu1 %vm341_vm2, %v4215_v39  ;;  %5251 = vmatprep.mubr.msk.f32.mxu0 %vm341_vm2, %v4348_v40  ;;  %v6103_v39 = vld [vmem:[%s5775_s10 + $0x97] sm:$0xff] }
  0x39   : >> { %v6106_v40 = vld [vmem:[%s5775_s10 + $0x99] sm:$0xff] }
  0x3a   : >> { %7463 = vst [vmem:[#allocation15_spill] sm:$0xff] %v6106_v40 }
  0x3b   : >> { %5202 = vmatmul.mubr.msk.f32.vlgmr.msra.gmra.mxu1 %vm341_vm2, %v4216_v41  ;;  %5252 = vmatmul.mubr.msk.f32.vlgmr.msra.gmra.mxu0 %vm341_vm2, %v4349_v42  ;;  %v6117_v41 = vld [vmem:[%s5775_s10 + $0x9f] sm:$0xff] }
  0x3c   : >> { %5300 = vmatpush3.msk.msra.mxu1 %vm438_vm1, %v5800_v11  ;;  %5350 = vmatpush3.msk.msra.mxu0 %vm438_vm1, %v5805_v12  ;;  %v6097_v11 = vld [vmem:[%s5775_s10 + $0x8f] sm:$0xff]  ;;  %v6120_v42 = vld [vmem:[%s5775_s10 + $0xa1] sm:$0xff] }
  0x3d   : >> { %5204 = vmatprep.mubr.msk.f32.mxu1 %vm341_vm2, %v4217_v43  ;;  %5254 = vmatprep.mubr.msk.f32.mxu0 %vm341_vm2, %v4350_v44  ;;  %v6100_v12 = vld [vmem:[%s5775_s10 + $0x91] sm:$0xff]  ;;  %7464 = vst [vmem:[#allocation16_spill] sm:$0xff] %v6120_v42  ;;  %v6123_v43 = vld [vmem:[%s5775_s10 + $0xa7] sm:$0xff] }
  0x3e   : >> { %5399 = vmatprep.subr.msk.mxu1 %vm438_vm1, %v5959_v45  ;;  %5449 = vmatprep.subr.msk.mxu0 %vm438_vm1, %v5964_v46  ;;  %7462 = vst [vmem:[#allocation14_spill] sm:$0xff] %v6100_v12  ;;  %v6126_v44 = vld [vmem:[%s5775_s10 + $0xa9] sm:$0xff] }
  0x3f   : >> { %5205 = vmatmul.mubr.msk.f32.gmra.mxu1 %vm341_vm2, %v5971_v47  ;;  %5255 = vmatmul.mubr.msk.f32.gmra.mxu0 %vm341_vm2, %v5974_v48  ;;  %7465 = vst [vmem:[#allocation17_spill] sm:$0xff] %v6126_v44 }
  0x40   : >> { %5207 = vmatprep.mubr.msk.f32.mxu1 %vm341_vm2, %v5979_v49  ;;  %5257 = vmatprep.mubr.msk.f32.mxu0 %vm341_vm2, %v5982_v50  ;;  %v6246_v50 = vld [vmem:[%s5775_s10 + $0x109] sm:$0xff] }
  0x41   : >> { %7476 = vst [vmem:[#allocation28_spill] sm:$0xff] %v6246_v50 }
  0x43   : >> { %5208 = vmatmul.mubr.msk.f32.gmra.mxu1 %vm341_vm2, %v5997_v51  ;;  %5258 = vmatmul.mubr.msk.f32.gmra.mxu0 %vm341_vm2, %v6000_v52  ;;  %v6243_v52 = vld [vmem:[%s5775_s10 + $0x107] sm:$0xff] }
  0x44   : >> { %5210 = vmatprep.mubr.msk.f32.mxu1 %vm341_vm2, %v6003_v53  ;;  %5260 = vmatprep.mubr.msk.f32.mxu0 %vm341_vm2, %v6006_v54  ;;  %v6226_v54 = vld [vmem:[%s5775_s10 + $0xf9] sm:$0xff] }
  0x45   : >> { %7475 = vst [vmem:[#allocation27_spill] sm:$0xff] %v6226_v54 }
  0x47   : >> { %5211 = vmatmul.mubr.msk.f32.gmra.mxu1 %vm341_vm2, %v6017_v55  ;;  %5261 = vmatmul.mubr.msk.f32.gmra.mxu0 %vm341_vm2, %v6020_v56  ;;  %v6223_v56 = vld [vmem:[%s5775_s10 + $0xf7] sm:$0xff] }
  0x48   : >> { %5213 = vmatprep.mubr.msk.f32.mxu1 %vm341_vm2, %v6023_v57  ;;  %5263 = vmatprep.mubr.msk.f32.mxu0 %vm341_vm2, %v6026_v58  ;;  %v6206_v58 = vld [vmem:[%s5775_s10 + $0xe9] sm:$0xff] }
  0x49   : >> { %7473 = vst [vmem:[#allocation25_spill] sm:$0xff] %v6206_v58 }
  0x4b   : >> { %5214 = vmatmul.mubr.msk.f32.gmra.mxu1 %vm341_vm2, %v6037_v59  ;;  %5264 = vmatmul.mubr.msk.f32.gmra.mxu0 %vm341_vm2, %v6040_v60  ;;  %v6203_v60 = vld [vmem:[%s5775_s10 + $0xe7] sm:$0xff] }
  0x4c   : >> { %5216 = vmatprep.mubr.msk.f32.mxu1 %vm341_vm2, %v6043_v61  ;;  %5266 = vmatprep.mubr.msk.f32.mxu0 %vm341_vm2, %v6046_v62  ;;  %v6186_v62 = vld [vmem:[%s5775_s10 + $0xd9] sm:$0xff] }
  0x4d   : >> { %7471 = vst [vmem:[#allocation23_spill] sm:$0xff] %v6186_v62 }
  0x4f   : >> { %5217 = vmatmul.mubr.msk.f32.gmra.mxu1 %vm341_vm2, %v6057_v63  ;;  %5267 = vmatmul.mubr.msk.f32.gmra.mxu0 %vm341_vm2, %v6060_v1  ;;  %v6183_v1 = vld [vmem:[%s5775_s10 + $0xd7] sm:$0xff] }
  0x50   : >> { %5219 = vmatprep.mubr.msk.f32.mxu1 %vm341_vm2, %v6063_v2  ;;  %5269 = vmatprep.mubr.msk.f32.mxu0 %vm341_vm2, %v6066_v3  ;;  %v6166_v3 = vld [vmem:[%s5775_s10 + $0xc9] sm:$0xff] }
  0x51   : >> { %7469 = vst [vmem:[#allocation21_spill] sm:$0xff] %v6166_v3 }
  0x53   : >> { %5220 = vmatmul.mubr.msk.f32.gmra.mxu1 %vm341_vm2, %v6077_v4  ;;  %5270 = vmatmul.mubr.msk.f32.gmra.mxu0 %vm341_vm2, %v6080_v5  ;;  %v6163_v5 = vld [vmem:[%s5775_s10 + $0xc7] sm:$0xff] }
  0x54   : >> { %5222 = vmatprep.mubr.msk.f32.mxu1 %vm341_vm2, %v6083_v7  ;;  %5272 = vmatprep.mubr.msk.f32.mxu0 %vm341_vm2, %v6086_v9  ;;  %v6146_v9 = vld [vmem:[%s5775_s10 + $0xb9] sm:$0xff] }
  0x55   : >> { %7467 = vst [vmem:[#allocation19_spill] sm:$0xff] %v6146_v9 }
  0x57   : >> { %5223 = vmatmul.mubr.msk.f32.gmra.mxu1 %vm341_vm2, %v6097_v11  ;;  %5273 = vmatmul.mubr.msk.f32.gmra.mxu0 %vm341_vm2, %v6100_v12  ;;  %v6143_v12 = vld [vmem:[%s5775_s10 + $0xb7] sm:$0xff] }
  0x58   : >> { %5225 = vmatprep.mubr.msk.f32.mxu1 %vm341_vm2, %v6103_v39  ;;  %5275 = vmatprep.mubr.msk.f32.mxu0 %vm341_vm2, %v6106_v40  ;;  %v6140_v40 = vld [vmem:[%s5775_s10 + $0xb1] sm:$0xff] }
  0x59   : >> { %7466 = vst [vmem:[#allocation18_spill] sm:$0xff] %v6140_v40 }
  0x5b   : >> { %5226 = vmatmul.mubr.msk.f32.gmra.mxu1 %vm341_vm2, %v6117_v41  ;;  %5276 = vmatmul.mubr.msk.f32.gmra.mxu0 %vm341_vm2, %v6120_v42  ;;  %v6160_v42 = vld [vmem:[%s5775_s10 + $0xc1] sm:$0xff] }
  0x5c   : >> { %5228 = vmatprep.mubr.msk.f32.mxu1 %vm341_vm2, %v6123_v43  ;;  %5278 = vmatprep.mubr.msk.f32.mxu0 %vm341_vm2, %v6126_v44  ;;  %v6157_v44 = vld [vmem:[%s5775_s10 + $0xbf] sm:$0xff]  ;;  %7468 = vst [vmem:[#allocation20_spill] sm:$0xff] %v6160_v42 }
  0x5f   : >> { %5229 = vmatmul.mubr.msk.f32.gmra.mxu1 %vm341_vm2, %v6137_v0  ;;  %5279 = vmatmul.mubr.msk.f32.gmra.mxu0 %vm341_vm2, %v6140_v40  ;;  %v6180_v40 = vld [vmem:[%s5775_s10 + $0xd1] sm:$0xff] }
  0x60   : >> { %5231 = vmatprep.mubr.msk.f32.mxu1 %vm341_vm2, %v6143_v12  ;;  %5281 = vmatprep.mubr.msk.f32.mxu0 %vm341_vm2, %v6146_v9  ;;  %v6177_v9 = vld [vmem:[%s5775_s10 + $0xcf] sm:$0xff]  ;;  %7470 = vst [vmem:[#allocation22_spill] sm:$0xff] %v6180_v40 }
  0x63   : >> { %5232 = vmatmul.mubr.msk.f32.gmra.mxu1 %vm341_vm2, %v6157_v44  ;;  %5282 = vmatmul.mubr.msk.f32.gmra.mxu0 %vm341_vm2, %v6160_v42  ;;  %v6200_v42 = vld [vmem:[%s5775_s10 + $0xe1] sm:$0xff] }
  0x64   : >> { %5234 = vmatprep.mubr.msk.f32.mxu1 %vm341_vm2, %v6163_v5  ;;  %5284 = vmatprep.mubr.msk.f32.mxu0 %vm341_vm2, %v6166_v3  ;;  %v6197_v3 = vld [vmem:[%s5775_s10 + $0xdf] sm:$0xff]  ;;  %7472 = vst [vmem:[#allocation24_spill] sm:$0xff] %v6200_v42 }
  0x67   : >> { %5235 = vmatmul.mubr.msk.f32.gmra.mxu1 %vm341_vm2, %v6177_v9  ;;  %5285 = vmatmul.mubr.msk.f32.gmra.mxu0 %vm341_vm2, %v6180_v40  ;;  %v6220_v40 = vld [vmem:[%s5775_s10 + $0xf1] sm:$0xff] }
  0x68   : >> { %5237 = vmatprep.mubr.msk.f32.mxu1 %vm341_vm2, %v6183_v1  ;;  %5287 = vmatprep.mubr.msk.f32.mxu0 %vm341_vm2, %v6186_v62  ;;  %v6217_v62 = vld [vmem:[%s5775_s10 + $0xef] sm:$0xff]  ;;  %7474 = vst [vmem:[#allocation26_spill] sm:$0xff] %v6220_v40 }
  0x6b   : >> { %5238 = vmatmul.mubr.msk.f32.gmra.mxu1 %vm341_vm2, %v6197_v3  ;;  %5288 = vmatmul.mubr.msk.f32.gmra.mxu0 %vm341_vm2, %v6200_v42  ;;  %v6240_v42 = vld [vmem:[%s5775_s10 + $0x101] sm:$0xff] }
  0x6c   : >> { %5240 = vmatprep.mubr.msk.f32.mxu1 %vm341_vm2, %v6203_v60  ;;  %5290 = vmatprep.mubr.msk.f32.mxu0 %vm341_vm2, %v6206_v58  ;;  %v6237_v58 = vld [vmem:[%s5775_s10 + $0xff] sm:$0xff] }
  0x6f   : >> { %5241 = vmatmul.mubr.msk.f32.gmra.mxu1 %vm341_vm2, %v6217_v62  ;;  %5291 = vmatmul.mubr.msk.f32.gmra.mxu0 %vm341_vm2, %v6220_v40  ;;  %v6260_v40 = vld [vmem:[%s5775_s10 + $0x111] sm:$0xff] }
  0x70   : >> { %5243 = vmatprep.mubr.msk.f32.mxu1 %vm341_vm2, %v6223_v56  ;;  %5293 = vmatprep.mubr.msk.f32.mxu0 %vm341_vm2, %v6226_v54  ;;  %v6257_v54 = vld [vmem:[%s5775_s10 + $0x10f] sm:$0xff]  ;;  %7477 = vst [vmem:[#allocation29_spill] sm:$0xff] %v6260_v40 }
  0x73   : >> { %5244 = vmatmul.mubr.msk.f32.gmra.mxu1 %vm341_vm2, %v6237_v58  ;;  %5294 = vmatmul.mubr.msk.f32.gmra.mxu0 %vm341_vm2, %v6240_v42 }
  0x74   : >> { %5246 = vmatprep.mubr.msk.f32.mxu1 %vm341_vm2, %v6243_v52  ;;  %5296 = vmatprep.mubr.msk.f32.mxu0 %vm341_vm2, %v6246_v50  ;;  %v6277_v50 = vld [vmem:[%s7393_s1 + $0x1c] sm:$0xf] }
  0x77   : >> { %5247 = vmatmul.mubr.msk.f32.gmra.mxu1 %vm341_vm2, %v6257_v54  ;;  %5297 = vmatmul.mubr.msk.f32.gmra.mxu0 %vm341_vm2, %v6260_v40  ;;  %v6282_v40 = vld [vmem:[%s7393_s1 + $0x20] sm:$0xf] }
  0x78   : >> { %5301 = vmatprep.mubr.msk.f32.mxu1 %vm341_vm2, %v5971_v47  ;;  %5351 = vmatprep.mubr.msk.f32.mxu0 %vm341_vm2, %v5810_v13  ;;  %v3775_v13 = vld [vmem:[%s6324_s5 + $0x10] sm:$0xff]  ;;  %v3778_v47 = vld [vmem:[%s6324_s5 + $0x28] sm:$0xff] }
  0x7b   : >> { %5302 = vmatmul.mubr.msk.f32.vlgmr.msra.gmra.mxu1 %vm341_vm2, %v5979_v49  ;;  %5352 = vmatmul.mubr.msk.f32.vlgmr.msra.gmra.mxu0 %vm341_vm2, %v5819_v15  ;;  %v3773_v15 = vld [vmem:[%s6324_s5] sm:$0xff] }
  0x7c   : >> { %5400 = vmatpush3.msk.msra.mxu1 %vm438_vm1, %v5959_v45  ;;  %5450 = vmatpush3.msk.msra.mxu0 %vm438_vm1, %v5964_v46  ;;  %v3776_v45 = vld [vmem:[%s6324_s5 + $0x18] sm:$0xff]  ;;  %v3774_v46 = vld [vmem:[%s6324_s5 + $0x8] sm:$0xff]  ;;  %v3777_v49 = vld [vmem:[%s6324_s5 + $0x20] sm:$0xff] }
  0x7d   : >> { %5304 = vmatprep.mubr.msk.f32.mxu1 %vm341_vm2, %v5997_v51  ;;  %5354 = vmatprep.mubr.msk.f32.mxu0 %vm341_vm2, %v5837_v17  ;;  %v5671_v17 = vmov 0   ;;  %v6430_v51 = vld [vmem:[%s5775_s10 + $0x118] sm:$0xff] }
  0x7e   : >> { %5499 = vmatprep.subr.msk.mxu1 %vm438_vm1, %v6277_v50  ;;  %5549 = vmatprep.subr.msk.mxu0 %vm438_vm1, %v6282_v40 }
  0x7f   : >> { %5305 = vmatmul.mubr.msk.f32.gmra.mxu1 %vm341_vm2, %v6003_v53  ;;  %5355 = vmatmul.mubr.msk.f32.gmra.mxu0 %vm341_vm2, %v5843_v19 }
  0x80   : >> { %5307 = vmatprep.mubr.msk.f32.mxu1 %vm341_vm2, %v6017_v55  ;;  %5357 = vmatprep.mubr.msk.f32.mxu0 %vm341_vm2, %v5857_v21 }
  0x81   : >> { %5637 = vset.pattern.permute.xlu1 %v5671_v17  ;;  %5636 = vset.pattern.permute.xlu0 %v5671_v17  ;;  %v6449_v17 = vld [vmem:[%s5775_s10 + $0x127] sm:$0xff] }
  0x82   : >> { %3817 = vperm.xlu1 %5637, %v3775_v13   ;;  %3807 = vperm.xlu0 %5636, %v3773_v15   ;;  %v6433_v13 = vld [vmem:[%s5775_s10 + $0x11f] sm:$0xff] }
  0x83   : >> { %5308 = vmatmul.mubr.msk.f32.gmra.mxu1 %vm341_vm2, %v6023_v57  ;;  %5358 = vmatmul.mubr.msk.f32.gmra.mxu0 %vm341_vm2, %v5863_v23  ;;  %v6436_v15 = vld [vmem:[%s5775_s10 + $0x120] sm:$0xff] }
  0x84   : >> { %5310 = vmatprep.mubr.msk.f32.mxu1 %vm341_vm2, %v6037_v59  ;;  %5360 = vmatprep.mubr.msk.f32.mxu0 %vm341_vm2, %v5877_v25  ;;  %7478 = vst [vmem:[#allocation30_spill] sm:$0xff] %v6436_v15 }
  0x86   : >> { %3822 = vperm.xlu1 %5637, %v3776_v45   ;;  %3812 = vperm.xlu0 %5636, %v3774_v46   ;;  %v6452_v45 = vld [vmem:[%s5775_s10 + $0x128] sm:$0xff]  ;;  %v3796_v46 = vld [vmem:[%s6324_s5 + $0xb8] sm:$0xff] }
  0x87   : >> { %5311 = vmatmul.mubr.msk.f32.gmra.mxu1 %vm341_vm2, %v6043_v61  ;;  %5361 = vmatmul.mubr.msk.f32.gmra.mxu0 %vm341_vm2, %v5883_v27  ;;  %7479 = vst [vmem:[#allocation31_spill] sm:$0xff] %v6452_v45 }
  0x88   : >> { %5313 = vmatprep.mubr.msk.f32.mxu1 %vm341_vm2, %v6057_v63  ;;  %5363 = vmatprep.mubr.msk.f32.mxu0 %vm341_vm2, %v5897_v29 }
  0x8a   : >> { %3832 = vperm.xlu1 %5637, %v3778_v47   ;;  %3827 = vperm.xlu0 %5636, %v3777_v49   ;;  %v3795_v47 = vld [vmem:[%s6324_s5 + $0xb0] sm:$0xff]  ;;  %v7480_v49 = vld [vmem:[#allocation3_spill] sm:$0xff] }
  0x8b   : >> { %5314 = vmatmul.mubr.msk.f32.gmra.mxu1 %vm341_vm2, %v6063_v2  ;;  %5364 = vmatmul.mubr.msk.f32.gmra.mxu0 %vm341_vm2, %v5903_v31 }
  0x8c   : >> { %5316 = vmatprep.mubr.msk.f32.mxu1 %vm341_vm2, %v6077_v4  ;;  %5366 = vmatprep.mubr.msk.f32.mxu0 %vm341_vm2, %v5917_v33 }
  0x8f   : >> { %5317 = vmatmul.mubr.msk.f32.gmra.mxu1 %vm341_vm2, %v6083_v7  ;;  %5367 = vmatmul.mubr.msk.f32.gmra.mxu0 %vm341_vm2, %v5923_v35 }
  0x90   : >> { %5319 = vmatprep.mubr.msk.f32.mxu1 %vm341_vm2, %v6097_v11  ;;  %5369 = vmatprep.mubr.msk.f32.mxu0 %vm341_vm2, %v5937_v37  ;;  %v3780_v37 = vld [vmem:[%s6324_s5 + $0x38] sm:$0xff] }
  0x91   : >> { %3842 = vperm.xlu1 %5637, %v3780_v37   ;;  %v3798_v37 = vld [vmem:[%s6324_s5 + $0xc8] sm:$0xff] }
  0x93   : >> { %5320 = vmatmul.mubr.msk.f32.gmra.mxu1 %vm341_vm2, %v6103_v39  ;;  %5370 = vmatmul.mubr.msk.f32.gmra.mxu0 %vm341_vm2, %v5781_v6  ;;  %v3779_v6 = vld [vmem:[%s6324_s5 + $0x30] sm:$0xff] }
  0x94   : >> { %5322 = vmatprep.mubr.msk.f32.mxu1 %vm341_vm2, %v6117_v41  ;;  %5372 = vmatprep.mubr.msk.f32.mxu0 %vm341_vm2, %v5788_v8  ;;  %v3782_v8 = vld [vmem:[%s6324_s5 + $0x48] sm:$0xff] }
  0x95   : >> { %3837 = vperm.xlu0 %5636, %v3779_v6   ;;  %3852 = vperm.xlu1 %5637, %v3782_v8   ;;  %v3797_v6 = vld [vmem:[%s6324_s5 + $0xc0] sm:$0xff] }
  0x96   : >> { %v7483_v8 = vld [vmem:[#allocation6_spill] sm:$0xff] }
  0x97   : >> { %5323 = vmatmul.mubr.msk.f32.gmra.mxu1 %vm341_vm2, %v6123_v43  ;;  %5373 = vmatmul.mubr.msk.f32.gmra.mxu0 %vm341_vm2, %v5792_v10  ;;  %v3781_v10 = vld [vmem:[%s6324_s5 + $0x40] sm:$0xff] }
  0x98   : >> { %5325 = vmatprep.mubr.msk.f32.mxu1 %vm341_vm2, %v6137_v0  ;;  %5375 = vmatprep.mubr.msk.f32.mxu0 %vm341_vm2, %v5813_v14  ;;  %v3784_v14 = vld [vmem:[%s6324_s5 + $0x58] sm:$0xff] }
  0x99   : >> { %3847 = vperm.xlu0 %5636, %v3781_v10   ;;  %3862 = vperm.xlu1 %5637, %v3784_v14   ;;  %v7485_v10 = vld [vmem:[#allocation8_spill] sm:$0xff]  ;;  %v7486_v14 = vld [vmem:[#allocation9_spill] sm:$0xff] }
  0x9b   : >> { %5326 = vmatmul.mubr.msk.f32.gmra.mxu1 %vm341_vm2, %v6143_v12  ;;  %5376 = vmatmul.mubr.msk.f32.gmra.mxu0 %vm341_vm2, %v5822_v16  ;;  %v3783_v16 = vld [vmem:[%s6324_s5 + $0x50] sm:$0xff] }
  0x9c   : >> { %5328 = vmatprep.mubr.msk.f32.mxu1 %vm341_vm2, %v6157_v44  ;;  %5378 = vmatprep.mubr.msk.f32.mxu0 %vm341_vm2, %v5840_v18  ;;  %v3786_v18 = vld [vmem:[%s6324_s5 + $0x68] sm:$0xff] }
  0x9d   : >> { %3857 = vperm.xlu0 %5636, %v3783_v16   ;;  %3872 = vperm.xlu1 %5637, %v3786_v18   ;;  %v3803_v16 = vld [vmem:[%s6324_s5 + $0xf0] sm:$0xff]  ;;  %v7487_v18 = vld [vmem:[#allocation10_spill] sm:$0xff] }
  0x9f   : >> { %5329 = vmatmul.mubr.msk.f32.gmra.mxu1 %vm341_vm2, %v6163_v5  ;;  %5379 = vmatmul.mubr.msk.f32.gmra.mxu0 %vm341_vm2, %v5846_v20  ;;  %v3785_v20 = vld [vmem:[%s6324_s5 + $0x60] sm:$0xff] }
  0xa0   : >> { %5331 = vmatprep.mubr.msk.f32.mxu1 %vm341_vm2, %v6177_v9  ;;  %5381 = vmatprep.mubr.msk.f32.mxu0 %vm341_vm2, %v5860_v22  ;;  %v3788_v22 = vld [vmem:[%s6324_s5 + $0x78] sm:$0xff] }
  0xa1   : >> { %3867 = vperm.xlu0 %5636, %v3785_v20   ;;  %3882 = vperm.xlu1 %5637, %v3788_v22   ;;  %v7492_v20 = vld [vmem:[#allocation15_spill] sm:$0xff] }
  0xa2   : >> { %v7496_v22 = vld [vmem:[#allocation19_spill] sm:$0xff] }
  0xa3   : >> { %5332 = vmatmul.mubr.msk.f32.gmra.mxu1 %vm341_vm2, %v6183_v1  ;;  %5382 = vmatmul.mubr.msk.f32.gmra.mxu0 %vm341_vm2, %v5866_v24  ;;  %v3787_v24 = vld [vmem:[%s6324_s5 + $0x70] sm:$0xff] }
  0xa4   : >> { %5334 = vmatprep.mubr.msk.f32.mxu1 %vm341_vm2, %v6197_v3  ;;  %5384 = vmatprep.mubr.msk.f32.mxu0 %vm341_vm2, %v5880_v26  ;;  %v3790_v26 = vld [vmem:[%s6324_s5 + $0x88] sm:$0xff] }
  0xa5   : >> { %3877 = vperm.xlu0 %5636, %v3787_v24   ;;  %3892 = vperm.xlu1 %5637, %v3790_v26  }
  0xa7   : >> { %5335 = vmatmul.mubr.msk.f32.gmra.mxu1 %vm341_vm2, %v6203_v60  ;;  %5385 = vmatmul.mubr.msk.f32.gmra.mxu0 %vm341_vm2, %v5886_v28  ;;  %v3789_v28 = vld [vmem:[%s6324_s5 + $0x80] sm:$0xff] }
  0xa8   : >> { %5337 = vmatprep.mubr.msk.f32.mxu1 %vm341_vm2, %v6217_v62  ;;  %5387 = vmatprep.mubr.msk.f32.mxu0 %vm341_vm2, %v5900_v30  ;;  %v3792_v30 = vld [vmem:[%s6324_s5 + $0x98] sm:$0xff] }
  0xa9   : >> { %3887 = vperm.xlu0 %5636, %v3789_v28   ;;  %3902 = vperm.xlu1 %5637, %v3792_v30   ;;  %v7498_v28 = vld [vmem:[#allocation21_spill] sm:$0xff] }
  0xab   : >> { %5338 = vmatmul.mubr.msk.f32.gmra.mxu1 %vm341_vm2, %v6223_v56  ;;  %5388 = vmatmul.mubr.msk.f32.gmra.mxu0 %vm341_vm2, %v5906_v32  ;;  %v3791_v32 = vld [vmem:[%s6324_s5 + $0x90] sm:$0xff] }
  0xac   : >> { %5340 = vmatprep.mubr.msk.f32.mxu1 %vm341_vm2, %v6237_v58  ;;  %5390 = vmatprep.mubr.msk.f32.mxu0 %vm341_vm2, %v5920_v34  ;;  %v6427_v34 = vld [vmem:[%s5775_s10 + $0x117] sm:$0xff] }
  0xad   : >> { %3897 = vperm.xlu0 %5636, %v3791_v32  }
  0xaf   : >> { %5341 = vmatmul.mubr.msk.f32.gmra.mxu1 %vm341_vm2, %v6243_v52  ;;  %5391 = vmatmul.mubr.msk.f32.gmra.mxu0 %vm341_vm2, %v5926_v36  ;;  %v3794_v36 = vld [vmem:[%s6324_s5 + $0xa8] sm:$0xff] }
  0xb0   : >> { %5343 = vmatprep.mubr.msk.f32.mxu1 %vm341_vm2, %v6257_v54  ;;  %5393 = vmatprep.mubr.msk.f32.mxu0 %vm341_vm2, %v5940_v38  ;;  %v3793_v38 = vld [vmem:[%s6324_s5 + $0xa0] sm:$0xff] }
  0xb1   : >> { %3912 = vperm.xlu1 %5637, %v3794_v36   ;;  %3907 = vperm.xlu0 %5636, %v3793_v38   ;;  %v7500_v38 = vld [vmem:[#allocation23_spill] sm:$0xff] }
  0xb3   : >> { %5344 = vmatmul.mubr.msk.f32.gmra.mxu1 %vm341_vm2, %v6427_v34  ;;  %5394 = vmatmul.mubr.msk.f32.gmra.mxu0 %vm341_vm2, %v6430_v51 }
  0xb4   : >> { %5346 = vmatprep.mubr.msk.f32.mxu1 %vm341_vm2, %v6433_v13  ;;  %5396 = vmatprep.mubr.msk.f32.mxu0 %vm341_vm2, %v6436_v15 }
  0xb5   : >> { %3922 = vperm.xlu1 %5637, %v3796_v46   ;;  %3917 = vperm.xlu0 %5636, %v3795_v47  }
  0xb7   : >> { %5347 = vmatmul.mubr.msk.f32.gmra.mxu1 %vm341_vm2, %v6449_v17  ;;  %5397 = vmatmul.mubr.msk.f32.gmra.mxu0 %vm341_vm2, %v6452_v45 }
  0xb8   : >> { %5401 = vmatprep.mubr.msk.f32.mxu1 %vm341_vm2, %v5974_v48  ;;  %5451 = vmatprep.mubr.msk.f32.mxu0 %vm341_vm2, %v6003_v53  ;;  %v7481_v48 = vld [vmem:[#allocation4_spill] sm:$0xff]  ;;  %v7482_v53 = vld [vmem:[#allocation5_spill] sm:$0xff] }
  0xb9   : >> { %3932 = vperm.xlu1 %5637, %v3798_v37   ;;  %3927 = vperm.xlu0 %5636, %v3797_v6   ;;  %v7502_v37 = vld [vmem:[#allocation25_spill] sm:$0xff] }
  0xbb   : >> { %5402 = vmatmul.mubr.msk.f32.vlgmr.msra.gmra.mxu1 %vm341_vm2, %v7480_v49  ;;  %5452 = vmatmul.mubr.msk.f32.vlgmr.msra.gmra.mxu0 %vm341_vm2, %v6017_v55  ;;  %v3799_v55 = vld [vmem:[%s6324_s5 + $0xd0] sm:$0xff] }
  0xbc   : >> { %5500 = vmatpush3.msk.msra.mxu1 %vm438_vm1, %v6277_v50  ;;  %5550 = vmatpush3.msk.msra.mxu0 %vm438_vm1, %v6282_v40  ;;  %v3800_v50 = vld [vmem:[%s6324_s5 + $0xd8] sm:$0xff]  ;;  %v3802_v40 = vld [vmem:[%s6324_s5 + $0xe8] sm:$0xff] }
  0xbd   : >> { %5404 = vmatprep.mubr.msk.f32.mxu1 %vm341_vm2, %v7481_v48  ;;  %5454 = vmatprep.mubr.msk.f32.mxu0 %vm341_vm2, %v6023_v57  ;;  %v7484_v57 = vld [vmem:[#allocation7_spill] sm:$0xff] }
  0xbe   : >> { %3942 = vperm.xlu1 %5637, %v3800_v50   ;;  %3937 = vperm.xlu0 %5636, %v3799_v55   ;;  %v7504_v55 = vld [vmem:[#allocation27_spill] sm:$0xff] }
  0xbf   : >> { %5405 = vmatmul.mubr.msk.f32.gmra.mxu1 %vm341_vm2, %v7482_v53  ;;  %5455 = vmatmul.mubr.msk.f32.gmra.mxu0 %vm341_vm2, %v6037_v59  ;;  %v3801_v59 = vld [vmem:[%s6324_s5 + $0xe0] sm:$0xff] }
  0xc0   : >> { %5407 = vmatprep.mubr.msk.f32.mxu1 %vm341_vm2, %v7483_v8  ;;  %5457 = vmatprep.mubr.msk.f32.mxu0 %vm341_vm2, %v6043_v61  ;;  %v3804_v61 = vld [vmem:[%s6324_s5 + $0xf8] sm:$0xff] }
  0xc2   : >> { %3952 = vperm.xlu1 %5637, %v3802_v40   ;;  %3947 = vperm.xlu0 %5636, %v3801_v59  }
  0xc3   : >> { %5408 = vmatmul.mubr.msk.f32.gmra.mxu1 %vm341_vm2, %v7484_v57  ;;  %5458 = vmatmul.mubr.msk.f32.gmra.mxu0 %vm341_vm2, %v6057_v63  ;;  %v7488_v63 = vld [vmem:[#allocation11_spill] sm:$0xff] }
  0xc4   : >> { %5410 = vmatprep.mubr.msk.f32.mxu1 %vm341_vm2, %v7485_v10  ;;  %5460 = vmatprep.mubr.msk.f32.mxu0 %vm341_vm2, %v6063_v2  ;;  %v7489_v2 = vld [vmem:[#allocation12_spill] sm:$0xff] }
  0xc6   : >> { %3962 = vperm.xlu1 %5637, %v3804_v61   ;;  %3957 = vperm.xlu0 %5636, %v3803_v16   ;;  %v7507_v61 = vld [vmem:[#allocation28_spill] sm:$0xff] }
  0xc7   : >> { %5411 = vmatmul.mubr.msk.f32.gmra.mxu1 %vm341_vm2, %v7486_v14  ;;  %5461 = vmatmul.mubr.msk.f32.gmra.mxu0 %vm341_vm2, %v6077_v4  ;;  %v7490_v4 = vld [vmem:[#allocation13_spill] sm:$0xff] }
  0xc8   : >> { %5413 = vmatprep.mubr.msk.f32.mxu1 %vm341_vm2, %v7487_v18  ;;  %5463 = vmatprep.mubr.msk.f32.mxu0 %vm341_vm2, %v6083_v7  ;;  %v7491_v7 = vld [vmem:[#allocation14_spill] sm:$0xff] }
  0xcb   : >> { %5414 = vmatmul.mubr.msk.f32.gmra.mxu1 %vm341_vm2, %v7488_v63  ;;  %5464 = vmatmul.mubr.msk.f32.gmra.mxu0 %vm341_vm2, %v6097_v11  ;;  %v7493_v11 = vld [vmem:[#allocation16_spill] sm:$0xff] }
  0xcc   : >> { %5416 = vmatprep.mubr.msk.f32.mxu1 %vm341_vm2, %v7489_v2  ;;  %5466 = vmatprep.mubr.msk.f32.mxu0 %vm341_vm2, %v6103_v39  ;;  %v7494_v39 = vld [vmem:[#allocation17_spill] sm:$0xff] }
  0xcf   : >> { %5417 = vmatmul.mubr.msk.f32.gmra.mxu1 %vm341_vm2, %v7490_v4  ;;  %5467 = vmatmul.mubr.msk.f32.gmra.mxu0 %vm341_vm2, %v6117_v41  ;;  %v7495_v41 = vld [vmem:[#allocation18_spill] sm:$0xff] }
  0xd0   : >> { %5419 = vmatprep.mubr.msk.f32.mxu1 %vm341_vm2, %v7491_v7  ;;  %5469 = vmatprep.mubr.msk.f32.mxu0 %vm341_vm2, %v6123_v43 }
  0xd3   : >> { %5420 = vmatmul.mubr.msk.f32.gmra.mxu1 %vm341_vm2, %v7492_v20  ;;  %5470 = vmatmul.mubr.msk.f32.gmra.mxu0 %vm341_vm2, %v6137_v0 }
  0xd4   : >> { %5422 = vmatprep.mubr.msk.f32.mxu1 %vm341_vm2, %v7493_v11  ;;  %5472 = vmatprep.mubr.msk.f32.mxu0 %vm341_vm2, %v6143_v12  ;;  %v7497_v12 = vld [vmem:[#allocation20_spill] sm:$0xff] }
  0xd7   : >> { %5423 = vmatmul.mubr.msk.f32.gmra.mxu1 %vm341_vm2, %v7494_v39  ;;  %5473 = vmatmul.mubr.msk.f32.gmra.mxu0 %vm341_vm2, %v6157_v44 }
  0xd8   : >> { %5425 = vmatprep.mubr.msk.f32.mxu1 %vm341_vm2, %v7495_v41  ;;  %5475 = vmatprep.mubr.msk.f32.mxu0 %vm341_vm2, %v6163_v5 }
  0xdb   : >> { %v6540_v43 = vpop.f32.mrf.mxu0  ;;  %v6542_v0 = vpop.f32.mrf.mxu1  ;;  %5426 = vmatmul.mubr.msk.f32.gmra.mxu1 %vm341_vm2, %v7496_v22  ;;  %5476 = vmatmul.mubr.msk.f32.gmra.mxu0 %vm341_vm2, %v6177_v9  ;;  %v7499_v9 = vld [vmem:[#allocation22_spill] sm:$0xff] }
  0xdc   : >> { %5428 = vmatprep.mubr.msk.f32.mxu1 %vm341_vm2, %v7497_v12  ;;  %5478 = vmatprep.mubr.msk.f32.mxu0 %vm341_vm2, %v6183_v1 }
  0xdd   : >> { %v6552_v44 = vpop.f32.mrf.mxu0  ;;  %v6554_v24 = vpop.f32.mrf.mxu1 }
  0xdf   : >> { %v6556_v5 = vpop.f32.mrf.mxu0  ;;  %v6558_v26 = vpop.f32.mrf.mxu1  ;;  %5429 = vmatmul.mubr.msk.f32.gmra.mxu1 %vm341_vm2, %v7498_v28  ;;  %5479 = vmatmul.mubr.msk.f32.gmra.mxu0 %vm341_vm2, %v6197_v3  ;;  %v7501_v3 = vld [vmem:[#allocation24_spill] sm:$0xff] }
  0xe0   : >> { %5431 = vmatprep.mubr.msk.f32.mxu1 %vm341_vm2, %v7499_v9  ;;  %5481 = vmatprep.mubr.msk.f32.mxu0 %vm341_vm2, %v6203_v60 }
  0xe1   : >> { %v6568_v1 = vpop.f32.mrf.mxu0  ;;  %v6570_v30 = vpop.f32.mrf.mxu1 }
  0xe3   : >> { %v6572_v32 = vpop.f32.mrf.mxu0  ;;  %v6574_v36 = vpop.f32.mrf.mxu1  ;;  %5432 = vmatmul.mubr.msk.f32.gmra.mxu1 %vm341_vm2, %v7500_v38  ;;  %5482 = vmatmul.mubr.msk.f32.gmra.mxu0 %vm341_vm2, %v6217_v62  ;;  %v7503_v62 = vld [vmem:[#allocation26_spill] sm:$0xff] }
  0xe4   : >> { %5434 = vmatprep.mubr.msk.f32.mxu1 %vm341_vm2, %v7501_v3  ;;  %5484 = vmatprep.mubr.msk.f32.mxu0 %vm341_vm2, %v6223_v56 }
  0xe5   : >> { %v6584_v60 = vpop.f32.mrf.mxu0  ;;  %v6586_v46 = vpop.f32.mrf.mxu1 }
  0xe7   : >> { %v6588_v47 = vpop.f32.mrf.mxu0  ;;  %v6590_v49 = vpop.f32.mrf.mxu1  ;;  %5435 = vmatmul.mubr.msk.f32.gmra.mxu1 %vm341_vm2, %v7502_v37  ;;  %5485 = vmatmul.mubr.msk.f32.gmra.mxu0 %vm341_vm2, %v6237_v58 }
  0xe8   : >> { %5437 = vmatprep.mubr.msk.f32.mxu1 %vm341_vm2, %v7503_v62  ;;  %5487 = vmatprep.mubr.msk.f32.mxu0 %vm341_vm2, %v6243_v52 }
  0xe9   : >> { %v6600_v56 = vpop.f32.mrf.mxu0  ;;  %v6602_v6 = vpop.f32.mrf.mxu1 }
  0xeb   : >> { %v6604_v48 = vpop.f32.mrf.mxu0  ;;  %v6606_v50 = vpop.f32.mrf.mxu1  ;;  %5438 = vmatmul.mubr.msk.f32.gmra.mxu1 %vm341_vm2, %v7504_v55  ;;  %5488 = vmatmul.mubr.msk.f32.gmra.mxu0 %vm341_vm2, %v6257_v54  ;;  %v7508_v54 = vld [vmem:[#allocation29_spill] sm:$0xff]  ;;  %v6641_v55 = vld [vmem:[%s5775_s10 + $0x121] sm:$0xff] }
  0xec   : >> { %5440 = vmatprep.mubr.msk.f32.mxu1 %vm341_vm2, %v6240_v42  ;;  %5490 = vmatprep.mubr.msk.f32.mxu0 %vm341_vm2, %v6427_v34  ;;  %v6633_v42 = vld [vmem:[%s5775_s10 + $0x119] sm:$0xff]  ;;  %v4645_v34 = vld [vmem:[%s5775_s10 + $0x12f] sm:$0xff]  ;;  %7510 = vst [vmem:[#allocation6_spill] sm:$0xff] %v6641_v55 }
  0xed   : >> { %v6616_v52 = vpop.f32.mrf.mxu0  ;;  %v6618_v58 = vpop.f32.mrf.mxu1 }
  0xee   : >> { %7505 = vst [vmem:[#allocation3_spill] sm:$0xff] %v6618_v58 }
  0xef   : >> { %v6620_v40 = vpop.f32.mrf.mxu0  ;;  %v6622_v59 = vpop.f32.mrf.mxu1  ;;  %5441 = vmatmul.mubr.msk.f32.gmra.mxu1 %vm341_vm2, %v7507_v61  ;;  %5491 = vmatmul.mubr.msk.f32.gmra.mxu0 %vm341_vm2, %v6433_v13  ;;  %v4646_v61 = vld [vmem:[%s5775_s10 + $0x137] sm:$0xff] }
  0xf0   : >> { %7506 = vst [vmem:[#allocation4_spill] sm:$0xff] %v6622_v59  ;;  %5443 = vmatprep.mubr.msk.f32.mxu1 %vm341_vm2, %v7508_v54  ;;  %5493 = vmatprep.mubr.msk.f32.mxu0 %vm341_vm2, %v6449_v17  ;;  %v6655_v17 = vld [vmem:[%s5775_s10 + $0x129] sm:$0xff]  ;;  %v4647_v54 = vld [vmem:[%s5775_s10 + $0x13f] sm:$0xff] }
  0xf1   : >> { %v6636_v16 = vpop.f32.mrf.mxu0  ;;  %v6638_v62 = vpop.f32.mrf.mxu1  ;;  %7512 = vst [vmem:[#allocation8_spill] sm:$0xff] %v6655_v17 }
  0xf2   : >> { %7509 = vst [vmem:[#allocation5_spill] sm:$0xff] %v6638_v62 }
  0xf3   : >> { %v6644_v45 = vpop.f32.mrf.mxu0  ;;  %v6646_v13 = vpop.f32.mrf.mxu1  ;;  %5444 = vmatmul.mubr.msk.f32.gmra.mxu1 %vm341_vm2, %v6633_v42  ;;  %5494 = vmatmul.mubr.msk.f32.gmra.mxu0 %vm341_vm2, %v4645_v34 }
  0xf4   : >> { %7511 = vst [vmem:[#allocation7_spill] sm:$0xff] %v6646_v13  ;;  %5446 = vmatprep.mubr.msk.f32.mxu1 %vm341_vm2, %v6641_v55  ;;  %5496 = vmatprep.mubr.msk.f32.mxu0 %vm341_vm2, %v4646_v61 }
  0xf5   : >> { %v6658_v62 = vpop.f32.mrf.mxu0  ;;  %v6660_v59 = vpop.f32.mrf.mxu1 }
  0xf6   : >> { %7513 = vst [vmem:[#allocation9_spill] sm:$0xff] %v6660_v59 }
  0xf7   : >> { %v6662_v15 = vpop.f32.mrf.mxu0  ;;  %v6664_v13 = vpop.f32.mrf.mxu1  ;;  %5447 = vmatmul.mubr.msk.f32.gmra.mxu1 %vm341_vm2, %v6655_v17  ;;  %5497 = vmatmul.mubr.msk.f32.gmra.mxu0 %vm341_vm2, %v4647_v54 }
  0xf8   : >> { %7514 = vst [vmem:[#allocation10_spill] sm:$0xff] %v6664_v13  ;;  %5501 = vmatprep.mubr.msk.f32.mxu1 %vm341_vm2, %v5843_v19  ;;  %5551 = vmatprep.mubr.msk.f32.mxu0 %vm341_vm2, %v7482_v53 }
  0xf9   : >> { %v6673_v34 = vpop.f32.mrf.mxu0  ;;  %v6675_v61 = vpop.f32.mrf.mxu1 }
  0xfa   : >> { %7515 = vst [vmem:[#allocation11_spill] sm:$0xff] %v6675_v61 }
  0xfb   : >> { %v5203_v59 = vpop.f32.mrf.mxu1  ;;  %v5253_v55 = vpop.f32.mrf.mxu0  ;;  %5502 = vmatmul.mubr.msk.f32.vlgmr.msra.gmra.mxu1 %vm341_vm2, %v5857_v21  ;;  %5552 = vmatmul.mubr.msk.f32.vlgmr.msra.gmra.mxu0 %vm341_vm2, %v7483_v8 }
  0xfc   : >> { %v838_v54 = vadd.f32 %v5203_v59, %v6540_v43  ;;  %5504 = vmatprep.mubr.msk.f32.mxu1 %vm341_vm2, %v5863_v23  ;;  %5554 = vmatprep.mubr.msk.f32.mxu0 %vm341_vm2, %v7484_v57 }
  0xfd   : >> { %v832_v19 = vpop.f32.mrf.mxu1  ;;  %v1192_v53 = vpop.f32.mrf.mxu0 }
  0xfe   : >> { %v6686_v13 = vadd.f32 %v5253_v55, %v838_v54  ;;  %v833_v61 = vadd.f32 %v832_v19, %v6552_v44 }
  0xff   : >> { %v5206_v17 = vpop.f32.mrf.mxu1  ;;  %v5256_v58 = vpop.f32.mrf.mxu0  ;;  %5505 = vmatmul.mubr.msk.f32.gmra.mxu1 %vm341_vm2, %v5877_v25  ;;  %5555 = vmatmul.mubr.msk.f32.gmra.mxu0 %vm341_vm2, %v7485_v10 }
 0x100   : >> { %v6693_v21 = vadd.f32 %v1192_v53, %v833_v61  ;;  %v848_v23 = vadd.f32 %v5206_v17, %v6556_v5  ;;  %5507 = vmatprep.mubr.msk.f32.mxu1 %vm341_vm2, %v5883_v27  ;;  %5557 = vmatprep.mubr.msk.f32.mxu0 %vm341_vm2, %v7486_v14  ;;  %v4693_v17 = vld [vmem:[%s5775_s10 + $0x98] sm:$0xff]  ;;  %v4695_v53 = vld [vmem:[%s5775_s10 + $0xa8] sm:$0xff] }
 0x101   : >> { %v842_v8 = vpop.f32.mrf.mxu1  ;;  %v1202_v57 = vpop.f32.mrf.mxu0 }
 0x102   : >> { %v6700_v43 = vadd.f32 %v5256_v58, %v848_v23  ;;  %v843_v44 = vadd.f32 %v842_v8, %v6568_v1 }
 0x103   : >> { %v5209_v25 = vpop.f32.mrf.mxu1  ;;  %v5259_v59 = vpop.f32.mrf.mxu0  ;;  %5508 = vmatmul.mubr.msk.f32.gmra.mxu1 %vm341_vm2, %v5897_v29  ;;  %5558 = vmatmul.mubr.msk.f32.gmra.mxu0 %vm341_vm2, %v7487_v18 }
 0x104   : >> { %v6707_v10 = vadd.f32 %v1202_v57, %v843_v44  ;;  %v858_v27 = vadd.f32 %v5209_v25, %v6572_v32  ;;  %5510 = vmatprep.mubr.msk.f32.mxu1 %vm341_vm2, %v5903_v31  ;;  %5560 = vmatprep.mubr.msk.f32.mxu0 %vm341_vm2, %v7488_v63  ;;  %v4692_v63 = vld [vmem:[%s5775_s10 + $0x90] sm:$0xff] }
 0x105   : >> { %v852_v14 = vpop.f32.mrf.mxu1  ;;  %v1212_v5 = vpop.f32.mrf.mxu0  ;;  %v4696_v44 = vld [vmem:[%s5775_s10 + $0xb0] sm:$0xff] }
 0x106   : >> { %v6714_v1 = vadd.f32 %v5259_v59, %v858_v27  ;;  %v853_v29 = vadd.f32 %v852_v14, %v6584_v60  ;;  %v4697_v59 = vld [vmem:[%s5775_s10 + $0xb8] sm:$0xff] }
 0x107   : >> { %v5212_v58 = vpop.f32.mrf.mxu1  ;;  %v5262_v18 = vpop.f32.mrf.mxu0  ;;  %5511 = vmatmul.mubr.msk.f32.gmra.mxu1 %vm341_vm2, %v5917_v33  ;;  %5561 = vmatmul.mubr.msk.f32.gmra.mxu0 %vm341_vm2, %v7489_v2 }
 0x108   : >> { %v6721_v32 = vadd.f32 %v1212_v5, %v853_v29  ;;  %v868_v31 = vadd.f32 %v5212_v58, %v6588_v47  ;;  %5513 = vmatprep.mubr.msk.f32.mxu1 %vm341_vm2, %v5923_v35  ;;  %5563 = vmatprep.mubr.msk.f32.mxu0 %vm341_vm2, %v7490_v4  ;;  %v4694_v47 = vld [vmem:[%s5775_s10 + $0xa0] sm:$0xff] }
 0x109   : >> { %v862_v60 = vpop.f32.mrf.mxu1  ;;  %v1222_v55 = vpop.f32.mrf.mxu0  ;;  %v4698_v29 = vld [vmem:[%s5775_s10 + $0xc0] sm:$0xff] }
 0x10a   : >> { %v6730_v33 = vadd.f32 %v5262_v18, %v868_v31  ;;  %v863_v2 = vadd.f32 %v862_v60, %v6600_v56  ;;  %v4699_v18 = vld [vmem:[%s5775_s10 + $0xc8] sm:$0xff] }
 0x10b   : >> { %v5215_v61 = vpop.f32.mrf.mxu1  ;;  %v5265_v54 = vpop.f32.mrf.mxu0  ;;  %5514 = vmatmul.mubr.msk.f32.gmra.mxu1 %vm341_vm2, %v4692_v63  ;;  %5564 = vmatmul.mubr.msk.f32.gmra.mxu0 %vm341_vm2, %v7491_v7 }
 0x10c   : >> { %v6736_v35 = vadd.f32 %v1222_v55, %v863_v2  ;;  %v878_v4 = vadd.f32 %v5215_v61, %v6604_v48  ;;  %5516 = vmatprep.mubr.msk.f32.mxu1 %vm341_vm2, %v4693_v17  ;;  %5566 = vmatprep.mubr.msk.f32.mxu0 %vm341_vm2, %v7492_v20  ;;  %v4700_v55 = vld [vmem:[%s5775_s10 + $0xd0] sm:$0xff]  ;;  %v4701_v2 = vld [vmem:[%s5775_s10 + $0xd8] sm:$0xff] }
 0x10d   : >> { %v872_v19 = vpop.f32.mrf.mxu1  ;;  %v1232_v56 = vpop.f32.mrf.mxu0 }
 0x10e   : >> { %v6744_v23 = vadd.f32 %v5265_v54, %v878_v4  ;;  %v873_v8 = vadd.f32 %v872_v19, %v6616_v52 }
 0x10f   : >> { %v5218_v7 = vpop.f32.mrf.mxu1  ;;  %v5268_v57 = vpop.f32.mrf.mxu0  ;;  %5517 = vmatmul.mubr.msk.f32.gmra.mxu1 %vm341_vm2, %v4694_v47  ;;  %5567 = vmatmul.mubr.msk.f32.gmra.mxu0 %vm341_vm2, %v7493_v11  ;;  %v4702_v47 = vld [vmem:[%s5775_s10 + $0xe0] sm:$0xff] }
 0x110   : >> { %v6750_v48 = vadd.f32 %v1232_v56, %v873_v8  ;;  %v888_v20 = vadd.f32 %v5218_v7, %v6620_v40  ;;  %5519 = vmatprep.mubr.msk.f32.mxu1 %vm341_vm2, %v4695_v53  ;;  %5569 = vmatprep.mubr.msk.f32.mxu0 %vm341_vm2, %v7494_v39  ;;  %v4703_v56 = vld [vmem:[%s5775_s10 + $0xe8] sm:$0xff] }
 0x111   : >> { %v882_v25 = vpop.f32.mrf.mxu1  ;;  %v1242_v52 = vpop.f32.mrf.mxu0 }
 0x112   : >> { %v6758_v27 = vadd.f32 %v5268_v57, %v888_v20  ;;  %v883_v14 = vadd.f32 %v882_v25, %v6636_v16  ;;  %v4704_v57 = vld [vmem:[%s5775_s10 + $0xf0] sm:$0xff]  ;;  %v4705_v25 = vld [vmem:[%s5775_s10 + $0xf8] sm:$0xff] }
 0x113   : >> { %v5221_v11 = vpop.f32.mrf.mxu1  ;;  %v5271_v5 = vpop.f32.mrf.mxu0  ;;  %5520 = vmatmul.mubr.msk.f32.gmra.mxu1 %vm341_vm2, %v4696_v44  ;;  %5570 = vmatmul.mubr.msk.f32.gmra.mxu0 %vm341_vm2, %v7495_v41  ;;  %v4771_v20 = vld [vmem:[%s5775_s10 + $0xf1] sm:$0xff] }
 0x114   : >> { %v6764_v40 = vadd.f32 %v1242_v52, %v883_v14  ;;  %v898_v39 = vadd.f32 %v5221_v11, %v6644_v45  ;;  %5522 = vmatprep.mubr.msk.f32.mxu1 %vm341_vm2, %v4697_v59  ;;  %5572 = vmatprep.mubr.msk.f32.mxu0 %vm341_vm2, %v7496_v22  ;;  %v4772_v52 = vld [vmem:[%s5775_s10 + $0xf9] sm:$0xff] }
 0x115   : >> { %v892_v58 = vpop.f32.mrf.mxu1  ;;  %v1252_v16 = vpop.f32.mrf.mxu0 }
 0x116   : >> { %v6772_v31 = vadd.f32 %v5271_v5, %v898_v39  ;;  %v893_v63 = vadd.f32 %v892_v58, %v6658_v62  ;;  %v4706_v5 = vld [vmem:[%s5775_s10 + $0x100] sm:$0xff]  ;;  %v4707_v58 = vld [vmem:[%s5775_s10 + $0x108] sm:$0xff] }
 0x117   : >> { %v5224_v41 = vpop.f32.mrf.mxu1  ;;  %v5274_v60 = vpop.f32.mrf.mxu0  ;;  %5523 = vmatmul.mubr.msk.f32.gmra.mxu1 %vm341_vm2, %v4698_v29  ;;  %5573 = vmatmul.mubr.msk.f32.gmra.mxu0 %vm341_vm2, %v7497_v12  ;;  %v4773_v39 = vld [vmem:[%s5775_s10 + $0x101] sm:$0xff] }
 0x118   : >> { %v6778_v45 = vadd.f32 %v1252_v16, %v893_v63  ;;  %v908_v22 = vadd.f32 %v5224_v41, %v6662_v15  ;;  %5525 = vmatprep.mubr.msk.f32.mxu1 %vm341_vm2, %v4699_v18  ;;  %5575 = vmatprep.mubr.msk.f32.mxu0 %vm341_vm2, %v7498_v28  ;;  %v4774_v16 = vld [vmem:[%s5775_s10 + $0x109] sm:$0xff] }
 0x119   : >> { %v902_v17 = vpop.f32.mrf.mxu1  ;;  %v1262_v62 = vpop.f32.mrf.mxu0 }
 0x11a   : >> { %v6786_v61 = vadd.f32 %v5274_v60, %v908_v22  ;;  %v903_v54 = vadd.f32 %v902_v17, %v6673_v34  ;;  %v4775_v17 = vld [vmem:[%s5775_s10 + $0x111] sm:$0xff] }
 0x11b   : >> { %v5227_v12 = vpop.f32.mrf.mxu1  ;;  %v5277_v4 = vpop.f32.mrf.mxu0  ;;  %5526 = vmatmul.mubr.msk.f32.gmra.mxu1 %vm341_vm2, %v4700_v55  ;;  %5576 = vmatmul.mubr.msk.f32.gmra.mxu0 %vm341_vm2, %v7499_v9  ;;  %v4708_v55 = vld [vmem:[%s5775_s10 + $0x110] sm:$0xff] }
 0x11c   : >> { %v6792_v15 = vadd.f32 %v1262_v62, %v903_v54  ;;  %v918_v28 = vadd.f32 %v5227_v12, %v6542_v0  ;;  %5528 = vmatprep.mubr.msk.f32.mxu1 %vm341_vm2, %v4701_v2  ;;  %5578 = vmatprep.mubr.msk.f32.mxu0 %vm341_vm2, %v7500_v38 }
 0x11d   : >> { %v912_v34 = vpop.f32.mrf.mxu1  ;;  %v1272_v19 = vpop.f32.mrf.mxu0 }
 0x11e   : >> { %v6800_v53 = vadd.f32 %v5277_v4, %v918_v28  ;;  %v913_v9 = vadd.f32 %v912_v34, %v6554_v24 }
 0x11f   : >> { %v5230_v8 = vpop.f32.mrf.mxu1  ;;  %v5280_v7 = vpop.f32.mrf.mxu0  ;;  %5529 = vmatmul.mubr.msk.f32.gmra.mxu1 %vm341_vm2, %v4702_v47  ;;  %5579 = vmatmul.mubr.msk.f32.gmra.mxu0 %vm341_vm2, %v7501_v3 }
 0x120   : >> { %v6806_v0 = vadd.f32 %v1272_v19, %v913_v9  ;;  %v928_v38 = vadd.f32 %v5230_v8, %v6558_v26  ;;  %5531 = vmatprep.mubr.msk.f32.mxu1 %vm341_vm2, %v4703_v56  ;;  %5581 = vmatprep.mubr.msk.f32.mxu0 %vm341_vm2, %v7502_v37  ;;  %v7516_v19 = vld [vmem:[#allocation3_spill] sm:$0xff] }
 0x121   : >> { %v922_v24 = vpop.f32.mrf.mxu1  ;;  %v1282_v44 = vpop.f32.mrf.mxu0 }
 0x122   : >> { %v6816_v3 = vadd.f32 %v5280_v7, %v928_v38  ;;  %v923_v59 = vadd.f32 %v922_v24, %v6570_v30  ;;  %v7517_v7 = vld [vmem:[#allocation30_spill] sm:$0xff]  ;;  %v7519_v38 = vld [vmem:[#allocation4_spill] sm:$0xff] }
 0x123   : >> { %v5233_v26 = vpop.f32.mrf.mxu1  ;;  %v5283_v14 = vpop.f32.mrf.mxu0  ;;  %5532 = vmatmul.mubr.msk.f32.gmra.mxu1 %vm341_vm2, %v4704_v57  ;;  %5582 = vmatmul.mubr.msk.f32.gmra.mxu0 %vm341_vm2, %v4771_v20  ;;  %v7520_v57 = vld [vmem:[#allocation31_spill] sm:$0xff]  ;;  %v7521_v20 = vld [vmem:[#allocation8_spill] sm:$0xff] }
 0x124   : >> { %v6821_v37 = vadd.f32 %v1282_v44, %v923_v59  ;;  %v938_v11 = vadd.f32 %v5233_v26, %v6574_v36  ;;  %5534 = vmatprep.mubr.msk.f32.mxu1 %vm341_vm2, %v4705_v25  ;;  %5584 = vmatprep.mubr.msk.f32.mxu0 %vm341_vm2, %v4772_v52  ;;  %v4712_v24 = vld [vmem:[%s5775_s10 + $0x130] sm:$0xff]  ;;  %v4713_v59 = vld [vmem:[%s5775_s10 + $0x138] sm:$0xff] }
 0x125   : >> { %v932_v29 = vpop.f32.mrf.mxu1  ;;  %v1292_v30 = vpop.f32.mrf.mxu0  ;;  %v4779_v44 = vld [vmem:[%s5775_s10 + $0x131] sm:$0xff]  ;;  %v4780_v26 = vld [vmem:[%s5775_s10 + $0x139] sm:$0xff] }
 0x126   : >> { %v6830_v18 = vadd.f32 %v5283_v14, %v938_v11  ;;  %v933_v63 = vadd.f32 %v932_v29, %v6586_v46  ;;  %v7522_v11 = vld [vmem:[#allocation5_spill] sm:$0xff] }
 0x127   : >> { %v5236_v41 = vpop.f32.mrf.mxu1  ;;  %v5286_v60 = vpop.f32.mrf.mxu0  ;;  %5535 = vmatmul.mubr.msk.f32.gmra.mxu1 %vm341_vm2, %v4706_v5  ;;  %5585 = vmatmul.mubr.msk.f32.gmra.mxu0 %vm341_vm2, %v4773_v39 }
 0x128   : >> { %v6835_v36 = vadd.f32 %v1292_v30, %v933_v63  ;;  %v948_v22 = vadd.f32 %v5236_v41, %v6590_v49  ;;  %5537 = vmatprep.mubr.msk.f32.mxu1 %vm341_vm2, %v4707_v58  ;;  %5587 = vmatprep.mubr.msk.f32.mxu0 %vm341_vm2, %v4774_v16  ;;  %v7523_v58 = vld [vmem:[#allocation7_spill] sm:$0xff]  ;;  %v4714_v63 = vld [vmem:[%s5775_s10 + $0x140] sm:$0xff] }
 0x129   : >> { %v942_v62 = vpop.f32.mrf.mxu1  ;;  %v1302_v2 = vpop.f32.mrf.mxu0  ;;  %v4781_v41 = vld [vmem:[%s5775_s10 + $0x141] sm:$0xff] }
 0x12a   : >> { %v6842_v54 = vadd.f32 %v5286_v60, %v948_v22  ;;  %v943_v46 = vadd.f32 %v942_v62, %v6602_v6 }
 0x12b   : >> { %v5239_v12 = vpop.f32.mrf.mxu1  ;;  %v5289_v4 = vpop.f32.mrf.mxu0  ;;  %5538 = vmatmul.mubr.msk.f32.gmra.mxu1 %vm341_vm2, %v4708_v55  ;;  %5588 = vmatmul.mubr.msk.f32.gmra.mxu0 %vm341_vm2, %v4775_v17  ;;  %v7524_v17 = vld [vmem:[#allocation9_spill] sm:$0xff] }
 0x12c   : >> { %v6847_v28 = vadd.f32 %v1302_v2, %v943_v46  ;;  %v958_v49 = vadd.f32 %v5239_v12, %v6606_v50  ;;  %5540 = vmatprep.mubr.msk.f32.mxu1 %vm341_vm2, %v6430_v51  ;;  %5590 = vmatprep.mubr.msk.f32.mxu0 %vm341_vm2, %v6633_v42  ;;  %v7518_v50 = vld [vmem:[#allocation6_spill] sm:$0xff] }
 0x12d   : >> { %v952_v47 = vpop.f32.mrf.mxu1  ;;  %v1312_v6 = vpop.f32.mrf.mxu0 }
 0x12e   : >> { %v6854_v34 = vadd.f32 %v5289_v4, %v958_v49  ;;  %v953_v56 = vadd.f32 %v952_v47, %v7516_v19  ;;  %v7525_v4 = vld [vmem:[#allocation10_spill] sm:$0xff] }
 0x12f   : >> { %v5242_v9 = vpop.f32.mrf.mxu1  ;;  %v5292_v8 = vpop.f32.mrf.mxu0  ;;  %5541 = vmatmul.mubr.msk.f32.gmra.mxu1 %vm341_vm2, %v7517_v7  ;;  %5591 = vmatmul.mubr.msk.f32.gmra.mxu0 %vm341_vm2, %v7518_v50 }
 0x130   : >> { %v6861_v51 = vadd.f32 %v1312_v6, %v953_v56  ;;  %v968_v42 = vadd.f32 %v5242_v9, %v7519_v38  ;;  %5543 = vmatprep.mubr.msk.f32.mxu1 %vm341_vm2, %v7520_v57  ;;  %5593 = vmatprep.mubr.msk.f32.mxu0 %vm341_vm2, %v7521_v20  ;;  %v7526_v56 = vld [vmem:[#allocation11_spill] sm:$0xff] }
 0x131   : >> { %v962_v25 = vpop.f32.mrf.mxu1  ;;  %v1322_v52 = vpop.f32.mrf.mxu0 }
 0x132   : >> { %v6872_v14 = vadd.f32 %v5292_v8, %v968_v42  ;;  %v963_v5 = vadd.f32 %v962_v25, %v7522_v11 }
 0x133   : >> { %v5245_v39 = vpop.f32.mrf.mxu1  ;;  %v5295_v29 = vpop.f32.mrf.mxu0  ;;  %5544 = vmatmul.mubr.msk.f32.gmra.mxu1 %vm341_vm2, %v4712_v24  ;;  %5594 = vmatmul.mubr.msk.f32.gmra.mxu0 %vm341_vm2, %v4779_v44 }
 0x134   : >> { %v6877_v30 = vadd.f32 %v1322_v52, %v963_v5  ;;  %v978_v16 = vadd.f32 %v5245_v39, %v7523_v58  ;;  %5546 = vmatprep.mubr.msk.f32.mxu1 %vm341_vm2, %v4713_v59  ;;  %5596 = vmatprep.mubr.msk.f32.mxu0 %vm341_vm2, %v4780_v26 }
 0x135   : >> { %v972_v60 = vpop.f32.mrf.mxu1  ;;  %v1332_v22 = vpop.f32.mrf.mxu0 }
 0x136   : >> { %v6884_v55 = vadd.f32 %v5295_v29, %v978_v16  ;;  %v973_v62 = vadd.f32 %v972_v60, %v7524_v17 }
 0x137   : >> { %v5248_v2 = vpop.f32.mrf.mxu1  ;;  %v5298_v46 = vpop.f32.mrf.mxu0  ;;  %5547 = vmatmul.mubr.msk.f32.gmra.mxu1 %vm341_vm2, %v4714_v63  ;;  %5597 = vmatmul.mubr.msk.f32.gmra.mxu0 %vm341_vm2, %v4781_v41 }
 0x138   : >> { %v6889_v12 = vadd.f32 %v1332_v22, %v973_v62  ;;  %v988_v49 = vadd.f32 %v5248_v2, %v7525_v4 }
 0x139   : >> { %v982_v47 = vpop.f32.mrf.mxu1  ;;  %v1342_v6 = vpop.f32.mrf.mxu0 }
 0x13a   : >> { %v6892_v19 = vadd.f32 %v5298_v46, %v988_v49  ;;  %v983_v9 = vadd.f32 %v982_v47, %v7526_v56 }
 0x13b   : >> { %v5303_v8 = vpop.f32.mrf.mxu1  ;;  %v5353_v7 = vpop.f32.mrf.mxu0 }
 0x13c   : >> { %v6895_v50 = vadd.f32 %v1342_v6, %v983_v9  ;;  %v1744_v38 = vadd.f32 %v5303_v8, %v6686_v13 }
 0x13d   : >> { %v1584_v42 = vpop.f32.mrf.mxu1  ;;  %v1975_v57 = vpop.f32.mrf.mxu0 }
 0x13e   : >> { %v6898_v20 = vadd.f32 %v5353_v7, %v1744_v38  ;;  %v1743_v24 = vadd.f32 %v1584_v42, %v6693_v21 }
 0x13f   : >> { %v5306_v44 = vpop.f32.mrf.mxu1  ;;  %v5356_v25 = vpop.f32.mrf.mxu0 }
 0x140   : >> { %v6901_v52 = vadd.f32 %v1975_v57, %v1743_v24  ;;  %v1746_v59 = vadd.f32 %v5306_v44, %v6700_v43 }
 0x141   : >> { %v1594_v26 = vpop.f32.mrf.mxu1  ;;  %v1985_v11 = vpop.f32.mrf.mxu0 }
 0x142   : >> { %v6904_v5 = vadd.f32 %v5356_v25, %v1746_v59  ;;  %v1745_v39 = vadd.f32 %v1594_v26, %v6707_v10 }
 0x143   : >> { %v5309_v29 = vpop.f32.mrf.mxu1  ;;  %v5359_v13 = vpop.f32.mrf.mxu0 }
 0x144   : >> { %v6907_v58 = vadd.f32 %v1985_v11, %v1745_v39  ;;  %v1748_v16 = vadd.f32 %v5309_v29, %v6714_v1 }
 0x145   : >> { %v1604_v63 = vpop.f32.mrf.mxu1  ;;  %v1995_v21 = vpop.f32.mrf.mxu0 }
 0x146   : >> { %v6910_v41 = vadd.f32 %v5359_v13, %v1748_v16  ;;  %v1747_v60 = vadd.f32 %v1604_v63, %v6721_v32 }
 0x147   : >> { %v5312_v22 = vpop.f32.mrf.mxu1  ;;  %v5362_v43 = vpop.f32.mrf.mxu0 }
 0x148   : >> { %v6913_v17 = vadd.f32 %v1995_v21, %v1747_v60  ;;  %v1750_v62 = vadd.f32 %v5312_v22, %v6730_v33 }
 0x149   : >> { %v1614_v2 = vpop.f32.mrf.mxu1  ;;  %v2005_v10 = vpop.f32.mrf.mxu0 }
 0x14a   : >> { %v6916_v46 = vadd.f32 %v5362_v43, %v1750_v62  ;;  %v1749_v4 = vadd.f32 %v1614_v2, %v6736_v35 }
 0x14b   : >> { %v5315_v49 = vpop.f32.mrf.mxu1  ;;  %v5365_v1 = vpop.f32.mrf.mxu0 }
 0x14c   : >> { %v6919_v47 = vadd.f32 %v2005_v10, %v1749_v4  ;;  %v1752_v6 = vadd.f32 %v5315_v49, %v6744_v23 }
 0x14d   : >> { %v1624_v56 = vpop.f32.mrf.mxu1  ;;  %v2015_v32 = vpop.f32.mrf.mxu0 }
 0x14e   : >> { %v6922_v9 = vadd.f32 %v5365_v1, %v1752_v6  ;;  %v1751_v8 = vadd.f32 %v1624_v56, %v6750_v48 }
 0x14f   : >> { %v5318_v7 = vpop.f32.mrf.mxu1  ;;  %v5368_v33 = vpop.f32.mrf.mxu0 }
 0x150   : >> { %v6925_v38 = vadd.f32 %v2015_v32, %v1751_v8  ;;  %v1754_v42 = vadd.f32 %v5318_v7, %v6758_v27 }
 0x151   : >> { %v1634_v57 = vpop.f32.mrf.mxu1  ;;  %v2025_v35 = vpop.f32.mrf.mxu0 }
 0x152   : >> { %v6928_v24 = vadd.f32 %v5368_v33, %v1754_v42  ;;  %v1753_v44 = vadd.f32 %v1634_v57, %v6764_v40 }
 0x153   : >> { %v5321_v25 = vpop.f32.mrf.mxu1  ;;  %v5371_v23 = vpop.f32.mrf.mxu0 }
 0x154   : >> { %v6931_v59 = vadd.f32 %v2025_v35, %v1753_v44  ;;  %v1756_v26 = vadd.f32 %v5321_v25, %v6772_v31 }
 0x155   : >> { %v1644_v11 = vpop.f32.mrf.mxu1  ;;  %v2035_v48 = vpop.f32.mrf.mxu0 }
 0x156   : >> { %v6934_v39 = vadd.f32 %v5371_v23, %v1756_v26  ;;  %v1755_v29 = vadd.f32 %v1644_v11, %v6778_v45 }
 0x157   : >> { %v5324_v13 = vpop.f32.mrf.mxu1  ;;  %v5374_v27 = vpop.f32.mrf.mxu0 }
 0x158   : >> { %v6937_v16 = vadd.f32 %v2035_v48, %v1755_v29  ;;  %v1758_v63 = vadd.f32 %v5324_v13, %v6786_v61 }
 0x159   : >> { %v1654_v21 = vpop.f32.mrf.mxu1  ;;  %v2045_v40 = vpop.f32.mrf.mxu0 }
 0x15a   : >> { %v6940_v60 = vadd.f32 %v5374_v27, %v1758_v63  ;;  %v1757_v22 = vadd.f32 %v1654_v21, %v6792_v15 }
 0x15b   : >> { %v5327_v43 = vpop.f32.mrf.mxu1  ;;  %v5377_v31 = vpop.f32.mrf.mxu0 }
 0x15c   : >> { %v6943_v62 = vadd.f32 %v2045_v40, %v1757_v22  ;;  %v1760_v2 = vadd.f32 %v5327_v43, %v6800_v53 }
 0x15d   : >> { %v1664_v10 = vpop.f32.mrf.mxu1  ;;  %v2055_v45 = vpop.f32.mrf.mxu0 }
 0x15e   : >> { %v6946_v4 = vadd.f32 %v5377_v31, %v1760_v2  ;;  %v1759_v49 = vadd.f32 %v1664_v10, %v6806_v0 }
 0x15f   : >> { %v5330_v1 = vpop.f32.mrf.mxu1  ;;  %v5380_v61 = vpop.f32.mrf.mxu0 }
 0x160   : >> { %7527 = vst [vmem:[#allocation12_spill] sm:$0xff] %v6946_v4  ;;  %v6949_v6 = vadd.f32 %v2055_v45, %v1759_v49  ;;  %v1762_v56 = vadd.f32 %v5330_v1, %v6816_v3 }
 0x161   : >> { %v1674_v32 = vpop.f32.mrf.mxu1  ;;  %v2065_v15 = vpop.f32.mrf.mxu0 }
 0x162   : >> { %7528 = vst [vmem:[#allocation13_spill] sm:$0xff] %v6949_v6  ;;  %v6952_v8 = vadd.f32 %v5380_v61, %v1762_v56  ;;  %v1761_v7 = vadd.f32 %v1674_v32, %v6821_v37 }
 0x163   : >> { %v5333_v33 = vpop.f32.mrf.mxu1  ;;  %v5383_v53 = vpop.f32.mrf.mxu0 }
 0x164   : >> { %7529 = vst [vmem:[#allocation14_spill] sm:$0xff] %v6952_v8  ;;  %v6955_v42 = vadd.f32 %v2065_v15, %v1761_v7  ;;  %v1764_v57 = vadd.f32 %v5333_v33, %v6830_v18 }
 0x165   : >> { %v1684_v35 = vpop.f32.mrf.mxu1  ;;  %v2075_v0 = vpop.f32.mrf.mxu0 }
 0x166   : >> { %7530 = vst [vmem:[#allocation15_spill] sm:$0xff] %v6955_v42  ;;  %v6958_v44 = vadd.f32 %v5383_v53, %v1764_v57  ;;  %v1763_v25 = vadd.f32 %v1684_v35, %v6835_v36 }
 0x167   : >> { %v5336_v23 = vpop.f32.mrf.mxu1  ;;  %v5386_v3 = vpop.f32.mrf.mxu0 }
 0x168   : >> { %7531 = vst [vmem:[#allocation16_spill] sm:$0xff] %v6958_v44  ;;  %v6961_v26 = vadd.f32 %v2075_v0, %v1763_v25  ;;  %v1766_v11 = vadd.f32 %v5336_v23, %v6842_v54  ;;  %v7079_v44 = vpop.permute.xlu0 %3807 }
 0x169   : >> { %v1694_v48 = vpop.f32.mrf.mxu1  ;;  %v2085_v37 = vpop.f32.mrf.mxu0 }
 0x16a   : >> { %7532 = vst [vmem:[#allocation17_spill] sm:$0xff] %v6961_v26  ;;  %v6964_v29 = vadd.f32 %v5386_v3, %v1766_v11  ;;  %v1765_v13 = vadd.f32 %v1694_v48, %v6847_v28 }
 0x16b   : >> { %v5339_v27 = vpop.f32.mrf.mxu1  ;;  %v5389_v18 = vpop.f32.mrf.mxu0 }
 0x16c   : >> { %7533 = vst [vmem:[#allocation18_spill] sm:$0xff] %v6964_v29  ;;  %v6967_v63 = vadd.f32 %v2085_v37, %v1765_v13  ;;  %v1768_v21 = vadd.f32 %v5339_v27, %v6854_v34 }
 0x16d   : >> { %v1704_v40 = vpop.f32.mrf.mxu1  ;;  %v2095_v36 = vpop.f32.mrf.mxu0 }
 0x16e   : >> { %7534 = vst [vmem:[#allocation19_spill] sm:$0xff] %v6967_v63  ;;  %v6970_v22 = vadd.f32 %v5389_v18, %v1768_v21  ;;  %v1767_v43 = vadd.f32 %v1704_v40, %v6861_v51  ;;  %v7073_v63 = vpop.permute.xlu1 %3817 }
 0x16f   : >> { %v5342_v31 = vpop.f32.mrf.mxu1  ;;  %v5392_v54 = vpop.f32.mrf.mxu0 }
 0x170   : >> { %7535 = vst [vmem:[#allocation20_spill] sm:$0xff] %v6970_v22  ;;  %v6973_v2 = vadd.f32 %v2095_v36, %v1767_v43  ;;  %v1770_v10 = vadd.f32 %v5342_v31, %v6872_v14 }
 0x171   : >> { %v1714_v45 = vpop.f32.mrf.mxu1  ;;  %v2105_v28 = vpop.f32.mrf.mxu0 }
 0x172   : >> { %7536 = vst [vmem:[#allocation21_spill] sm:$0xff] %v6973_v2  ;;  %v6976_v49 = vadd.f32 %v5392_v54, %v1770_v10  ;;  %v1769_v1 = vadd.f32 %v1714_v45, %v6877_v30 }
 0x173   : >> { %v5345_v61 = vpop.f32.mrf.mxu1  ;;  %v5395_v34 = vpop.f32.mrf.mxu0 }
 0x174   : >> { %7537 = vst [vmem:[#allocation22_spill] sm:$0xff] %v6976_v49  ;;  %v6979_v56 = vadd.f32 %v2105_v28, %v1769_v1  ;;  %v1772_v32 = vadd.f32 %v5345_v61, %v6884_v55 }
 0x175   : >> { %v1724_v15 = vpop.f32.mrf.mxu1  ;;  %v2115_v51 = vpop.f32.mrf.mxu0 }
 0x176   : >> { %7538 = vst [vmem:[#allocation23_spill] sm:$0xff] %v6979_v56  ;;  %v6982_v7 = vadd.f32 %v5395_v34, %v1772_v32  ;;  %v1771_v33 = vadd.f32 %v1724_v15, %v6889_v12 }
 0x177   : >> { %v5348_v53 = vpop.f32.mrf.mxu1  ;;  %v5398_v14 = vpop.f32.mrf.mxu0 }
 0x178   : >> { %7539 = vst [vmem:[#allocation24_spill] sm:$0xff] %v6982_v7  ;;  %v6985_v57 = vadd.f32 %v2115_v51, %v1771_v33  ;;  %v1774_v35 = vadd.f32 %v5348_v53, %v6892_v19 }
 0x179   : >> { %v1734_v0 = vpop.f32.mrf.mxu1  ;;  %v2125_v30 = vpop.f32.mrf.mxu0 }
 0x17a   : >> { %7540 = vst [vmem:[#allocation25_spill] sm:$0xff] %v6985_v57  ;;  %v6988_v25 = vadd.f32 %v5398_v14, %v1774_v35  ;;  %v1773_v23 = vadd.f32 %v1734_v0, %v6895_v50 }
 0x17b   : >> { %v6991_v3 = vpop.f32.mrf.mxu1  ;;  %v6993_v55 = vpop.f32.mrf.mxu0 }
 0x17c   : >> { %7541 = vst [vmem:[#allocation26_spill] sm:$0xff] %v6988_v25  ;;  %v6995_v11 = vadd.f32 %v2125_v30, %v1773_v23 }
 0x17d   : >> { %v6997_v48 = vpop.f32.mrf.mxu1  ;;  %v6999_v12 = vpop.f32.mrf.mxu0 }
 0x17e   : >> { %7542 = vst [vmem:[#allocation27_spill] sm:$0xff] %v6995_v11 }
 0x17f   : >> { %v7001_v37 = vpop.f32.mrf.mxu1  ;;  %v7003_v13 = vpop.f32.mrf.mxu0 }
 0x181   : >> { %v7005_v19 = vpop.f32.mrf.mxu1  ;;  %v7007_v27 = vpop.f32.mrf.mxu0 }
 0x183   : >> { %v7009_v18 = vpop.f32.mrf.mxu1  ;;  %v7011_v50 = vpop.f32.mrf.mxu0 }
 0x185   : >> { %v7013_v21 = vpop.f32.mrf.mxu1  ;;  %v7015_v40 = vpop.f32.mrf.mxu0 }
 0x187   : >> { %v7017_v36 = vpop.f32.mrf.mxu1  ;;  %v7019_v43 = vpop.f32.mrf.mxu0 }
 0x189   : >> { %v7021_v31 = vpop.f32.mrf.mxu1  ;;  %v7023_v54 = vpop.f32.mrf.mxu0 }
 0x18b   : >> { %v7025_v10 = vpop.f32.mrf.mxu1  ;;  %v7027_v45 = vpop.f32.mrf.mxu0 }
 0x18d   : >> { %v7029_v28 = vpop.f32.mrf.mxu1  ;;  %v7031_v1 = vpop.f32.mrf.mxu0 }
 0x18f   : >> { %v7033_v61 = vpop.f32.mrf.mxu1  ;;  %v7035_v34 = vpop.f32.mrf.mxu0 }
 0x191   : >> { %v7037_v32 = vpop.f32.mrf.mxu1  ;;  %v7039_v15 = vpop.f32.mrf.mxu0 }
 0x193   : >> { %v7041_v51 = vpop.f32.mrf.mxu1  ;;  %v7043_v33 = vpop.f32.mrf.mxu0 }
 0x195   : >> { %v7045_v53 = vpop.f32.mrf.mxu1  ;;  %v7047_v14 = vpop.f32.mrf.mxu0 }
 0x197   : >> { %v7049_v35 = vpop.f32.mrf.mxu1  ;;  %v7051_v0 = vpop.f32.mrf.mxu0 }
 0x198   : >> { %7543 = vst [vmem:[#allocation28_spill] sm:$0xff] %v7051_v0 }
 0x199   : >> { %v7053_v30 = vpop.f32.mrf.mxu1  ;;  %v7055_v23 = vpop.f32.mrf.mxu0 }
 0x19a   : >> { %7544 = vst [vmem:[#allocation29_spill] sm:$0xff] %v7053_v30  ;;  %7545 = vst [vmem:[#allocation3_spill] sm:$0xff] %v7055_v23 }
 0x19b   : >> { %v7057_v11 = vpop.f32.mrf.mxu1  ;;  %v7059_v25 = vpop.f32.mrf.mxu0 }
 0x19c   : >> { %7546 = vst [vmem:[#allocation30_spill] sm:$0xff] %v7057_v11  ;;  %7547 = vst [vmem:[#allocation6_spill] sm:$0xff] %v7059_v25  ;;  %v3813_v25 = vpop.permute.xlu0 %3812 }
 0x19d   : >> { %v7061_v57 = vpop.f32.mrf.mxu1  ;;  %v7063_v7 = vpop.f32.mrf.mxu0 }
 0x19e   : >> { %7548 = vst [vmem:[#allocation4_spill] sm:$0xff] %v7061_v57  ;;  %7549 = vst [vmem:[#allocation31_spill] sm:$0xff] %v7063_v7 }
 0x19f   : >> { %v7065_v56 = vpop.f32.mrf.mxu1  ;;  %v7067_v49 = vpop.f32.mrf.mxu0 }
 0x1a0   : >> { %7550 = vst [vmem:[#allocation8_spill] sm:$0xff] %v7065_v56  ;;  %7551 = vst [vmem:[#allocation5_spill] sm:$0xff] %v7067_v49  ;;  %v7089_v49 = vpop.permute.xlu1 %3822  ;;  %v7109_v6 = vpop.permute.xlu0 %3827 }
 0x1a1   : >> { %v7069_v2 = vpop.f32.mrf.mxu1  ;;  %v7071_v22 = vpop.f32.mrf.mxu0 }
 0x1a2   : >> { %7552 = vst [vmem:[#allocation7_spill] sm:$0xff] %v7069_v2  ;;  %7553 = vst [vmem:[#allocation9_spill] sm:$0xff] %v7071_v22 }
 0x1a3   : >> { %v7075_v29 = vpop.f32.mrf.mxu1  ;;  %v7077_v26 = vpop.f32.mrf.mxu0 }
 0x1a4   : >> { %7554 = vst [vmem:[#allocation10_spill] sm:$0xff] %v7075_v29  ;;  %7555 = vst [vmem:[#allocation11_spill] sm:$0xff] %v7077_v26 }
 0x1a5   : >> { %v7081_v42 = vpop.f32.mrf.mxu1  ;;  %v7083_v8 = vpop.f32.mrf.mxu0 }
 0x1a6   : >> { %7556 = vst [vmem:[#allocation32_spill] sm:$0xff] %v7081_v42  ;;  %7557 = vst [vmem:[#allocation33_spill] sm:$0xff] %v7083_v8  ;;  %v7103_v8 = vpop.permute.xlu1 %3832 }
 0x1a7   : >> { %v7085_v7 = vpop.f32.mrf.mxu1  ;;  %v7087_v56 = vpop.f32.mrf.mxu0 }
 0x1a8   : >> { %7558 = vst [vmem:[#allocation34_spill] sm:$0xff] %v7085_v7  ;;  %7559 = vst [vmem:[#allocation35_spill] sm:$0xff] %v7087_v56 }
 0x1a9   : >> { %v7091_v2 = vpop.f32.mrf.mxu1  ;;  %v7093_v22 = vpop.f32.mrf.mxu0 }
 0x1aa   : >> { %7560 = vst [vmem:[#allocation36_spill] sm:$0xff] %v7091_v2  ;;  %7561 = vst [vmem:[#allocation37_spill] sm:$0xff] %v7093_v22 }
 0x1ab   : >> { %v7095_v29 = vpop.f32.mrf.mxu1  ;;  %v7097_v26 = vpop.f32.mrf.mxu0 }
 0x1ac   : >> { %7562 = vst [vmem:[#allocation38_spill] sm:$0xff] %v7095_v29  ;;  %7563 = vst [vmem:[#allocation39_spill] sm:$0xff] %v7097_v26  ;;  %v7119_v26 = vpop.permute.xlu1 %3842 }
 0x1ad   : >> { %v7099_v57 = vpop.f32.mrf.mxu1  ;;  %v7101_v42 = vpop.f32.mrf.mxu0 }
 0x1ae   : >> { %7564 = vst [vmem:[#allocation40_spill] sm:$0xff] %v7099_v57  ;;  %7565 = vst [vmem:[#allocation41_spill] sm:$0xff] %v7101_v42 }
 0x1af   : >> { %v7105_v7 = vpop.f32.mrf.mxu1  ;;  %v7107_v56 = vpop.f32.mrf.mxu0 }
 0x1b0   : >> { %7566 = vst [vmem:[#allocation42_spill] sm:$0xff] %v7105_v7  ;;  %7567 = vst [vmem:[#allocation43_spill] sm:$0xff] %v7107_v56  ;;  %v2527_v7 = vadd.f32 %v6991_v3, %v6898_v20  ;;  %v7127_v56 = vpop.permute.xlu0 %3837  ;;  %v7142_v11 = vpop.permute.xlu1 %3852 }
 0x1b1   : >> { %v7111_v2 = vpop.f32.mrf.mxu1  ;;  %v7113_v22 = vpop.f32.mrf.mxu0 }
 0x1b2   : >> { %7568 = vst [vmem:[#allocation44_spill] sm:$0xff] %v7111_v2  ;;  %7569 = vst [vmem:[#allocation45_spill] sm:$0xff] %v7113_v22  ;;  %v2526_v22 = vadd.f32 %v6997_v48, %v6901_v52 }
 0x1b3   : >> { %v7115_v23 = vpop.f32.mrf.mxu1  ;;  %v7117_v29 = vpop.f32.mrf.mxu0 }
 0x1b4   : >> { %7570 = vst [vmem:[#allocation46_spill] sm:$0xff] %v7115_v23  ;;  %7571 = vst [vmem:[#allocation47_spill] sm:$0xff] %v7117_v29  ;;  %v7147_v4 = vpop.permute.xlu0 %3847 }
 0x1b5   : >> { %v7121_v57 = vpop.f32.mrf.mxu1  ;;  %v7123_v42 = vpop.f32.mrf.mxu0 }
 0x1b6   : >> { %7572 = vst [vmem:[#allocation48_spill] sm:$0xff] %v7121_v57  ;;  %7573 = vst [vmem:[#allocation49_spill] sm:$0xff] %v7123_v42  ;;  %v2919_v57 = vadd.f32 %v6993_v55, %v2527_v7  ;;  %v2529_v42 = vadd.f32 %v7001_v37, %v6904_v5  ;;  %v2531_v5 = vadd.f32 %v7009_v18, %v6910_v41 }
 0x1b7   : >> { %v7129_v0 = vpop.f32.mrf.mxu1  ;;  %v7131_v2 = vpop.f32.mrf.mxu0  ;;  %v2530_v37 = vadd.f32 %v7013_v21, %v6913_v17 }
 0x1b8   : >> { %7574 = vst [vmem:[#allocation50_spill] sm:$0xff] %v7129_v0  ;;  %7575 = vst [vmem:[#allocation51_spill] sm:$0xff] %v7131_v2  ;;  %v2918_v0 = vadd.f32 %v6999_v12, %v2526_v22  ;;  %v2528_v2 = vadd.f32 %v7005_v19, %v6907_v58  ;;  %v7155_v58 = vpop.permute.xlu1 %3862  ;;  %v7160_v18 = vpop.permute.xlu0 %3857 }
 0x1b9   : >> { %v7135_v23 = vpop.f32.mrf.mxu1  ;;  %v7137_v29 = vpop.f32.mrf.mxu0 }
 0x1ba   : >> { %7576 = vst [vmem:[#allocation52_spill] sm:$0xff] %v7135_v23  ;;  %7577 = vst [vmem:[#allocation53_spill] sm:$0xff] %v7137_v29  ;;  %v2921_v29 = vadd.f32 %v7003_v13, %v2529_v42  ;;  %v2920_v12 = vadd.f32 %v7007_v27, %v2528_v2  ;;  %v2533_v13 = vadd.f32 %v7017_v36, %v6916_v46 }
 0x1bb   : >> { %v5503_v20 = vpop.f32.mrf.mxu1  ;;  %v5553_v3 = vpop.f32.mrf.mxu0  ;;  %v2923_v27 = vadd.f32 %v7011_v50, %v2531_v5  ;;  %v2535_v50 = vadd.f32 %v7025_v10, %v6922_v9 }
 0x1bc   : >> { %v3311_v52 = vadd.f32 %v5503_v20, %v2919_v57  ;;  %v7578_v57 = vld [vmem:[#allocation2_spill] sm:$0xff]  ;;  %v7183_v9 = vpop.permute.xlu0 %3867 }
 0x1bd   : >> { %v3151_v48 = vpop.f32.mrf.mxu1  ;;  %v3543_v23 = vpop.f32.mrf.mxu0 }
 0x1be   : >> { %v3703_v7 = vadd.f32 %v5553_v3, %v3311_v52  ;;  %v3310_v55 = vadd.f32 %v3151_v48, %v2918_v0  ;;  %v2922_v52 = vadd.f32 %v7015_v40, %v2530_v37 }
 0x1bf   : >> { %v5506_v30 = vpop.f32.mrf.mxu1  ;;  %v5556_v22 = vpop.f32.mrf.mxu0 }
 0x1c0   : >> { %v3741_v19 = vadd.f32 %v7578_v57, %v3703_v7  ;;  %v3702_v20 = vadd.f32 %v3543_v23, %v3310_v55  ;;  %v3313_v42 = vadd.f32 %v5506_v30, %v2921_v29  ;;  %v2532_v23 = vadd.f32 %v7021_v31, %v6919_v47  ;;  %v7176_v31 = vpop.permute.xlu1 %3872 }
 0x1c1   : >> { %v3161_v0 = vpop.f32.mrf.mxu1  ;;  %v3553_v41 = vpop.f32.mrf.mxu0  ;;  %v2925_v7 = vadd.f32 %v7019_v43, %v2533_v13 }
 0x1c2   : >> { %v3966_v17 = vmul.f32 %v3813_v25, %v3741_v19  ;;  %v3740_v21 = vadd.f32 %v7578_v57, %v3702_v20  ;;  %v3705_v3 = vadd.f32 %v5556_v22, %v3313_v42  ;;  %v3312_v2 = vadd.f32 %v3161_v0, %v2920_v12 }
 0x1c3   : >> { %v5509_v46 = vpop.f32.mrf.mxu1  ;;  %v5559_v29 = vpop.f32.mrf.mxu0  ;;  %v2924_v12 = vadd.f32 %v7023_v54, %v2532_v23  ;;  %v2537_v54 = vadd.f32 %v7033_v61, %v6928_v24 }
 0x1c4   : >> { %v3998_v36 = vmax.f32 %v3966_v17, 0.0  ;;  %v3965_v30 = vmul.f32 %v7079_v44, %v3740_v21  ;;  %v3743_v25 = vadd.f32 %v7578_v57, %v3705_v3  ;;  %v3704_v48 = vadd.f32 %v3553_v41, %v3312_v2 }
 0x1c5   : >> { %v3315_v40 = vadd.f32 %v5509_v46, %v2923_v27  ;;  %v3171_v55 = vpop.f32.mrf.mxu1  ;;  %v3563_v47 = vpop.f32.mrf.mxu0  ;;  %v2534_v41 = vadd.f32 %v7029_v28, %v6925_v38 }
 0x1c6   : >> { %4819 = vst.msk [vmem:[%s7169_s6 + $0x38] sm:$0xff] %vm249_vm0, %v3998_v36  ;;  %v3997_v5 = vmax.f32 %v3965_v30, 0.0  ;;  %v3968_v37 = vmul.f32 %v7089_v49, %v3743_v25  ;;  %v3742_v44 = vadd.f32 %v7578_v57, %v3704_v48  ;;  %v3314_v22 = vadd.f32 %v3171_v55, %v2922_v52  ;;  %v7200_v46 = vpop.permute.xlu1 %3882 }
 0x1c7   : >> { %v3707_v43 = vadd.f32 %v5559_v29, %v3315_v40  ;;  %v5512_v19 = vpop.f32.mrf.mxu1  ;;  %v5562_v20 = vpop.f32.mrf.mxu0  ;;  %v2927_v49 = vadd.f32 %v7027_v45, %v2535_v50  ;;  %v2536_v45 = vadd.f32 %v7037_v32, %v6931_v59  ;;  %v2926_v30 = vadd.f32 %v7031_v1, %v2534_v41 }
 0x1c8   : >> { %4818 = vst.msk [vmem:[%s7169_s6 + $0x30] sm:$0xff] %vm249_vm0, %v3997_v5  ;;  %v4000_v10 = vmax.f32 %v3968_v37, 0.0  ;;  %v3967_v42 = vmul.f32 %v7073_v63, %v3742_v44  ;;  %v3706_v13 = vadd.f32 %v3563_v47, %v3314_v22  ;;  %v3317_v0 = vadd.f32 %v5512_v19, %v2925_v7  ;;  %v7210_v7 = vpop.permute.xlu0 %3877 }
 0x1c9   : >> { %v3745_v17 = vadd.f32 %v7578_v57, %v3707_v43  ;;  %v3181_v21 = vpop.f32.mrf.mxu1  ;;  %v3573_v3 = vpop.f32.mrf.mxu0  ;;  %v2929_v25 = vadd.f32 %v7035_v34, %v2537_v54  ;;  %v2539_v59 = vadd.f32 %v7041_v51, %v6934_v39  ;;  %v2928_v47 = vadd.f32 %v7039_v15, %v2536_v45 }
 0x1ca   : >> { %4821 = vst.msk [vmem:[%s7169_s6 + $0x48] sm:$0xff] %vm249_vm0, %v4000_v10  ;;  %v3999_v2 = vmax.f32 %v3967_v42, 0.0  ;;  %v3744_v63 = vadd.f32 %v7578_v57, %v3706_v13  ;;  %v3709_v27 = vadd.f32 %v5562_v20, %v3317_v0  ;;  %v3316_v52 = vadd.f32 %v3181_v21, %v2924_v12 }
 0x1cb   : >> { %v3970_v23 = vmul.f32 %v7103_v8, %v3745_v17  ;;  %v5515_v38 = vpop.f32.mrf.mxu1  ;;  %v5565_v28 = vpop.f32.mrf.mxu0  ;;  %v2538_v1 = vadd.f32 %v7045_v53, %v6937_v16  ;;  %v2931_v22 = vadd.f32 %v7043_v33, %v2539_v59  ;;  %v2541_v42 = vadd.f32 %v7049_v35, %v6940_v60  ;;  %v7579_v33 = vld [vmem:[#allocation29_spill] sm:$0xff] }
 0x1cc   : >> { %4820 = vst.msk [vmem:[%s7169_s6 + $0x40] sm:$0xff] %vm249_vm0, %v3999_v2  ;;  %v3969_v24 = vmul.f32 %v7109_v6, %v3744_v63  ;;  %v3747_v61 = vadd.f32 %v7578_v57, %v3709_v27  ;;  %v3708_v29 = vadd.f32 %v3573_v3, %v3316_v52  ;;  %v3319_v36 = vadd.f32 %v5515_v38, %v2927_v49  ;;  %v7224_v16 = vpop.permute.xlu1 %3892  ;;  %v7235_v54 = vpop.permute.xlu0 %3887  ;;  %v7580_v3 = vld [vmem:[#allocation12_spill] sm:$0xff]  ;;  %v7581_v2 = vld [vmem:[#allocation30_spill] sm:$0xff] }
 0x1cd   : >> { %v4002_v8 = vmax.f32 %v3970_v23, 0.0  ;;  %v3191_v32 = vpop.f32.mrf.mxu1  ;;  %v3583_v48 = vpop.f32.mrf.mxu0  ;;  %v2540_v13 = vadd.f32 %v7579_v33, %v6943_v62  ;;  %v2543_v63 = vadd.f32 %v7581_v2, %v7580_v3  ;;  %v7582_v38 = vld [vmem:[#allocation28_spill] sm:$0xff] }
 0x1ce   : >> { %v4001_v50 = vmax.f32 %v3969_v24, 0.0  ;;  %v3972_v6 = vmul.f32 %v7119_v26, %v3747_v61  ;;  %v3746_v40 = vadd.f32 %v7578_v57, %v3708_v29  ;;  %v3711_v55 = vadd.f32 %v5565_v28, %v3319_v36  ;;  %v7583_v24 = vld [vmem:[#allocation3_spill] sm:$0xff]  ;;  %v7584_v29 = vld [vmem:[#allocation13_spill] sm:$0xff]  ;;  %v7585_v36 = vld [vmem:[#allocation4_spill] sm:$0xff] }
 0x1cf   : >> { %4823 = vst.msk [vmem:[%s7169_s6 + $0x58] sm:$0xff] %vm249_vm0, %v4002_v8  ;;  %v3318_v39 = vadd.f32 %v3191_v32, %v2926_v30  ;;  %v5518_v34 = vpop.f32.mrf.mxu1  ;;  %v5568_v51 = vpop.f32.mrf.mxu0  ;;  %v2933_v28 = vadd.f32 %v7582_v38, %v2541_v42  ;;  %v2932_v61 = vadd.f32 %v7583_v24, %v2540_v13  ;;  %v2542_v30 = vadd.f32 %v7585_v36, %v7584_v29  ;;  %v7590_v42 = vld [vmem:[#allocation5_spill] sm:$0xff]  ;;  %v7591_v13 = vld [vmem:[#allocation15_spill] sm:$0xff] }
 0x1d0   : >> { %4822 = vst.msk [vmem:[%s7169_s6 + $0x50] sm:$0xff] %vm249_vm0, %v4001_v50  ;;  %v4004_v5 = vmax.f32 %v3972_v6, 0.0  ;;  %v3971_v37 = vmul.f32 %v7127_v56, %v3746_v40  ;;  %v3749_v26 = vadd.f32 %v7578_v57, %v3711_v55  ;;  %v3321_v44 = vadd.f32 %v5518_v34, %v2929_v25  ;;  %v7251_v8 = vpop.permute.xlu1 %3902  ;;  %v7586_v6 = vld [vmem:[#allocation6_spill] sm:$0xff]  ;;  %v7597_v36 = vld [vmem:[#allocation9_spill] sm:$0xff] }
 0x1d1   : >> { %v3710_v15 = vadd.f32 %v3583_v48, %v3318_v39  ;;  %v3201_v12 = vpop.f32.mrf.mxu1  ;;  %v3593_v43 = vpop.f32.mrf.mxu0  ;;  %v2930_v56 = vadd.f32 %v7047_v14, %v2538_v1  ;;  %v2935_v40 = vadd.f32 %v7586_v6, %v2543_v63  ;;  %v7587_v55 = vld [vmem:[#allocation14_spill] sm:$0xff] }
 0x1d2   : >> { %4825 = vst.msk [vmem:[%s7169_s6 + $0x68] sm:$0xff] %vm249_vm0, %v4004_v5  ;;  %v4003_v53 = vmax.f32 %v3971_v37, 0.0  ;;  %v3974_v19 = vmul.f32 %v7142_v11, %v3749_v26  ;;  %v3713_v20 = vadd.f32 %v5568_v51, %v3321_v44  ;;  %v3320_v10 = vadd.f32 %v3201_v12, %v2928_v47  ;;  %v7588_v47 = vld [vmem:[#allocation8_spill] sm:$0xff]  ;;  %v7260_v5 = vpop.permute.xlu0 %3897 }
 0x1d3   : >> { %v3748_v0 = vadd.f32 %v7578_v57, %v3710_v15  ;;  %v5521_v49 = vpop.f32.mrf.mxu1  ;;  %v5571_v41 = vpop.f32.mrf.mxu0  ;;  %v2545_v1 = vadd.f32 %v7588_v47, %v7587_v55  ;;  %v7601_v47 = vld [vmem:[#allocation33_spill] sm:$0xff] }
 0x1d4   : >> { %4824 = vst.msk [vmem:[%s7169_s6 + $0x60] sm:$0xff] %vm249_vm0, %v4003_v53  ;;  %v4006_v11 = vmax.f32 %v3974_v19, 0.0  ;;  %v3751_v17 = vadd.f32 %v7578_v57, %v3713_v20  ;;  %v3712_v21 = vadd.f32 %v3593_v43, %v3320_v10  ;;  %v3323_v14 = vadd.f32 %v5521_v49, %v2931_v22  ;;  %v7589_v22 = vld [vmem:[#allocation31_spill] sm:$0xff]  ;;  %v7593_v49 = vld [vmem:[#allocation16_spill] sm:$0xff]  ;;  %v7276_v3 = vpop.permute.xlu1 %3912 }
 0x1d5   : >> { %v3973_v60 = vmul.f32 %v7147_v4, %v3748_v0  ;;  %v3211_v35 = vpop.f32.mrf.mxu1  ;;  %v3603_v62 = vpop.f32.mrf.mxu0  ;;  %v2934_v15 = vadd.f32 %v7589_v22, %v2542_v30  ;;  %v2937_v33 = vadd.f32 %v7590_v42, %v2545_v1 }
 0x1d6   : >> { %4827 = vst.msk [vmem:[%s7169_s6 + $0x78] sm:$0xff] %vm249_vm0, %v4006_v11  ;;  %v3976_v27 = vmul.f32 %v7155_v58, %v3751_v17  ;;  %v3750_v52 = vadd.f32 %v7578_v57, %v3712_v21  ;;  %v3715_v45 = vadd.f32 %v5571_v41, %v3323_v14  ;;  %v3322_v23 = vadd.f32 %v3211_v35, %v2930_v56  ;;  %v7594_v41 = vld [vmem:[#allocation10_spill] sm:$0xff]  ;;  %v7595_v35 = vld [vmem:[#allocation17_spill] sm:$0xff]  ;;  %v7284_v38 = vpop.permute.xlu0 %3907 }
 0x1d7   : >> { %v4005_v4 = vmax.f32 %v3973_v60, 0.0  ;;  %v5524_v25 = vpop.f32.mrf.mxu1  ;;  %v5574_v59 = vpop.f32.mrf.mxu0  ;;  %v2547_v11 = vadd.f32 %v7594_v41, %v7593_v49  ;;  %v7607_v41 = vld [vmem:[#allocation38_spill] sm:$0xff] }
 0x1d8   : >> { %v4008_v32 = vmax.f32 %v3976_v27, 0.0  ;;  %v3975_v58 = vmul.f32 %v7160_v18, %v3750_v52  ;;  %v3753_v48 = vadd.f32 %v7578_v57, %v3715_v45  ;;  %v3714_v50 = vadd.f32 %v3603_v62, %v3322_v23  ;;  %v7596_v62 = vld [vmem:[#allocation32_spill] sm:$0xff] }
 0x1d9   : >> { %4826 = vst.msk [vmem:[%s7169_s6 + $0x70] sm:$0xff] %vm249_vm0, %v4005_v4  ;;  %v3325_v39 = vadd.f32 %v5524_v25, %v2933_v28  ;;  %v3221_v34 = vpop.f32.mrf.mxu1  ;;  %v3613_v51 = vpop.f32.mrf.mxu0  ;;  %v2546_v27 = vadd.f32 %v7596_v62, %v7595_v35  ;;  %v7598_v4 = vld [vmem:[#allocation11_spill] sm:$0xff] }
 0x1da   : >> { %4829 = vst.msk [vmem:[%s7169_s6 + $0x88] sm:$0xff] %vm249_vm0, %v4008_v32  ;;  %v4007_v37 = vmax.f32 %v3975_v58, 0.0  ;;  %v3978_v18 = vmul.f32 %v7176_v31, %v3753_v48  ;;  %v3752_v26 = vadd.f32 %v7578_v57, %v3714_v50  ;;  %v3324_v44 = vadd.f32 %v3221_v34, %v2932_v61  ;;  %v7592_v31 = vld [vmem:[#allocation7_spill] sm:$0xff]  ;;  %v7600_v32 = vld [vmem:[#allocation34_spill] sm:$0xff]  ;;  %v7603_v34 = vld [vmem:[#allocation36_spill] sm:$0xff] }
 0x1db   : >> { %v3717_v12 = vadd.f32 %v5574_v59, %v3325_v39  ;;  %v5527_v43 = vpop.f32.mrf.mxu1  ;;  %v5577_v53 = vpop.f32.mrf.mxu0  ;;  %v2544_v0 = vadd.f32 %v7592_v31, %v7591_v13  ;;  %v2939_v25 = vadd.f32 %v7598_v4, %v2547_v11  ;;  %v7599_v59 = vld [vmem:[#allocation18_spill] sm:$0xff]  ;;  %v2938_v1 = vadd.f32 %v7601_v47, %v2546_v27  ;;  %v7602_v39 = vld [vmem:[#allocation19_spill] sm:$0xff] }
 0x1dc   : >> { %4828 = vst.msk [vmem:[%s7169_s6 + $0x80] sm:$0xff] %vm249_vm0, %v4007_v37  ;;  %v4010_v19 = vmax.f32 %v3978_v18, 0.0  ;;  %v3977_v20 = vmul.f32 %v7183_v9, %v3752_v26  ;;  %v3716_v10 = vadd.f32 %v3613_v51, %v3324_v44  ;;  %v3327_v56 = vadd.f32 %v5527_v43, %v2935_v40  ;;  %v3923_v44 = vpop.permute.xlu1 %3922  ;;  %v7604_v43 = vld [vmem:[#allocation35_spill] sm:$0xff]  ;;  %v7610_v27 = vld [vmem:[#allocation22_spill] sm:$0xff] }
 0x1dd   : >> { %v3755_v17 = vadd.f32 %v7578_v57, %v3717_v12  ;;  %v3231_v21 = vpop.f32.mrf.mxu1  ;;  %v3623_v14 = vpop.f32.mrf.mxu0  ;;  %v2936_v30 = vadd.f32 %v7597_v36, %v2544_v0  ;;  %v2548_v51 = vadd.f32 %v7603_v34, %v7602_v39  ;;  %v7605_v0 = vld [vmem:[#allocation37_spill] sm:$0xff]  ;;  %v7616_v39 = vld [vmem:[#allocation43_spill] sm:$0xff] }
 0x1de   : >> { %4831 = vst.msk [vmem:[%s7169_s6 + $0x98] sm:$0xff] %vm249_vm0, %v4010_v19  ;;  %v4009_v9 = vmax.f32 %v3977_v20, 0.0  ;;  %v3754_v2 = vadd.f32 %v7578_v57, %v3716_v10  ;;  %v3719_v63 = vadd.f32 %v5577_v53, %v3327_v56  ;;  %v3326_v60 = vadd.f32 %v3231_v21, %v2934_v15  ;;  %v3918_v56 = vpop.permute.xlu0 %3917  ;;  %v7609_v21 = vld [vmem:[#allocation40_spill] sm:$0xff] }
 0x1df   : >> { %v3980_v52 = vmul.f32 %v7200_v46, %v3755_v17  ;;  %v5530_v45 = vpop.f32.mrf.mxu1  ;;  %v5580_v23 = vpop.f32.mrf.mxu0  ;;  %v2549_v46 = vadd.f32 %v7600_v32, %v7599_v59  ;;  %v2940_v49 = vadd.f32 %v7605_v0, %v2548_v51  ;;  %v7608_v17 = vld [vmem:[#allocation21_spill] sm:$0xff]  ;;  %v7617_v51 = vld [vmem:[#allocation24_spill] sm:$0xff] }
 0x1e0   : >> { %4830 = vst.msk [vmem:[%s7169_s6 + $0x90] sm:$0xff] %vm249_vm0, %v4009_v9  ;;  %v3979_v28 = vmul.f32 %v7210_v7, %v3754_v2  ;;  %v3757_v24 = vadd.f32 %v7578_v57, %v3719_v63  ;;  %v3718_v61 = vadd.f32 %v3623_v14, %v3326_v60  ;;  %v3329_v29 = vadd.f32 %v5530_v45, %v2937_v33  ;;  %v7613_v32 = vld [vmem:[#allocation41_spill] sm:$0xff] }
 0x1e1   : >> { %v4012_v58 = vmax.f32 %v3980_v52, 0.0  ;;  %v3241_v48 = vpop.f32.mrf.mxu1  ;;  %v3633_v50 = vpop.f32.mrf.mxu0  ;;  %v2941_v53 = vadd.f32 %v7604_v43, %v2549_v46  ;;  %v2550_v14 = vadd.f32 %v7609_v21, %v7608_v17  ;;  %v7611_v52 = vld [vmem:[#allocation42_spill] sm:$0xff] }
 0x1e2   : >> { %v4011_v6 = vmax.f32 %v3979_v28, 0.0  ;;  %v3982_v40 = vmul.f32 %v7224_v16, %v3757_v24  ;;  %v3756_v7 = vadd.f32 %v7578_v57, %v3718_v61  ;;  %v3721_v55 = vadd.f32 %v5580_v23, %v3329_v29  ;;  %v3933_v61 = vpop.permute.xlu1 %3932  ;;  %v7623_v21 = vld [vmem:[#allocation26_spill] sm:$0xff] }
 0x1e3   : >> { %4833 = vst.msk [vmem:[%s7169_s6 + $0xa8] sm:$0xff] %vm249_vm0, %v4012_v58  ;;  %v3328_v37 = vadd.f32 %v3241_v48, %v2936_v30  ;;  %v5533_v18 = vpop.f32.mrf.mxu1  ;;  %v5583_v26 = vpop.f32.mrf.mxu0  ;;  %v2553_v45 = vadd.f32 %v7611_v52, %v7610_v27  ;;  %v2942_v46 = vadd.f32 %v7613_v32, %v2550_v14  ;;  %v7614_v58 = vld [vmem:[#allocation23_spill] sm:$0xff]  ;;  %v7615_v48 = vld [vmem:[#allocation44_spill] sm:$0xff]  ;;  %v7624_v14 = vld [vmem:[#allocation50_spill] sm:$0xff] }
 0x1e4   : >> { %4832 = vst.msk [vmem:[%s7169_s6 + $0xa0] sm:$0xff] %vm249_vm0, %v4011_v6  ;;  %v4014_v22 = vmax.f32 %v3982_v40, 0.0  ;;  %v3981_v16 = vmul.f32 %v7235_v54, %v3756_v7  ;;  %v3759_v15 = vadd.f32 %v7578_v57, %v3721_v55  ;;  %v3331_v12 = vadd.f32 %v5533_v18, %v2939_v25  ;;  %v7606_v54 = vld [vmem:[#allocation20_spill] sm:$0xff]  ;;  %v7612_v25 = vld [vmem:[#allocation39_spill] sm:$0xff]  ;;  %v3928_v7 = vpop.permute.xlu0 %3927 }
 0x1e5   : >> { %v3720_v19 = vadd.f32 %v3633_v50, %v3328_v37  ;;  %v3251_v20 = vpop.f32.mrf.mxu1  ;;  %v3643_v10 = vpop.f32.mrf.mxu0  ;;  %v2551_v11 = vadd.f32 %v7607_v41, %v7606_v54  ;;  %v2945_v34 = vadd.f32 %v7616_v39, %v2553_v45  ;;  %v7618_v37 = vld [vmem:[#allocation46_spill] sm:$0xff]  ;;  %v7620_v54 = vld [vmem:[#allocation47_spill] sm:$0xff]  ;;  %v7626_v45 = vld [vmem:[#allocation52_spill] sm:$0xff] }
 0x1e6   : >> { %4835 = vst.msk [vmem:[%s7169_s6 + $0xb8] sm:$0xff] %vm249_vm0, %v4014_v22  ;;  %v4013_v42 = vmax.f32 %v3981_v16, 0.0  ;;  %v3984_v33 = vmul.f32 %v7251_v8, %v3759_v15  ;;  %v3723_v13 = vadd.f32 %v5583_v26, %v3331_v12  ;;  %v3330_v31 = vadd.f32 %v3251_v20, %v2938_v1  ;;  %v7625_v52 = vld [vmem:[#allocation27_spill] sm:$0xff] }
 0x1e7   : >> { %v3758_v9 = vadd.f32 %v7578_v57, %v3720_v19  ;;  %v5536_v2 = vpop.f32.mrf.mxu1  ;;  %v5586_v63 = vpop.f32.mrf.mxu0  ;;  %v2943_v59 = vadd.f32 %v7612_v25, %v2551_v11  ;;  %v2555_v18 = vadd.f32 %v7618_v37, %v7617_v51  ;;  %v7621_v11 = vld [vmem:[#allocation25_spill] sm:$0xff] }
 0x1e8   : >> { %4834 = vst.msk [vmem:[%s7169_s6 + $0xb0] sm:$0xff] %vm249_vm0, %v4013_v42  ;;  %v4016_v60 = vmax.f32 %v3984_v33, 0.0  ;;  %v3761_v8 = vadd.f32 %v7578_v57, %v3723_v13  ;;  %v3722_v35 = vadd.f32 %v3643_v10, %v3330_v31  ;;  %v3333_v62 = vadd.f32 %v5536_v2, %v2941_v53  ;;  %v7619_v53 = vld [vmem:[#allocation45_spill] sm:$0xff]  ;;  %v3943_v33 = vpop.permute.xlu1 %3942 }
 0x1e9   : >> { %v3983_v23 = vmul.f32 %v7260_v5, %v3758_v9  ;;  %v3261_v28 = vpop.f32.mrf.mxu1  ;;  %v3653_v24 = vpop.f32.mrf.mxu0  ;;  %v2552_v5 = vadd.f32 %v7615_v48, %v7614_v58  ;;  %v2947_v41 = vadd.f32 %v7620_v54, %v2555_v18  ;;  %v2557_v9 = vadd.f32 %v7624_v14, %v7623_v21 }
 0x1ea   : >> { %4837 = vst.msk [vmem:[%s7169_s6 + $0xc8] sm:$0xff] %vm249_vm0, %v4016_v60  ;;  %v3986_v29 = vmul.f32 %v7276_v3, %v3761_v8  ;;  %v3760_v36 = vadd.f32 %v7578_v57, %v3722_v35  ;;  %v3725_v30 = vadd.f32 %v5586_v63, %v3333_v62  ;;  %v3332_v4 = vadd.f32 %v3261_v28, %v2940_v49  ;;  %v3938_v8 = vpop.permute.xlu0 %3937 }
 0x1eb   : >> { %v4015_v50 = vmax.f32 %v3983_v23, 0.0  ;;  %v5539_v6 = vpop.f32.mrf.mxu1  ;;  %v5589_v40 = vpop.f32.mrf.mxu0  ;;  %v2944_v19 = vadd.f32 %v7619_v53, %v2552_v5  ;;  %v2556_v23 = vadd.f32 %v7626_v45, %v7625_v52 }
 0x1ec   : >> { %v4018_v55 = vmax.f32 %v3986_v29, 0.0  ;;  %v3985_v3 = vmul.f32 %v7284_v38, %v3760_v36  ;;  %v3763_v47 = vadd.f32 %v7578_v57, %v3725_v30  ;;  %v3724_v1 = vadd.f32 %v3653_v24, %v3332_v4 }
 0x1ed   : >> { %4836 = vst.msk [vmem:[%s7169_s6 + $0xc0] sm:$0xff] %vm249_vm0, %v4015_v50  ;;  %v3335_v26 = vadd.f32 %v5539_v6, %v2943_v59  ;;  %v3271_v22 = vpop.f32.mrf.mxu1  ;;  %v3663_v16 = vpop.f32.mrf.mxu0  ;;  %v7627_v59 = vld [vmem:[#allocation49_spill] sm:$0xff] }
 0x1ee   : >> { %4839 = vst.msk [vmem:[%s7169_s6 + $0xd8] sm:$0xff] %vm249_vm0, %v4018_v55  ;;  %v4017_v15 = vmax.f32 %v3985_v3, 0.0  ;;  %v3988_v12 = vmul.f32 %v3923_v44, %v3763_v47  ;;  %v3762_v38 = vadd.f32 %v7578_v57, %v3724_v1  ;;  %v3334_v43 = vadd.f32 %v3271_v22, %v2942_v46  ;;  %v7622_v44 = vld [vmem:[#allocation48_spill] sm:$0xff]  ;;  %v7628_v46 = vld [vmem:[#allocation51_spill] sm:$0xff]  ;;  %v3953_v6 = vpop.permute.xlu1 %3952  ;;  %v3948_v22 = vpop.permute.xlu0 %3947 }
 0x1ef   : >> { %v3727_v20 = vadd.f32 %v5589_v40, %v3335_v26  ;;  %v5542_v10 = vpop.f32.mrf.mxu1  ;;  %v5592_v42 = vpop.f32.mrf.mxu0  ;;  %v2554_v17 = vadd.f32 %v7622_v44, %v7621_v11  ;;  %v2949_v58 = vadd.f32 %v7628_v46, %v2557_v9 }
 0x1f0   : >> { %4838 = vst.msk [vmem:[%s7169_s6 + $0xd0] sm:$0xff] %vm249_vm0, %v4017_v15  ;;  %v4020_v13 = vmax.f32 %v3988_v12, 0.0  ;;  %v3987_v31 = vmul.f32 %v3918_v56, %v3762_v38  ;;  %v3726_v0 = vadd.f32 %v3663_v16, %v3334_v43  ;;  %v3337_v49 = vadd.f32 %v5542_v10, %v2945_v34 }
 0x1f1   : >> { %v3765_v2 = vadd.f32 %v7578_v57, %v3727_v20  ;;  %v3281_v63 = vpop.f32.mrf.mxu1  ;;  %v3673_v60 = vpop.f32.mrf.mxu0  ;;  %v2946_v32 = vadd.f32 %v7627_v59, %v2554_v17 }
 0x1f2   : >> { %4841 = vst.msk [vmem:[%s7169_s6 + $0xe8] sm:$0xff] %vm249_vm0, %v4020_v13  ;;  %v4019_v35 = vmax.f32 %v3987_v31, 0.0  ;;  %v3764_v56 = vadd.f32 %v7578_v57, %v3726_v0  ;;  %v3729_v62 = vadd.f32 %v5592_v42, %v3337_v49  ;;  %v3336_v27 = vadd.f32 %v3281_v63, %v2944_v19  ;;  %v3963_v13 = vpop.permute.xlu1 %3962  ;;  %v3958_v54 = vpop.permute.xlu0 %3957 }
 0x1f3   : >> { %v3990_v28 = vmul.f32 %v3933_v61, %v3765_v2  ;;  %v5545_v24 = vpop.f32.mrf.mxu1  ;;  %v5595_v29 = vpop.f32.mrf.mxu0 }
 0x1f4   : >> { %4840 = vst.msk [vmem:[%s7169_s6 + $0xe0] sm:$0xff] %vm249_vm0, %v4019_v35  ;;  %v3989_v36 = vmul.f32 %v3928_v7, %v3764_v56  ;;  %v3767_v30 = vadd.f32 %v7578_v57, %v3729_v62  ;;  %v3728_v4 = vadd.f32 %v3673_v60, %v3336_v27  ;;  %v3339_v25 = vadd.f32 %v5545_v24, %v2947_v41  ;;  %v7629_v7 = vld [vmem:[#allocation53_spill] sm:$0xff] }
 0x1f5   : >> { %v4022_v48 = vmax.f32 %v3990_v28, 0.0  ;;  %v3291_v5 = vpop.f32.mrf.mxu1  ;;  %v3683_v50 = vpop.f32.mrf.mxu0  ;;  %v2948_v47 = vadd.f32 %v7629_v7, %v2556_v23 }
 0x1f6   : >> { %v4021_v61 = vmax.f32 %v3989_v36, 0.0  ;;  %v3992_v40 = vmul.f32 %v3943_v33, %v3767_v30  ;;  %v3766_v55 = vadd.f32 %v7578_v57, %v3728_v4  ;;  %v3731_v3 = vadd.f32 %v5595_v29, %v3339_v25 }
 0x1f7   : >> { %4843 = vst.msk [vmem:[%s7169_s6 + $0xf8] sm:$0xff] %vm249_vm0, %v4022_v48  ;;  %v3338_v1 = vadd.f32 %v3291_v5, %v2946_v32  ;;  %v5548_v39 = vpop.f32.mrf.mxu1  ;;  %v5598_v34 = vpop.f32.mrf.mxu0 }
 0x1f8   : >> { %4842 = vst.msk [vmem:[%s7169_s6 + $0xf0] sm:$0xff] %vm249_vm0, %v4021_v61  ;;  %v4024_v51 = vmax.f32 %v3992_v40, 0.0  ;;  %v3991_v37 = vmul.f32 %v3938_v8, %v3766_v55  ;;  %v3769_v18 = vadd.f32 %v7578_v57, %v3731_v3  ;;  %v3341_v26 = vadd.f32 %v5548_v39, %v2949_v58 }
 0x1f9   : >> { %v3730_v16 = vadd.f32 %v3683_v50, %v3338_v1  ;;  %v3301_v15 = vpop.f32.mrf.mxu1  ;;  %v3693_v20 = vpop.f32.mrf.mxu0 }
 0x1fa   : >> { %4845 = vst.msk [vmem:[%s7169_s6 + $0x108] sm:$0xff] %vm249_vm0, %v4024_v51  ;;  %v4023_v12 = vmax.f32 %v3991_v37, 0.0  ;;  %v3994_v38 = vmul.f32 %v3953_v6, %v3769_v18  ;;  %v3733_v43 = vadd.f32 %v5598_v34, %v3341_v26  ;;  %v3340_v53 = vadd.f32 %v3301_v15, %v2948_v47 }
 0x1fb   : >> { %v3768_v19 = vadd.f32 %v7578_v57, %v3730_v16 }
 0x1fc   : >> { %4844 = vst.msk [vmem:[%s7169_s6 + $0x100] sm:$0xff] %vm249_vm0, %v4023_v12  ;;  %v4026_v10 = vmax.f32 %v3994_v38, 0.0  ;;  %v3771_v42 = vadd.f32 %v7578_v57, %v3733_v43  ;;  %v3732_v33 = vadd.f32 %v3693_v20, %v3340_v53 }
 0x1fd   : >> { %v3993_v31 = vmul.f32 %v3948_v22, %v3768_v19 }
 0x1fe   : >> { %4847 = vst.msk [vmem:[%s7169_s6 + $0x118] sm:$0xff] %vm249_vm0, %v4026_v10  ;;  %v3996_v0 = vmul.f32 %v3963_v13, %v3771_v42  ;;  %v3770_v49 = vadd.f32 %v7578_v57, %v3732_v33 }
 0x1ff   : >> { %v4025_v41 = vmax.f32 %v3993_v31, 0.0 }
 0x200   : >> { %v4028_v11 = vmax.f32 %v3996_v0, 0.0  ;;  %v3995_v44 = vmul.f32 %v3958_v54, %v3770_v49  ;;  %266 = sbr.rel (!%p264_p5) target bundleno = 22 (0x16), region = 98 }
 0x201   : >> { %4846 = vst.msk [vmem:[%s7169_s6 + $0x110] sm:$0xff] %vm249_vm0, %v4025_v41 }
 0x202   : >> { %4849 = vst.msk [vmem:[%s7169_s6 + $0x128] sm:$0xff] %vm249_vm0, %v4028_v11  ;;  %v4027_v17 = vmax.f32 %v3995_v44, 0.0 }
 0x204   : >> { %4848 = vst.msk [vmem:[%s7169_s6 + $0x120] sm:$0xff] %vm249_vm0, %v4027_v17 }
 0x205 PF: > { %s14_s17 = sadd.s32 1, %s5664_s17   ;;  %s7630_s15 = smov %s5660_s16 }
 0x206   : > { %p11_p6 = scmp.ge.s32.totalorder %s14_s17, 4   ;;  %s7631_s16 = smov %s7633_s18 }
 0x208   :  { %13 = sbr.rel (!%p11_p6) target bundleno = 2 (0x2), region = 109 }

// kernel: resblock_forward.3
= control target key start
LH: loop header
LB: loop body
LE: loop exit
PB: predicated region body
PF: predicated region fallthrough
CT: control target
= control target key end

     0   :  { %s6331_s21 = smov 0   ;;  %s6333_s22 = smov 0   ;;  %s8093_s0 = inlined_call_operand.vmem [shape: f32[2,600,8], index: 0, kind: input, shape index: {}]   ;;  %s8094_s1 = inlined_call_operand.vmem [shape: f32[9,8,8], index: 1, kind: input, shape index: {}]   ;;  %s8095_s2 = inlined_call_operand.vmem [shape: f32[1,8], index: 2, kind: input, shape index: {}]   ;;  %s8096_s3 = inlined_call_operand.vmem [shape: f32[512,1], index: 3, kind: input, shape index: {}]   ;;  %s8097_s4 = inlined_call_operand.vmem [shape: f32[2,600,4], index: 4, kind: input, shape index: {}]   ;;  %s8098_s5 = inlined_call_operand.vmem [shape: f32[4,8], index: 5, kind: input, shape index: {}]   ;;  %s8099_s6 = inlined_call_operand.vmem [shape: f32[2,600,8], index: 6, kind: output, shape index: {}]  }
   0x1   :  { %s6335_s23 = smov 0  }
   0x2 LB: > { %s28_s24 = sadd.s32 1, %s6284_s22  ;;  %p4695_p0 = scmp.ge.s32.totalorder %s6288_s23, 1  ;;  %s6288_s23 = sphi %s6335_s23, %s16_s23   ;;  %s6284_s22 = sphi %s6333_s22, %s8287_s22   ;;  %s6280_s21 = sphi %s6331_s21, %s8286_s21  }
   0x3   : > { %p30_p1 = scmp.ge.s32.totalorder %s28_s24, 2  ;;  %p262_p2 = scmp.lt.s32.totalorder %s6288_s23, 3 }
   0x5   : > { %s8289_s24 = smov (%p30_p1, %s28_s24), 0  ;;  %p263_p3 = pnand %p4695_p0, %p262_p2 }
   0x6   : > { %p311_p4 = scmp.lt.s32.totalorder (!%p263_p3), %s6280_s21, 1  ;;  %s6392_s13 = smov (!%p263_p3), 0  }
   0x7   : > { %266 = sbr.rel (%p263_p3) target bundleno = 550 (0x226), region = 44 }
   0xc   : > { %v6352_v0 = vld [vmem:[%s8095_s2] ss:$0 sm:$0xff]  ;;  %s8291_s21 = smov (!%p311_p4, %s6280_s21), 1  ;;  %vm340_vm0 = vcmask 64512   ;;  %v6294_v1 = vmov 0.0  }
   0xd   : > { %8128 = vst [vmem:[#allocation2_spill] sm:$0xff] %v6352_v0  ;;  %s6354_s27 = smul.u32 600, %s8291_s21 }
   0xf   : > { %s315_s30 = scalar_lea.vmem %s8093_s0, %s6354_s27  ;;  %s327_s9 = scalar_lea.vmem %s8097_s4, %s6354_s27 }
  0x10   : > { %s6368_s12 = scalar_lea.vmem %s8099_s6, %s6354_s27 }
  0x11   : > { %341 = vst.msk [vmem:[%s6368_s12] sm:$0xff] %vm340_vm0, %v6294_v1  ;;  %342 = vst.msk [vmem:[%s6368_s12 + $0x8] sm:$0xff] %vm340_vm0, %v6294_v1 }
  0x12   : > { %343 = vst.msk [vmem:[%s6368_s12 + $0x10] sm:$0xff] %vm340_vm0, %v6294_v1  ;;  %344 = vst.msk [vmem:[%s6368_s12 + $0x18] sm:$0xff] %vm340_vm0, %v6294_v1 }
  0x13   : > { %345 = vst.msk [vmem:[%s6368_s12 + $0x20] sm:$0xff] %vm340_vm0, %v6294_v1  ;;  %346 = vst.msk [vmem:[%s6368_s12 + $0x28] sm:$0xff] %vm340_vm0, %v6294_v1 }
  0x14   : > { %347 = vst.msk [vmem:[%s6368_s12 + $0x230] sm:$0xff] %vm340_vm0, %v6294_v1  ;;  %348 = vst.msk [vmem:[%s6368_s12 + $0x238] sm:$0xff] %vm340_vm0, %v6294_v1 }
  0x15   : > { %349 = vst.msk [vmem:[%s6368_s12 + $0x240] sm:$0xff] %vm340_vm0, %v6294_v1  ;;  %350 = vst.msk [vmem:[%s6368_s12 + $0x248] sm:$0xff] %vm340_vm0, %v6294_v1 }
  0x16   : > { %351 = vst.msk [vmem:[%s6368_s12 + $0x250] sm:$0xff] %vm340_vm0, %v6294_v1 }
  0x17 LB: >> { %v4766_v2 = vld [vmem:[%s8094_s1 + $0x8] sm:$0xff]  ;;  %v395_v3 = vld [vmem:[%s8094_s1] sm:$0xff]  ;;  %v4864_v4 = vld [vmem:[%s8094_s1 + $0x10] sm:$0xff]  ;;  %s6410_s25 = sshll.u32 %s6292_s13, 8  ;;  %vm3927_vm1 = vcmask 1043456   ;;  %vm3830_vm2 = vcmask 31744   ;;  %s6292_s13 = sphi %s6392_s13, %s358_s13  }
  0x18   : >> { %5725 = vmatprep.subr.mxu0 %v4766_v2  ;;  %5775 = vmatprep.subr.mxu1 %v395_v3  ;;  %v4930_v5 = vld [vmem:[%s8094_s1 + $0x18] sm:$0xff]  ;;  %s6418_s29 = scalar_lea.vmem %s315_s30, %s6410_s25  ;;  %v6433_v12 = vld [vmem:[%s8094_s1 + $0x20] sm:$0xff]  ;;  %v6438_v13 = vld [vmem:[%s8094_s1 + $0x28] sm:$0xff]  ;;  %s7027_s7 = scalar_lea.vmem %s8096_s3, %s6410_s25 }
  0x19   : >> { %5726 = vmatpush3.msra.mxu0 %v4766_v2  ;;  %5776 = vmatpush3.msra.mxu1 %v395_v3  ;;  %v4734_v6 = vld [vmem:[%s6418_s29 + $0x18] sm:$0xff]  ;;  %v4735_v8 = vld [vmem:[%s6418_s29 + $0x20] sm:$0xff]  ;;  %v4736_v10 = vld [vmem:[%s6418_s29 + $0x28] sm:$0xff]  ;;  %s7356_s11 = scalar_lea.vmem %s327_s9, %s6410_s25  ;;  %s358_s13 = sadd.s32 1, %s6292_s13  }
  0x1a   : >> { %5825 = vmatprep.subr.mxu0 %v4864_v4  ;;  %5875 = vmatprep.subr.mxu1 %v4930_v5  ;;  %v4701_v7 = vld [vmem:[%s6418_s29 + $0x17] sm:$0xff]  ;;  %v4702_v9 = vld [vmem:[%s6418_s29 + $0x1f] sm:$0xff]  ;;  %v4703_v11 = vld [vmem:[%s6418_s29 + $0x27] sm:$0xff]  ;;  %p355_p5 = scmp.ge.s32.totalorder %s358_s13, 2  }
  0x1b   : >> { %5727 = vmatprep.mubr.msk.f32.mxu0 %vm340_vm0, %v4734_v6  ;;  %5777 = vmatprep.mubr.msk.f32.mxu1 %vm340_vm0, %v4701_v7  ;;  %v6441_v14 = vld [vmem:[%s6418_s29 + $0x30] sm:$0xff]  ;;  %v6449_v16 = vld [vmem:[%s6418_s29 + $0x38] sm:$0xff]  ;;  %v6465_v18 = vld [vmem:[%s6418_s29 + $0x40] sm:$0xff] }
  0x1c   : >> { %5728 = vmatmul.mubr.msk.f32.vlgmr.msra.gmra.mxu0 %vm340_vm0, %v4735_v8  ;;  %5778 = vmatmul.mubr.msk.f32.vlgmr.msra.gmra.mxu1 %vm340_vm0, %v4702_v9  ;;  %v6444_v15 = vld [vmem:[%s6418_s29 + $0x2f] sm:$0xff]  ;;  %v6452_v17 = vld [vmem:[%s6418_s29 + $0x37] sm:$0xff]  ;;  %v6468_v19 = vld [vmem:[%s6418_s29 + $0x3f] sm:$0xff] }
  0x1d   : >> { %5826 = vmatpush3.msra.mxu0 %v4864_v4  ;;  %5876 = vmatpush3.msra.mxu1 %v4930_v5  ;;  %v6471_v20 = vld [vmem:[%s6418_s29 + $0x48] sm:$0xff]  ;;  %v6485_v22 = vld [vmem:[%s6418_s29 + $0x50] sm:$0xff]  ;;  %v6491_v24 = vld [vmem:[%s6418_s29 + $0x58] sm:$0xff] }
  0x1e   : >> { %5730 = vmatprep.mubr.msk.f32.mxu0 %vm340_vm0, %v4736_v10  ;;  %5780 = vmatprep.mubr.msk.f32.mxu1 %vm340_vm0, %v4703_v11  ;;  %v6474_v21 = vld [vmem:[%s6418_s29 + $0x47] sm:$0xff]  ;;  %v6488_v23 = vld [vmem:[%s6418_s29 + $0x4f] sm:$0xff]  ;;  %v6494_v25 = vld [vmem:[%s6418_s29 + $0x57] sm:$0xff] }
  0x1f   : >> { %5925 = vmatprep.subr.mxu0 %v6433_v12  ;;  %5975 = vmatprep.subr.mxu1 %v6438_v13  ;;  %8129 = vst [vmem:[#allocation3_spill] sm:$0xff] %v6488_v23  ;;  %8130 = vst [vmem:[#allocation4_spill] sm:$0xff] %v6494_v25  ;;  %v6505_v26 = vld [vmem:[%s6418_s29 + $0x60] sm:$0xff]  ;;  %v6511_v28 = vld [vmem:[%s6418_s29 + $0x68] sm:$0xff] }
  0x20   : >> { %5731 = vmatmul.mubr.msk.f32.gmra.mxu0 %vm340_vm0, %v6441_v14  ;;  %5781 = vmatmul.mubr.msk.f32.gmra.mxu1 %vm340_vm0, %v6444_v15  ;;  %v6508_v27 = vld [vmem:[%s6418_s29 + $0x5f] sm:$0xff]  ;;  %v6514_v29 = vld [vmem:[%s6418_s29 + $0x67] sm:$0xff]  ;;  %v6525_v30 = vld [vmem:[%s6418_s29 + $0x70] sm:$0xff] }
  0x21   : >> { %5733 = vmatprep.mubr.msk.f32.mxu0 %vm340_vm0, %v6449_v16  ;;  %5783 = vmatprep.mubr.msk.f32.mxu1 %vm340_vm0, %v6452_v17  ;;  %8131 = vst [vmem:[#allocation5_spill] sm:$0xff] %v6508_v27  ;;  %8132 = vst [vmem:[#allocation6_spill] sm:$0xff] %v6514_v29  ;;  %v6528_v31 = vld [vmem:[%s6418_s29 + $0x6f] sm:$0xff]  ;;  %v6531_v32 = vld [vmem:[%s6418_s29 + $0x78] sm:$0xff] }
  0x22   : >> { %8133 = vst [vmem:[#allocation7_spill] sm:$0xff] %v6528_v31  ;;  %v6534_v33 = vld [vmem:[%s6418_s29 + $0x77] sm:$0xff]  ;;  %v6545_v34 = vld [vmem:[%s6418_s29 + $0x80] sm:$0xff]  ;;  %v6551_v36 = vld [vmem:[%s6418_s29 + $0x88] sm:$0xff] }
  0x23   : >> { %8134 = vst [vmem:[#allocation8_spill] sm:$0xff] %v6534_v33  ;;  %v6548_v35 = vld [vmem:[%s6418_s29 + $0x7f] sm:$0xff]  ;;  %v6554_v37 = vld [vmem:[%s6418_s29 + $0x87] sm:$0xff]  ;;  %v6565_v38 = vld [vmem:[%s6418_s29 + $0x90] sm:$0xff] }
  0x24   : >> { %5734 = vmatmul.mubr.msk.f32.gmra.mxu0 %vm340_vm0, %v6465_v18  ;;  %5784 = vmatmul.mubr.msk.f32.gmra.mxu1 %vm340_vm0, %v6468_v19  ;;  %8135 = vst [vmem:[#allocation9_spill] sm:$0xff] %v6548_v35  ;;  %8136 = vst [vmem:[#allocation10_spill] sm:$0xff] %v6554_v37  ;;  %v6568_v39 = vld [vmem:[%s6418_s29 + $0x8f] sm:$0xff]  ;;  %v6571_v40 = vld [vmem:[%s6418_s29 + $0x98] sm:$0xff] }
  0x25   : >> { %5736 = vmatprep.mubr.msk.f32.mxu0 %vm340_vm0, %v6471_v20  ;;  %5786 = vmatprep.mubr.msk.f32.mxu1 %vm340_vm0, %v6474_v21  ;;  %8137 = vst [vmem:[#allocation11_spill] sm:$0xff] %v6568_v39  ;;  %v6574_v41 = vld [vmem:[%s6418_s29 + $0x97] sm:$0xff]  ;;  %v6585_v42 = vld [vmem:[%s6418_s29 + $0xa0] sm:$0xff]  ;;  %v6591_v44 = vld [vmem:[%s6418_s29 + $0xa8] sm:$0xff] }
  0x26   : >> { %8138 = vst [vmem:[#allocation12_spill] sm:$0xff] %v6574_v41  ;;  %v6588_v43 = vld [vmem:[%s6418_s29 + $0x9f] sm:$0xff]  ;;  %v6594_v45 = vld [vmem:[%s6418_s29 + $0xa7] sm:$0xff]  ;;  %v6605_v46 = vld [vmem:[%s6418_s29 + $0xb0] sm:$0xff] }
  0x27   : >> { %8139 = vst [vmem:[#allocation13_spill] sm:$0xff] %v6588_v43  ;;  %8140 = vst [vmem:[#allocation14_spill] sm:$0xff] %v6594_v45  ;;  %v6608_v47 = vld [vmem:[%s6418_s29 + $0xaf] sm:$0xff]  ;;  %v6611_v48 = vld [vmem:[%s6418_s29 + $0xb8] sm:$0xff] }
  0x28   : >> { %5737 = vmatmul.mubr.msk.f32.gmra.mxu0 %vm340_vm0, %v6485_v22  ;;  %5787 = vmatmul.mubr.msk.f32.gmra.mxu1 %vm340_vm0, %v6488_v23  ;;  %8141 = vst [vmem:[#allocation15_spill] sm:$0xff] %v6608_v47  ;;  %v6614_v49 = vld [vmem:[%s6418_s29 + $0xb7] sm:$0xff]  ;;  %v6625_v50 = vld [vmem:[%s6418_s29 + $0xc0] sm:$0xff]  ;;  %v6631_v52 = vld [vmem:[%s6418_s29 + $0xc8] sm:$0xff] }
  0x29   : >> { %5739 = vmatprep.mubr.msk.f32.mxu0 %vm340_vm0, %v6491_v24  ;;  %5789 = vmatprep.mubr.msk.f32.mxu1 %vm340_vm0, %v6494_v25  ;;  %8142 = vst [vmem:[#allocation16_spill] sm:$0xff] %v6614_v49  ;;  %v6628_v51 = vld [vmem:[%s6418_s29 + $0xbf] sm:$0xff]  ;;  %v6634_v53 = vld [vmem:[%s6418_s29 + $0xc7] sm:$0xff]  ;;  %v6645_v54 = vld [vmem:[%s6418_s29 + $0xd0] sm:$0xff] }
  0x2a   : >> { %8143 = vst [vmem:[#allocation17_spill] sm:$0xff] %v6628_v51  ;;  %8144 = vst [vmem:[#allocation18_spill] sm:$0xff] %v6634_v53  ;;  %v6648_v55 = vld [vmem:[%s6418_s29 + $0xcf] sm:$0xff]  ;;  %v6651_v56 = vld [vmem:[%s6418_s29 + $0xd8] sm:$0xff] }
  0x2b   : >> { %8145 = vst [vmem:[#allocation19_spill] sm:$0xff] %v6648_v55  ;;  %v6654_v57 = vld [vmem:[%s6418_s29 + $0xd7] sm:$0xff]  ;;  %v6665_v58 = vld [vmem:[%s6418_s29 + $0xe0] sm:$0xff]  ;;  %v6671_v60 = vld [vmem:[%s6418_s29 + $0xe8] sm:$0xff] }
  0x2c   : >> { %5740 = vmatmul.mubr.msk.f32.gmra.mxu0 %vm340_vm0, %v6505_v26  ;;  %5790 = vmatmul.mubr.msk.f32.gmra.mxu1 %vm340_vm0, %v6508_v27  ;;  %8146 = vst [vmem:[#allocation20_spill] sm:$0xff] %v6654_v57  ;;  %v6668_v59 = vld [vmem:[%s6418_s29 + $0xdf] sm:$0xff]  ;;  %v6674_v61 = vld [vmem:[%s6418_s29 + $0xe7] sm:$0xff]  ;;  %v6685_v62 = vld [vmem:[%s6418_s29 + $0xf0] sm:$0xff] }
  0x2d   : >> { %5742 = vmatprep.mubr.msk.f32.mxu0 %vm340_vm0, %v6511_v28  ;;  %5792 = vmatprep.mubr.msk.f32.mxu1 %vm340_vm0, %v6514_v29  ;;  %8147 = vst [vmem:[#allocation21_spill] sm:$0xff] %v6668_v59  ;;  %8148 = vst [vmem:[#allocation22_spill] sm:$0xff] %v6674_v61  ;;  %v6688_v63 = vld [vmem:[%s6418_s29 + $0xef] sm:$0xff]  ;;  %v6691_v1 = vld [vmem:[%s6418_s29 + $0xf8] sm:$0xff] }
  0x2e   : >> { %8149 = vst [vmem:[#allocation23_spill] sm:$0xff] %v6688_v63  ;;  %v6694_v2 = vld [vmem:[%s6418_s29 + $0xf7] sm:$0xff]  ;;  %v6705_v3 = vld [vmem:[%s6418_s29 + $0x100] sm:$0xff]  ;;  %v6711_v5 = vld [vmem:[%s6418_s29 + $0x108] sm:$0xff] }
  0x2f   : >> { %8150 = vst [vmem:[#allocation24_spill] sm:$0xff] %v6694_v2  ;;  %v6708_v4 = vld [vmem:[%s6418_s29 + $0xff] sm:$0xff]  ;;  %v6714_v6 = vld [vmem:[%s6418_s29 + $0x107] sm:$0xff]  ;;  %v6725_v7 = vld [vmem:[%s6418_s29 + $0x110] sm:$0xff] }
  0x30   : >> { %5743 = vmatmul.mubr.msk.f32.gmra.mxu0 %vm340_vm0, %v6525_v30  ;;  %5793 = vmatmul.mubr.msk.f32.gmra.mxu1 %vm340_vm0, %v6528_v31  ;;  %8151 = vst [vmem:[#allocation25_spill] sm:$0xff] %v6708_v4  ;;  %8152 = vst [vmem:[#allocation26_spill] sm:$0xff] %v6714_v6  ;;  %v6728_v8 = vld [vmem:[%s6418_s29 + $0x10f] sm:$0xff]  ;;  %v4832_v9 = vld [vmem:[%s6418_s29 + $0x19] sm:$0xff] }
  0x31   : >> { %5745 = vmatprep.mubr.msk.f32.mxu0 %vm340_vm0, %v6531_v32  ;;  %5795 = vmatprep.mubr.msk.f32.mxu1 %vm340_vm0, %v6534_v33  ;;  %8153 = vst [vmem:[#allocation27_spill] sm:$0xff] %v6728_v8  ;;  %v4833_v10 = vld [vmem:[%s6418_s29 + $0x21] sm:$0xff]  ;;  %v4834_v11 = vld [vmem:[%s6418_s29 + $0x29] sm:$0xff] }
  0x32   : >> { %v6746_v0 = vld [vmem:[%s8094_s1 + $0x30] sm:$0xff] }
  0x34   : >> { %5746 = vmatmul.mubr.msk.f32.gmra.mxu0 %vm340_vm0, %v6545_v34  ;;  %5796 = vmatmul.mubr.msk.f32.gmra.mxu1 %vm340_vm0, %v6548_v35 }
  0x35   : >> { %5748 = vmatprep.mubr.msk.f32.mxu0 %vm340_vm0, %v6551_v36  ;;  %5798 = vmatprep.mubr.msk.f32.mxu1 %vm340_vm0, %v6554_v37 }
  0x38   : >> { %5749 = vmatmul.mubr.msk.f32.gmra.mxu0 %vm340_vm0, %v6565_v38  ;;  %5799 = vmatmul.mubr.msk.f32.gmra.mxu1 %vm340_vm0, %v6568_v39 }
  0x39   : >> { %5751 = vmatprep.mubr.msk.f32.mxu0 %vm340_vm0, %v6571_v40  ;;  %5801 = vmatprep.mubr.msk.f32.mxu1 %vm340_vm0, %v6574_v41 }
  0x3c   : >> { %5752 = vmatmul.mubr.msk.f32.gmra.mxu0 %vm340_vm0, %v6585_v42  ;;  %5802 = vmatmul.mubr.msk.f32.gmra.mxu1 %vm340_vm0, %v6588_v43 }
  0x3d   : >> { %5754 = vmatprep.mubr.msk.f32.mxu0 %vm340_vm0, %v6591_v44  ;;  %5804 = vmatprep.mubr.msk.f32.mxu1 %vm340_vm0, %v6594_v45 }
  0x40   : >> { %5755 = vmatmul.mubr.msk.f32.gmra.mxu0 %vm340_vm0, %v6605_v46  ;;  %5805 = vmatmul.mubr.msk.f32.gmra.mxu1 %vm340_vm0, %v6608_v47 }
  0x41   : >> { %5757 = vmatprep.mubr.msk.f32.mxu0 %vm340_vm0, %v6611_v48  ;;  %5807 = vmatprep.mubr.msk.f32.mxu1 %vm340_vm0, %v6614_v49 }
  0x44   : >> { %5758 = vmatmul.mubr.msk.f32.gmra.mxu0 %vm340_vm0, %v6625_v50  ;;  %5808 = vmatmul.mubr.msk.f32.gmra.mxu1 %vm340_vm0, %v6628_v51 }
  0x45   : >> { %5760 = vmatprep.mubr.msk.f32.mxu0 %vm340_vm0, %v6631_v52  ;;  %5810 = vmatprep.mubr.msk.f32.mxu1 %vm340_vm0, %v6634_v53 }
  0x48   : >> { %5761 = vmatmul.mubr.msk.f32.gmra.mxu0 %vm340_vm0, %v6645_v54  ;;  %5811 = vmatmul.mubr.msk.f32.gmra.mxu1 %vm340_vm0, %v6648_v55 }
  0x49   : >> { %5763 = vmatprep.mubr.msk.f32.mxu0 %vm340_vm0, %v6651_v56  ;;  %5813 = vmatprep.mubr.msk.f32.mxu1 %vm340_vm0, %v6654_v57 }
  0x4c   : >> { %5764 = vmatmul.mubr.msk.f32.gmra.mxu0 %vm340_vm0, %v6665_v58  ;;  %5814 = vmatmul.mubr.msk.f32.gmra.mxu1 %vm340_vm0, %v6668_v59 }
  0x4d   : >> { %5766 = vmatprep.mubr.msk.f32.mxu0 %vm340_vm0, %v6671_v60  ;;  %5816 = vmatprep.mubr.msk.f32.mxu1 %vm340_vm0, %v6674_v61 }
  0x50   : >> { %5767 = vmatmul.mubr.msk.f32.gmra.mxu0 %vm340_vm0, %v6685_v62  ;;  %5817 = vmatmul.mubr.msk.f32.gmra.mxu1 %vm340_vm0, %v6688_v63 }
  0x51   : >> { %5769 = vmatprep.mubr.msk.f32.mxu0 %vm340_vm0, %v6691_v1  ;;  %5819 = vmatprep.mubr.msk.f32.mxu1 %vm340_vm0, %v6694_v2 }
  0x54   : >> { %5770 = vmatmul.mubr.msk.f32.gmra.mxu0 %vm340_vm0, %v6705_v3  ;;  %5820 = vmatmul.mubr.msk.f32.gmra.mxu1 %vm340_vm0, %v6708_v4 }
  0x55   : >> { %5772 = vmatprep.mubr.msk.f32.mxu0 %vm340_vm0, %v6711_v5  ;;  %5822 = vmatprep.mubr.msk.f32.mxu1 %vm340_vm0, %v6714_v6 }
  0x58   : >> { %5773 = vmatmul.mubr.msk.f32.gmra.mxu0 %vm340_vm0, %v6725_v7  ;;  %5823 = vmatmul.mubr.msk.f32.gmra.mxu1 %vm340_vm0, %v6728_v8 }
  0x59   : >> { %5827 = vmatprep.mubr.msk.f32.mxu0 %vm340_vm0, %v4832_v9  ;;  %5877 = vmatprep.mubr.msk.f32.mxu1 %vm340_vm0, %v6444_v15  ;;  %v6751_v9 = vld [vmem:[%s8094_s1 + $0x38] sm:$0xff] }
  0x5a   : >> { %v6756_v15 = vld [vmem:[%s6418_s29 + $0x31] sm:$0xff] }
  0x5c   : >> { %5828 = vmatmul.mubr.msk.f32.vlgmr.msra.gmra.mxu0 %vm340_vm0, %v4833_v10  ;;  %5878 = vmatmul.mubr.msk.f32.vlgmr.msra.gmra.mxu1 %vm340_vm0, %v6452_v17  ;;  %v6762_v17 = vld [vmem:[%s6418_s29 + $0x39] sm:$0xff] }
  0x5d   : >> { %5926 = vmatpush3.msra.mxu0 %v6433_v12  ;;  %5976 = vmatpush3.msra.mxu1 %v6438_v13  ;;  %v6775_v12 = vld [vmem:[%s6418_s29 + $0x41] sm:$0xff]  ;;  %v6778_v13 = vld [vmem:[%s6418_s29 + $0x49] sm:$0xff]  ;;  %v6792_v10 = vld [vmem:[%s6418_s29 + $0x59] sm:$0xff] }
  0x5e   : >> { %5830 = vmatprep.mubr.msk.f32.mxu0 %vm340_vm0, %v4834_v11  ;;  %5880 = vmatprep.mubr.msk.f32.mxu1 %vm340_vm0, %v6468_v19  ;;  %v6789_v19 = vld [vmem:[%s6418_s29 + $0x51] sm:$0xff]  ;;  %v6803_v11 = vld [vmem:[%s6418_s29 + $0x61] sm:$0xff] }
  0x5f   : >> { %6025 = vmatprep.subr.mxu0 %v6746_v0  ;;  %6075 = vmatprep.subr.mxu1 %v6751_v9 }
  0x60   : >> { %5831 = vmatmul.mubr.msk.f32.gmra.mxu0 %vm340_vm0, %v6756_v15  ;;  %5881 = vmatmul.mubr.msk.f32.gmra.mxu1 %vm340_vm0, %v6474_v21 }
  0x61   : >> { %5833 = vmatprep.mubr.msk.f32.mxu0 %vm340_vm0, %v6762_v17  ;;  %5883 = vmatprep.mubr.msk.f32.mxu1 %vm340_vm0, %v6488_v23  ;;  %v6952_v23 = vld [vmem:[%s6418_s29 + $0x11f] sm:$0xff] }
  0x62   : >> { %8154 = vst [vmem:[#allocation28_spill] sm:$0xff] %v6952_v23 }
  0x64   : >> { %5834 = vmatmul.mubr.msk.f32.gmra.mxu0 %vm340_vm0, %v6775_v12  ;;  %5884 = vmatmul.mubr.msk.f32.gmra.mxu1 %vm340_vm0, %v6494_v25  ;;  %v6949_v25 = vld [vmem:[%s6418_s29 + $0x109] sm:$0xff] }
  0x65   : >> { %5836 = vmatprep.mubr.msk.f32.mxu0 %vm340_vm0, %v6778_v13  ;;  %5886 = vmatprep.mubr.msk.f32.mxu1 %vm340_vm0, %v6508_v27  ;;  %v6806_v27 = vld [vmem:[%s6418_s29 + $0x69] sm:$0xff] }
  0x68   : >> { %5837 = vmatmul.mubr.msk.f32.gmra.mxu0 %vm340_vm0, %v6789_v19  ;;  %5887 = vmatmul.mubr.msk.f32.gmra.mxu1 %vm340_vm0, %v6514_v29  ;;  %v6817_v29 = vld [vmem:[%s6418_s29 + $0x71] sm:$0xff] }
  0x69   : >> { %5839 = vmatprep.mubr.msk.f32.mxu0 %vm340_vm0, %v6792_v10  ;;  %5889 = vmatprep.mubr.msk.f32.mxu1 %vm340_vm0, %v6528_v31  ;;  %v6820_v31 = vld [vmem:[%s6418_s29 + $0x79] sm:$0xff] }
  0x6c   : >> { %5840 = vmatmul.mubr.msk.f32.gmra.mxu0 %vm340_vm0, %v6803_v11  ;;  %5890 = vmatmul.mubr.msk.f32.gmra.mxu1 %vm340_vm0, %v6534_v33  ;;  %v6831_v33 = vld [vmem:[%s6418_s29 + $0x81] sm:$0xff] }
  0x6d   : >> { %5842 = vmatprep.mubr.msk.f32.mxu0 %vm340_vm0, %v6806_v27  ;;  %5892 = vmatprep.mubr.msk.f32.mxu1 %vm340_vm0, %v6548_v35  ;;  %v6834_v35 = vld [vmem:[%s6418_s29 + $0x89] sm:$0xff] }
  0x70   : >> { %5843 = vmatmul.mubr.msk.f32.gmra.mxu0 %vm340_vm0, %v6817_v29  ;;  %5893 = vmatmul.mubr.msk.f32.gmra.mxu1 %vm340_vm0, %v6554_v37  ;;  %v6845_v37 = vld [vmem:[%s6418_s29 + $0x91] sm:$0xff] }
  0x71   : >> { %5845 = vmatprep.mubr.msk.f32.mxu0 %vm340_vm0, %v6820_v31  ;;  %5895 = vmatprep.mubr.msk.f32.mxu1 %vm340_vm0, %v6568_v39  ;;  %v6848_v39 = vld [vmem:[%s6418_s29 + $0x99] sm:$0xff] }
  0x74   : >> { %5846 = vmatmul.mubr.msk.f32.gmra.mxu0 %vm340_vm0, %v6831_v33  ;;  %5896 = vmatmul.mubr.msk.f32.gmra.mxu1 %vm340_vm0, %v6574_v41  ;;  %v6859_v41 = vld [vmem:[%s6418_s29 + $0xa1] sm:$0xff] }
  0x75   : >> { %5848 = vmatprep.mubr.msk.f32.mxu0 %vm340_vm0, %v6834_v35  ;;  %5898 = vmatprep.mubr.msk.f32.mxu1 %vm340_vm0, %v6588_v43  ;;  %v6862_v43 = vld [vmem:[%s6418_s29 + $0xa9] sm:$0xff] }
  0x78   : >> { %5849 = vmatmul.mubr.msk.f32.gmra.mxu0 %vm340_vm0, %v6845_v37  ;;  %5899 = vmatmul.mubr.msk.f32.gmra.mxu1 %vm340_vm0, %v6594_v45  ;;  %v6873_v45 = vld [vmem:[%s6418_s29 + $0xb1] sm:$0xff] }
  0x79   : >> { %5851 = vmatprep.mubr.msk.f32.mxu0 %vm340_vm0, %v6848_v39  ;;  %5901 = vmatprep.mubr.msk.f32.mxu1 %vm340_vm0, %v6608_v47  ;;  %v6876_v47 = vld [vmem:[%s6418_s29 + $0xb9] sm:$0xff] }
  0x7c   : >> { %5852 = vmatmul.mubr.msk.f32.gmra.mxu0 %vm340_vm0, %v6859_v41  ;;  %5902 = vmatmul.mubr.msk.f32.gmra.mxu1 %vm340_vm0, %v6614_v49  ;;  %v6887_v49 = vld [vmem:[%s6418_s29 + $0xc1] sm:$0xff] }
  0x7d   : >> { %5854 = vmatprep.mubr.msk.f32.mxu0 %vm340_vm0, %v6862_v43  ;;  %5904 = vmatprep.mubr.msk.f32.mxu1 %vm340_vm0, %v6628_v51  ;;  %v6890_v51 = vld [vmem:[%s6418_s29 + $0xc9] sm:$0xff] }
  0x80   : >> { %5855 = vmatmul.mubr.msk.f32.gmra.mxu0 %vm340_vm0, %v6873_v45  ;;  %5905 = vmatmul.mubr.msk.f32.gmra.mxu1 %vm340_vm0, %v6634_v53  ;;  %v6901_v53 = vld [vmem:[%s6418_s29 + $0xd1] sm:$0xff] }
  0x81   : >> { %5857 = vmatprep.mubr.msk.f32.mxu0 %vm340_vm0, %v6876_v47  ;;  %5907 = vmatprep.mubr.msk.f32.mxu1 %vm340_vm0, %v6648_v55  ;;  %v6904_v55 = vld [vmem:[%s6418_s29 + $0xd9] sm:$0xff] }
  0x84   : >> { %5858 = vmatmul.mubr.msk.f32.gmra.mxu0 %vm340_vm0, %v6887_v49  ;;  %5908 = vmatmul.mubr.msk.f32.gmra.mxu1 %vm340_vm0, %v6654_v57  ;;  %v6918_v57 = vld [vmem:[%s6418_s29 + $0xe9] sm:$0xff] }
  0x85   : >> { %5860 = vmatprep.mubr.msk.f32.mxu0 %vm340_vm0, %v6890_v51  ;;  %5910 = vmatprep.mubr.msk.f32.mxu1 %vm340_vm0, %v6668_v59  ;;  %v6915_v59 = vld [vmem:[%s6418_s29 + $0xe1] sm:$0xff] }
  0x88   : >> { %5861 = vmatmul.mubr.msk.f32.gmra.mxu0 %vm340_vm0, %v6901_v53  ;;  %5911 = vmatmul.mubr.msk.f32.gmra.mxu1 %vm340_vm0, %v6674_v61  ;;  %v6932_v61 = vld [vmem:[%s6418_s29 + $0xf9] sm:$0xff] }
  0x89   : >> { %5863 = vmatprep.mubr.msk.f32.mxu0 %vm340_vm0, %v6904_v55  ;;  %5913 = vmatprep.mubr.msk.f32.mxu1 %vm340_vm0, %v6688_v63  ;;  %v6929_v63 = vld [vmem:[%s6418_s29 + $0xf1] sm:$0xff] }
  0x8c   : >> { %5864 = vmatmul.mubr.msk.f32.gmra.mxu0 %vm340_vm0, %v6915_v59  ;;  %5914 = vmatmul.mubr.msk.f32.gmra.mxu1 %vm340_vm0, %v6694_v2  ;;  %v6943_v2 = vld [vmem:[%s6418_s29 + $0x101] sm:$0xff] }
  0x8d   : >> { %5866 = vmatprep.mubr.msk.f32.mxu0 %vm340_vm0, %v6918_v57  ;;  %5916 = vmatprep.mubr.msk.f32.mxu1 %vm340_vm0, %v6708_v4  ;;  %v6946_v4 = vld [vmem:[%s6418_s29 + $0x117] sm:$0xff] }
  0x90   : >> { %5867 = vmatmul.mubr.msk.f32.gmra.mxu0 %vm340_vm0, %v6929_v63  ;;  %5917 = vmatmul.mubr.msk.f32.gmra.mxu1 %vm340_vm0, %v6714_v6  ;;  %v6966_v6 = vld [vmem:[%s6418_s29 + $0x127] sm:$0xff] }
  0x91   : >> { %5869 = vmatprep.mubr.msk.f32.mxu0 %vm340_vm0, %v6932_v61  ;;  %5919 = vmatprep.mubr.msk.f32.mxu1 %vm340_vm0, %v6728_v8  ;;  %v6963_v8 = vld [vmem:[%s6418_s29 + $0x111] sm:$0xff]  ;;  %8155 = vst [vmem:[#allocation29_spill] sm:$0xff] %v6966_v6 }
  0x94   : >> { %5870 = vmatmul.mubr.msk.f32.gmra.mxu0 %vm340_vm0, %v6943_v2  ;;  %5920 = vmatmul.mubr.msk.f32.gmra.mxu1 %vm340_vm0, %v6946_v4 }
  0x95   : >> { %5872 = vmatprep.mubr.msk.f32.mxu0 %vm340_vm0, %v6949_v25  ;;  %5922 = vmatprep.mubr.msk.f32.mxu1 %vm340_vm0, %v6952_v23  ;;  %v6983_v23 = vld [vmem:[%s8094_s1 + $0x40] sm:$0xff] }
  0x98   : >> { %5873 = vmatmul.mubr.msk.f32.gmra.mxu0 %vm340_vm0, %v6963_v8  ;;  %5923 = vmatmul.mubr.msk.f32.gmra.mxu1 %vm340_vm0, %v6966_v6  ;;  %v6988_v6 = vld [vmem:[%s8098_s5] sm:$0xf] }
  0x99   : >> { %5927 = vmatprep.mubr.msk.f32.mxu0 %vm340_vm0, %v6441_v14  ;;  %5977 = vmatprep.mubr.msk.f32.mxu1 %vm340_vm0, %v6756_v15  ;;  %v4227_v14 = vld [vmem:[%s7027_s7] sm:$0xff]  ;;  %v4232_v15 = vld [vmem:[%s7027_s7 + $0x28] sm:$0xff] }
  0x9c   : >> { %5928 = vmatmul.mubr.msk.f32.vlgmr.msra.gmra.mxu0 %vm340_vm0, %v6449_v16  ;;  %5978 = vmatmul.mubr.msk.f32.vlgmr.msra.gmra.mxu1 %vm340_vm0, %v6762_v17  ;;  %v6295_v16 = vmov 0   ;;  %v4231_v17 = vld [vmem:[%s7027_s7 + $0x20] sm:$0xff] }
  0x9d   : >> { %6026 = vmatpush3.msra.mxu0 %v6746_v0  ;;  %6076 = vmatpush3.msra.mxu1 %v6751_v9  ;;  %v4229_v0 = vld [vmem:[%s7027_s7 + $0x10] sm:$0xff]  ;;  %v4228_v9 = vld [vmem:[%s7027_s7 + $0x8] sm:$0xff] }
  0x9e   : >> { %5930 = vmatprep.mubr.msk.f32.mxu0 %vm340_vm0, %v6465_v18  ;;  %5980 = vmatprep.mubr.msk.f32.mxu1 %vm340_vm0, %v6775_v12  ;;  %v4230_v18 = vld [vmem:[%s7027_s7 + $0x18] sm:$0xff] }
  0x9f   : >> { %6125 = vmatprep.subr.mxu0 %v6983_v23  ;;  %6175 = vmatprep.subr.msk.mxu1 %vm3927_vm1, %v6988_v6  ;;  %v4234_v12 = vld [vmem:[%s7027_s7 + $0x38] sm:$0xff] }
  0xa0   : >> { %5931 = vmatmul.mubr.msk.f32.gmra.mxu0 %vm340_vm0, %v6471_v20  ;;  %5981 = vmatmul.mubr.msk.f32.gmra.mxu1 %vm340_vm0, %v6778_v13 }
  0xa1   : >> { %5933 = vmatprep.mubr.msk.f32.mxu0 %vm340_vm0, %v6485_v22  ;;  %5983 = vmatprep.mubr.msk.f32.mxu1 %vm340_vm0, %v6789_v19 }
  0xa2   : >> { %6261 = vset.pattern.permute.xlu1 %v6295_v16  ;;  %6260 = vset.pattern.permute.xlu0 %v6295_v16  ;;  %v7139_v16 = vld [vmem:[%s6418_s29 + $0x121] sm:$0xff] }
  0xa3   : >> { %4271 = vperm.xlu1 %6261, %v4229_v0   ;;  %4261 = vperm.xlu0 %6260, %v4227_v14   ;;  %v7133_v0 = vld [vmem:[%s6418_s29 + $0x119] sm:$0xff] }
  0xa4   : >> { %5934 = vmatmul.mubr.msk.f32.gmra.mxu0 %vm340_vm0, %v6491_v24  ;;  %5984 = vmatmul.mubr.msk.f32.gmra.mxu1 %vm340_vm0, %v6792_v10  ;;  %v7136_v14 = vld [vmem:[%s6418_s29 + $0x120] sm:$0xff] }
  0xa5   : >> { %5936 = vmatprep.mubr.msk.f32.mxu0 %vm340_vm0, %v6505_v26  ;;  %5986 = vmatprep.mubr.msk.f32.mxu1 %vm340_vm0, %v6803_v11 }
  0xa7   : >> { %4276 = vperm.xlu1 %6261, %v4230_v18   ;;  %4266 = vperm.xlu0 %6260, %v4228_v9   ;;  %v7152_v18 = vld [vmem:[%s6418_s29 + $0x128] sm:$0xff] }
  0xa8   : >> { %5937 = vmatmul.mubr.msk.f32.gmra.mxu0 %vm340_vm0, %v6511_v28  ;;  %5987 = vmatmul.mubr.msk.f32.gmra.mxu1 %vm340_vm0, %v6806_v27  ;;  %v7155_v9 = vld [vmem:[%s6418_s29 + $0x129] sm:$0xff] }
  0xa9   : >> { %5939 = vmatprep.mubr.msk.f32.mxu0 %vm340_vm0, %v6525_v30  ;;  %5989 = vmatprep.mubr.msk.f32.mxu1 %vm340_vm0, %v6817_v29 }
  0xab   : >> { %4286 = vperm.xlu1 %6261, %v4232_v15   ;;  %4281 = vperm.xlu0 %6260, %v4231_v17   ;;  %v4250_v15 = vld [vmem:[%s7027_s7 + $0xb8] sm:$0xff]  ;;  %v4249_v17 = vld [vmem:[%s7027_s7 + $0xb0] sm:$0xff] }
  0xac   : >> { %5940 = vmatmul.mubr.msk.f32.gmra.mxu0 %vm340_vm0, %v6531_v32  ;;  %5990 = vmatmul.mubr.msk.f32.gmra.mxu1 %vm340_vm0, %v6820_v31 }
  0xad   : >> { %5942 = vmatprep.mubr.msk.f32.mxu0 %vm340_vm0, %v6545_v34  ;;  %5992 = vmatprep.mubr.msk.f32.mxu1 %vm340_vm0, %v6831_v33 }
  0xaf   : >> { %4296 = vperm.xlu1 %6261, %v4234_v12  }
  0xb0   : >> { %5943 = vmatmul.mubr.msk.f32.gmra.mxu0 %vm340_vm0, %v6551_v36  ;;  %5993 = vmatmul.mubr.msk.f32.gmra.mxu1 %vm340_vm0, %v6834_v35 }
  0xb1   : >> { %5945 = vmatprep.mubr.msk.f32.mxu0 %vm340_vm0, %v6565_v38  ;;  %5995 = vmatprep.mubr.msk.f32.mxu1 %vm340_vm0, %v6845_v37 }
  0xb4   : >> { %5946 = vmatmul.mubr.msk.f32.gmra.mxu0 %vm340_vm0, %v6571_v40  ;;  %5996 = vmatmul.mubr.msk.f32.gmra.mxu1 %vm340_vm0, %v6848_v39  ;;  %v4233_v39 = vld [vmem:[%s7027_s7 + $0x30] sm:$0xff] }
  0xb5   : >> { %5948 = vmatprep.mubr.msk.f32.mxu0 %vm340_vm0, %v6585_v42  ;;  %5998 = vmatprep.mubr.msk.f32.mxu1 %vm340_vm0, %v6859_v41  ;;  %v4236_v41 = vld [vmem:[%s7027_s7 + $0x48] sm:$0xff] }
  0xb6   : >> { %4291 = vperm.xlu0 %6260, %v4233_v39   ;;  %4306 = vperm.xlu1 %6261, %v4236_v41   ;;  %v8156_v41 = vld [vmem:[#allocation3_spill] sm:$0xff] }
  0xb8   : >> { %5949 = vmatmul.mubr.msk.f32.gmra.mxu0 %vm340_vm0, %v6591_v44  ;;  %5999 = vmatmul.mubr.msk.f32.gmra.mxu1 %vm340_vm0, %v6862_v43  ;;  %v4235_v43 = vld [vmem:[%s7027_s7 + $0x40] sm:$0xff] }
  0xb9   : >> { %5951 = vmatprep.mubr.msk.f32.mxu0 %vm340_vm0, %v6605_v46  ;;  %6001 = vmatprep.mubr.msk.f32.mxu1 %vm340_vm0, %v6873_v45  ;;  %v4238_v45 = vld [vmem:[%s7027_s7 + $0x58] sm:$0xff] }
  0xba   : >> { %4301 = vperm.xlu0 %6260, %v4235_v43   ;;  %4316 = vperm.xlu1 %6261, %v4238_v45   ;;  %v4252_v43 = vld [vmem:[%s7027_s7 + $0xc8] sm:$0xff]  ;;  %v4251_v45 = vld [vmem:[%s7027_s7 + $0xc0] sm:$0xff] }
  0xbc   : >> { %5952 = vmatmul.mubr.msk.f32.gmra.mxu0 %vm340_vm0, %v6611_v48  ;;  %6002 = vmatmul.mubr.msk.f32.gmra.mxu1 %vm340_vm0, %v6876_v47  ;;  %v4237_v47 = vld [vmem:[%s7027_s7 + $0x50] sm:$0xff] }
  0xbd   : >> { %5954 = vmatprep.mubr.msk.f32.mxu0 %vm340_vm0, %v6625_v50  ;;  %6004 = vmatprep.mubr.msk.f32.mxu1 %vm340_vm0, %v6887_v49  ;;  %v4240_v49 = vld [vmem:[%s7027_s7 + $0x68] sm:$0xff] }
  0xbe   : >> { %4311 = vperm.xlu0 %6260, %v4237_v47   ;;  %4326 = vperm.xlu1 %6261, %v4240_v49   ;;  %v8157_v49 = vld [vmem:[#allocation4_spill] sm:$0xff] }
  0xc0   : >> { %5955 = vmatmul.mubr.msk.f32.gmra.mxu0 %vm340_vm0, %v6631_v52  ;;  %6005 = vmatmul.mubr.msk.f32.gmra.mxu1 %vm340_vm0, %v6890_v51  ;;  %v4239_v51 = vld [vmem:[%s7027_s7 + $0x60] sm:$0xff] }
  0xc1   : >> { %5957 = vmatprep.mubr.msk.f32.mxu0 %vm340_vm0, %v6645_v54  ;;  %6007 = vmatprep.mubr.msk.f32.mxu1 %vm340_vm0, %v6901_v53  ;;  %v4242_v53 = vld [vmem:[%s7027_s7 + $0x78] sm:$0xff] }
  0xc2   : >> { %4321 = vperm.xlu0 %6260, %v4239_v51   ;;  %4336 = vperm.xlu1 %6261, %v4242_v53  }
  0xc4   : >> { %5958 = vmatmul.mubr.msk.f32.gmra.mxu0 %vm340_vm0, %v6651_v56  ;;  %6008 = vmatmul.mubr.msk.f32.gmra.mxu1 %vm340_vm0, %v6904_v55  ;;  %v4241_v55 = vld [vmem:[%s7027_s7 + $0x70] sm:$0xff] }
  0xc5   : >> { %5960 = vmatprep.mubr.msk.f32.mxu0 %vm340_vm0, %v6665_v58  ;;  %6010 = vmatprep.mubr.msk.f32.mxu1 %vm340_vm0, %v6915_v59  ;;  %v4243_v59 = vld [vmem:[%s7027_s7 + $0x80] sm:$0xff] }
  0xc6   : >> { %4331 = vperm.xlu0 %6260, %v4241_v55   ;;  %v8158_v55 = vld [vmem:[#allocation5_spill] sm:$0xff] }
  0xc8   : >> { %5961 = vmatmul.mubr.msk.f32.gmra.mxu0 %vm340_vm0, %v6671_v60  ;;  %6011 = vmatmul.mubr.msk.f32.gmra.mxu1 %vm340_vm0, %v6918_v57  ;;  %v4244_v57 = vld [vmem:[%s7027_s7 + $0x88] sm:$0xff] }
  0xc9   : >> { %5963 = vmatprep.mubr.msk.f32.mxu0 %vm340_vm0, %v6685_v62  ;;  %6013 = vmatprep.mubr.msk.f32.mxu1 %vm340_vm0, %v6929_v63  ;;  %v4245_v63 = vld [vmem:[%s7027_s7 + $0x90] sm:$0xff] }
  0xca   : >> { %4346 = vperm.xlu1 %6261, %v4244_v57   ;;  %4341 = vperm.xlu0 %6260, %v4243_v59   ;;  %v8159_v59 = vld [vmem:[#allocation6_spill] sm:$0xff] }
  0xcc   : >> { %5964 = vmatmul.mubr.msk.f32.gmra.mxu0 %vm340_vm0, %v6691_v1  ;;  %6014 = vmatmul.mubr.msk.f32.gmra.mxu1 %vm340_vm0, %v6932_v61  ;;  %v4246_v61 = vld [vmem:[%s7027_s7 + $0x98] sm:$0xff] }
  0xcd   : >> { %5966 = vmatprep.mubr.msk.f32.mxu0 %vm340_vm0, %v6705_v3  ;;  %6016 = vmatprep.mubr.msk.f32.mxu1 %vm340_vm0, %v6943_v2  ;;  %v7130_v2 = vld [vmem:[%s6418_s29 + $0x118] sm:$0xff] }
  0xce   : >> { %4356 = vperm.xlu1 %6261, %v4246_v61   ;;  %4351 = vperm.xlu0 %6260, %v4245_v63  }
  0xd0   : >> { %5967 = vmatmul.mubr.msk.f32.gmra.mxu0 %vm340_vm0, %v6711_v5  ;;  %6017 = vmatmul.mubr.msk.f32.gmra.mxu1 %vm340_vm0, %v6949_v25  ;;  %v4248_v25 = vld [vmem:[%s7027_s7 + $0xa8] sm:$0xff] }
  0xd1   : >> { %5969 = vmatprep.mubr.msk.f32.mxu0 %vm340_vm0, %v6725_v7  ;;  %6019 = vmatprep.mubr.msk.f32.mxu1 %vm340_vm0, %v6963_v8  ;;  %v4247_v8 = vld [vmem:[%s7027_s7 + $0xa0] sm:$0xff] }
  0xd2   : >> { %4366 = vperm.xlu1 %6261, %v4248_v25   ;;  %4361 = vperm.xlu0 %6260, %v4247_v8  }
  0xd4   : >> { %5970 = vmatmul.mubr.msk.f32.gmra.mxu0 %vm340_vm0, %v7130_v2  ;;  %6020 = vmatmul.mubr.msk.f32.gmra.mxu1 %vm340_vm0, %v7133_v0 }
  0xd5   : >> { %5972 = vmatprep.mubr.msk.f32.mxu0 %vm340_vm0, %v7136_v14  ;;  %6022 = vmatprep.mubr.msk.f32.mxu1 %vm340_vm0, %v7139_v16 }
  0xd6   : >> { %4376 = vperm.xlu1 %6261, %v4250_v15   ;;  %4371 = vperm.xlu0 %6260, %v4249_v17   ;;  %v4256_v15 = vld [vmem:[%s7027_s7 + $0xe8] sm:$0xff]  ;;  %v4255_v17 = vld [vmem:[%s7027_s7 + $0xe0] sm:$0xff] }
  0xd8   : >> { %5973 = vmatmul.mubr.msk.f32.gmra.mxu0 %vm340_vm0, %v7152_v18  ;;  %6023 = vmatmul.mubr.msk.f32.gmra.mxu1 %vm340_vm0, %v7155_v9 }
  0xd9   : >> { %6027 = vmatprep.mubr.msk.f32.mxu0 %vm340_vm0, %v6474_v21  ;;  %6077 = vmatprep.mubr.msk.f32.mxu1 %vm340_vm0, %v6471_v20 }
  0xda   : >> { %4386 = vperm.xlu1 %6261, %v4252_v43   ;;  %4381 = vperm.xlu0 %6260, %v4251_v45  }
  0xdc   : >> { %v5729_v12 = vpop.f32.mrf.mxu0  ;;  %v5779_v39 = vpop.f32.mrf.mxu1  ;;  %6028 = vmatmul.mubr.msk.f32.vlgmr.msra.gmra.mxu0 %vm340_vm0, %v8156_v41  ;;  %6078 = vmatmul.mubr.msk.f32.vlgmr.msra.gmra.mxu1 %vm340_vm0, %v6485_v22 }
  0xdd   : >> { %v7173_v47 = vadd.f32 %v5779_v39, %v5729_v12  ;;  %6126 = vmatpush3.msra.mxu0 %v6983_v23  ;;  %6176 = vmatpush3.msk.msra.mxu1 %vm3927_vm1, %v6988_v6  ;;  %v4254_v23 = vld [vmem:[%s7027_s7 + $0xd8] sm:$0xff]  ;;  %v4253_v6 = vld [vmem:[%s7027_s7 + $0xd0] sm:$0xff] }
  0xde   : >> { %v594_v20 = vpop.f32.mrf.mxu0  ;;  %v915_v21 = vpop.f32.mrf.mxu1  ;;  %6030 = vmatprep.mubr.msk.f32.mxu0 %vm340_vm0, %v8157_v49  ;;  %6080 = vmatprep.mubr.msk.f32.mxu1 %vm340_vm0, %v6491_v24  ;;  %v4257_v49 = vld [vmem:[%s7027_s7 + $0xf0] sm:$0xff] }
  0xdf   : >> { %v7182_v22 = vadd.f32 %v915_v21, %v594_v20  ;;  %4396 = vperm.xlu1 %6261, %v4254_v23   ;;  %4391 = vperm.xlu0 %6260, %v4253_v6   ;;  %v4258_v21 = vld [vmem:[%s7027_s7 + $0xf8] sm:$0xff] }
  0xe0   : >> { %v5732_v51 = vpop.f32.mrf.mxu0  ;;  %v5782_v53 = vpop.f32.mrf.mxu1  ;;  %6031 = vmatmul.mubr.msk.f32.gmra.mxu0 %vm340_vm0, %v8158_v55  ;;  %6081 = vmatmul.mubr.msk.f32.gmra.mxu1 %vm340_vm0, %v6505_v26  ;;  %v8160_v26 = vld [vmem:[#allocation7_spill] sm:$0xff] }
  0xe1   : >> { %v7190_v57 = vadd.f32 %v5782_v53, %v5732_v51  ;;  %6033 = vmatprep.mubr.msk.f32.mxu0 %vm340_vm0, %v8159_v59  ;;  %6083 = vmatprep.mubr.msk.f32.mxu1 %vm340_vm0, %v6511_v28  ;;  %v8161_v28 = vld [vmem:[#allocation8_spill] sm:$0xff]  ;;  %v8163_v53 = vld [vmem:[#allocation10_spill] sm:$0xff] }
  0xe2   : >> { %v604_v24 = vpop.f32.mrf.mxu0  ;;  %v925_v61 = vpop.f32.mrf.mxu1 }
  0xe3   : >> { %v7196_v63 = vadd.f32 %v925_v61, %v604_v24  ;;  %4406 = vperm.xlu1 %6261, %v4256_v15   ;;  %4401 = vperm.xlu0 %6260, %v4255_v17   ;;  %v8164_v24 = vld [vmem:[#allocation11_spill] sm:$0xff]  ;;  %v8165_v61 = vld [vmem:[#allocation12_spill] sm:$0xff]  ;;  %v8166_v17 = vld [vmem:[#allocation13_spill] sm:$0xff] }
  0xe4   : >> { %v5735_v25 = vpop.f32.mrf.mxu0  ;;  %v5785_v8 = vpop.f32.mrf.mxu1  ;;  %6034 = vmatmul.mubr.msk.f32.gmra.mxu0 %vm340_vm0, %v8160_v26  ;;  %6084 = vmatmul.mubr.msk.f32.gmra.mxu1 %vm340_vm0, %v6525_v30  ;;  %v8162_v30 = vld [vmem:[#allocation9_spill] sm:$0xff] }
  0xe5   : >> { %v7204_v12 = vadd.f32 %v5785_v8, %v5735_v25  ;;  %6036 = vmatprep.mubr.msk.f32.mxu0 %vm340_vm0, %v8161_v28  ;;  %6086 = vmatprep.mubr.msk.f32.mxu1 %vm340_vm0, %v6531_v32  ;;  %v8167_v28 = vld [vmem:[#allocation14_spill] sm:$0xff] }
  0xe6   : >> { %v614_v39 = vpop.f32.mrf.mxu0  ;;  %v935_v41 = vpop.f32.mrf.mxu1 }
  0xe7   : >> { %v7210_v43 = vadd.f32 %v935_v41, %v614_v39  ;;  %4416 = vperm.xlu1 %6261, %v4258_v21   ;;  %4411 = vperm.xlu0 %6260, %v4257_v49   ;;  %v8169_v21 = vld [vmem:[#allocation16_spill] sm:$0xff] }
  0xe8   : >> { %v5738_v45 = vpop.f32.mrf.mxu0  ;;  %v5788_v20 = vpop.f32.mrf.mxu1  ;;  %6037 = vmatmul.mubr.msk.f32.gmra.mxu0 %vm340_vm0, %v8162_v30  ;;  %6087 = vmatmul.mubr.msk.f32.gmra.mxu1 %vm340_vm0, %v6545_v34  ;;  %v8168_v30 = vld [vmem:[#allocation15_spill] sm:$0xff] }
  0xe9   : >> { %v7218_v51 = vadd.f32 %v5788_v20, %v5738_v45  ;;  %6039 = vmatprep.mubr.msk.f32.mxu0 %vm340_vm0, %v8163_v53  ;;  %6089 = vmatprep.mubr.msk.f32.mxu1 %vm340_vm0, %v6551_v36 }
  0xea   : >> { %v624_v32 = vpop.f32.mrf.mxu0  ;;  %v945_v55 = vpop.f32.mrf.mxu1 }
  0xeb   : >> { %v7224_v23 = vadd.f32 %v945_v55, %v624_v32 }
  0xec   : >> { %v5741_v6 = vpop.f32.mrf.mxu0  ;;  %v5791_v59 = vpop.f32.mrf.mxu1  ;;  %6040 = vmatmul.mubr.msk.f32.gmra.mxu0 %vm340_vm0, %v8164_v24  ;;  %6090 = vmatmul.mubr.msk.f32.gmra.mxu1 %vm340_vm0, %v6565_v38 }
  0xed   : >> { %v7230_v34 = vadd.f32 %v5791_v59, %v5741_v6  ;;  %6042 = vmatprep.mubr.msk.f32.mxu0 %vm340_vm0, %v8165_v61  ;;  %6092 = vmatprep.mubr.msk.f32.mxu1 %vm340_vm0, %v6571_v40  ;;  %v8170_v6 = vld [vmem:[#allocation17_spill] sm:$0xff]  ;;  %v8171_v59 = vld [vmem:[#allocation18_spill] sm:$0xff] }
  0xee   : >> { %v634_v36 = vpop.f32.mrf.mxu0  ;;  %v955_v25 = vpop.f32.mrf.mxu1 }
  0xef   : >> { %v7236_v8 = vadd.f32 %v955_v25, %v634_v36 }
  0xf0   : >> { %v5744_v26 = vpop.f32.mrf.mxu0  ;;  %v5794_v15 = vpop.f32.mrf.mxu1  ;;  %6043 = vmatmul.mubr.msk.f32.gmra.mxu0 %vm340_vm0, %v8166_v17  ;;  %6093 = vmatmul.mubr.msk.f32.gmra.mxu1 %vm340_vm0, %v6585_v42 }
  0xf1   : >> { %v7242_v38 = vadd.f32 %v5794_v15, %v5744_v26  ;;  %6045 = vmatprep.mubr.msk.f32.mxu0 %vm340_vm0, %v8167_v28  ;;  %6095 = vmatprep.mubr.msk.f32.mxu1 %vm340_vm0, %v6591_v44  ;;  %v8172_v26 = vld [vmem:[#allocation19_spill] sm:$0xff]  ;;  %v8173_v15 = vld [vmem:[#allocation20_spill] sm:$0xff] }
  0xf2   : >> { %v644_v40 = vpop.f32.mrf.mxu0  ;;  %v965_v39 = vpop.f32.mrf.mxu1 }
  0xf3   : >> { %v7248_v41 = vadd.f32 %v965_v39, %v644_v40 }
  0xf4   : >> { %v5747_v45 = vpop.f32.mrf.mxu0  ;;  %v5797_v20 = vpop.f32.mrf.mxu1  ;;  %6046 = vmatmul.mubr.msk.f32.gmra.mxu0 %vm340_vm0, %v8168_v30  ;;  %6096 = vmatmul.mubr.msk.f32.gmra.mxu1 %vm340_vm0, %v6605_v46 }
  0xf5   : >> { %v7254_v42 = vadd.f32 %v5797_v20, %v5747_v45  ;;  %6048 = vmatprep.mubr.msk.f32.mxu0 %vm340_vm0, %v8169_v21  ;;  %6098 = vmatprep.mubr.msk.f32.mxu1 %vm340_vm0, %v6611_v48  ;;  %v8174_v45 = vld [vmem:[#allocation21_spill] sm:$0xff]  ;;  %v8175_v20 = vld [vmem:[#allocation22_spill] sm:$0xff] }
  0xf6   : >> { %v654_v44 = vpop.f32.mrf.mxu0  ;;  %v975_v49 = vpop.f32.mrf.mxu1 }
  0xf7   : >> { %v7260_v53 = vadd.f32 %v975_v49, %v654_v44 }
  0xf8   : >> { %v5750_v32 = vpop.f32.mrf.mxu0  ;;  %v5800_v55 = vpop.f32.mrf.mxu1  ;;  %6049 = vmatmul.mubr.msk.f32.gmra.mxu0 %vm340_vm0, %v8170_v6  ;;  %6099 = vmatmul.mubr.msk.f32.gmra.mxu1 %vm340_vm0, %v6625_v50 }
  0xf9   : >> { %v7266_v46 = vadd.f32 %v5800_v55, %v5750_v32  ;;  %6051 = vmatprep.mubr.msk.f32.mxu0 %vm340_vm0, %v8171_v59  ;;  %6101 = vmatprep.mubr.msk.f32.mxu1 %vm340_vm0, %v6631_v52  ;;  %v8176_v32 = vld [vmem:[#allocation23_spill] sm:$0xff]  ;;  %v8177_v55 = vld [vmem:[#allocation24_spill] sm:$0xff] }
  0xfa   : >> { %v664_v48 = vpop.f32.mrf.mxu0  ;;  %v985_v24 = vpop.f32.mrf.mxu1 }
  0xfb   : >> { %v7272_v61 = vadd.f32 %v985_v24, %v664_v48 }
  0xfc   : >> { %v5753_v36 = vpop.f32.mrf.mxu0  ;;  %v5803_v25 = vpop.f32.mrf.mxu1  ;;  %6052 = vmatmul.mubr.msk.f32.gmra.mxu0 %vm340_vm0, %v8172_v26  ;;  %6102 = vmatmul.mubr.msk.f32.gmra.mxu1 %vm340_vm0, %v6645_v54 }
  0xfd   : >> { %v7278_v50 = vadd.f32 %v5803_v25, %v5753_v36  ;;  %6054 = vmatprep.mubr.msk.f32.mxu0 %vm340_vm0, %v8173_v15  ;;  %6104 = vmatprep.mubr.msk.f32.mxu1 %vm340_vm0, %v6651_v56  ;;  %v8178_v36 = vld [vmem:[#allocation25_spill] sm:$0xff]  ;;  %v8179_v25 = vld [vmem:[#allocation26_spill] sm:$0xff] }
  0xfe   : >> { %v674_v52 = vpop.f32.mrf.mxu0  ;;  %v995_v17 = vpop.f32.mrf.mxu1 }
  0xff   : >> { %v7284_v28 = vadd.f32 %v995_v17, %v674_v52 }
 0x100   : >> { %v5756_v40 = vpop.f32.mrf.mxu0  ;;  %v5806_v39 = vpop.f32.mrf.mxu1  ;;  %6055 = vmatmul.mubr.msk.f32.gmra.mxu0 %vm340_vm0, %v8174_v45  ;;  %6105 = vmatmul.mubr.msk.f32.gmra.mxu1 %vm340_vm0, %v6665_v58 }
 0x101   : >> { %v7290_v54 = vadd.f32 %v5806_v39, %v5756_v40  ;;  %6057 = vmatprep.mubr.msk.f32.mxu0 %vm340_vm0, %v8175_v20  ;;  %6107 = vmatprep.mubr.msk.f32.mxu1 %vm340_vm0, %v6671_v60  ;;  %v8180_v40 = vld [vmem:[#allocation27_spill] sm:$0xff] }
 0x102   : >> { %v684_v56 = vpop.f32.mrf.mxu0  ;;  %v1005_v30 = vpop.f32.mrf.mxu1 }
 0x103   : >> { %v7296_v21 = vadd.f32 %v1005_v30, %v684_v56  ;;  %v8181_v30 = vld [vmem:[#allocation28_spill] sm:$0xff] }
 0x104   : >> { %v5759_v44 = vpop.f32.mrf.mxu0  ;;  %v5809_v49 = vpop.f32.mrf.mxu1  ;;  %6058 = vmatmul.mubr.msk.f32.gmra.mxu0 %vm340_vm0, %v8176_v32  ;;  %6108 = vmatmul.mubr.msk.f32.gmra.mxu1 %vm340_vm0, %v6685_v62 }
 0x105   : >> { %v7302_v58 = vadd.f32 %v5809_v49, %v5759_v44  ;;  %6060 = vmatprep.mubr.msk.f32.mxu0 %vm340_vm0, %v8177_v55  ;;  %6110 = vmatprep.mubr.msk.f32.mxu1 %vm340_vm0, %v6691_v1  ;;  %v5191_v44 = vld [vmem:[%s6418_s29 + $0x130] sm:$0xff] }
 0x106   : >> { %v694_v60 = vpop.f32.mrf.mxu0  ;;  %v1015_v6 = vpop.f32.mrf.mxu1  ;;  %v5126_v55 = vld [vmem:[%s6418_s29 + $0x137] sm:$0xff] }
 0x107   : >> { %v7308_v59 = vadd.f32 %v1015_v6, %v694_v60  ;;  %v5192_v60 = vld [vmem:[%s6418_s29 + $0x138] sm:$0xff] }
 0x108   : >> { %v5762_v48 = vpop.f32.mrf.mxu0  ;;  %v5812_v24 = vpop.f32.mrf.mxu1  ;;  %6061 = vmatmul.mubr.msk.f32.gmra.mxu0 %vm340_vm0, %v8178_v36  ;;  %6111 = vmatmul.mubr.msk.f32.gmra.mxu1 %vm340_vm0, %v6705_v3  ;;  %v5193_v36 = vld [vmem:[%s6418_s29 + $0x140] sm:$0xff] }
 0x109   : >> { %v7314_v62 = vadd.f32 %v5812_v24, %v5762_v48  ;;  %6063 = vmatprep.mubr.msk.f32.mxu0 %vm340_vm0, %v8179_v25  ;;  %6113 = vmatprep.mubr.msk.f32.mxu1 %vm340_vm0, %v6711_v5  ;;  %v5127_v24 = vld [vmem:[%s6418_s29 + $0x13f] sm:$0xff] }
 0x10a   : >> { %v704_v1 = vpop.f32.mrf.mxu0  ;;  %v1025_v26 = vpop.f32.mrf.mxu1 }
 0x10b   : >> { %v7320_v15 = vadd.f32 %v1025_v26, %v704_v1  ;;  %v5294_v26 = vld [vmem:[%s7356_s11 + $0x30] sm:$0xff] }
 0x10c   : >> { %v5765_v52 = vpop.f32.mrf.mxu0  ;;  %v5815_v17 = vpop.f32.mrf.mxu1  ;;  %6064 = vmatmul.mubr.msk.f32.gmra.mxu0 %vm340_vm0, %v8180_v40  ;;  %6114 = vmatmul.mubr.msk.f32.gmra.mxu1 %vm340_vm0, %v6725_v7  ;;  %v8182_v7 = vld [vmem:[#allocation29_spill] sm:$0xff] }
 0x10d   : >> { %v7326_v3 = vadd.f32 %v5815_v17, %v5765_v52  ;;  %6066 = vmatprep.mubr.msk.f32.mxu0 %vm340_vm0, %v6946_v4  ;;  %6116 = vmatprep.mubr.msk.f32.mxu1 %vm340_vm0, %v7130_v2  ;;  %v5125_v2 = vld [vmem:[%s6418_s29 + $0x12f] sm:$0xff] }
 0x10e   : >> { %v714_v5 = vpop.f32.mrf.mxu0  ;;  %v1035_v39 = vpop.f32.mrf.mxu1 }
 0x10f   : >> { %v7332_v45 = vadd.f32 %v1035_v39, %v714_v5  ;;  %v5295_v39 = vld [vmem:[%s7356_s11 + $0x38] sm:$0xff] }
 0x110   : >> { %v5768_v20 = vpop.f32.mrf.mxu0  ;;  %v5818_v56 = vpop.f32.mrf.mxu1  ;;  %6067 = vmatmul.mubr.msk.f32.gmra.mxu0 %vm340_vm0, %v8181_v30  ;;  %6117 = vmatmul.mubr.msk.f32.gmra.mxu1 %vm340_vm0, %v7136_v14  ;;  %v5296_v30 = vld [vmem:[%s7356_s11 + $0x40] sm:$0xff] }
 0x111   : >> { %v7338_v4 = vadd.f32 %v5818_v56, %v5768_v20  ;;  %6069 = vmatprep.mubr.msk.f32.mxu0 %vm340_vm0, %v8182_v7  ;;  %6119 = vmatprep.mubr.msk.f32.mxu1 %vm340_vm0, %v7152_v18 }
 0x112   : >> { %v724_v49 = vpop.f32.mrf.mxu0  ;;  %v1045_v32 = vpop.f32.mrf.mxu1 }
 0x113   : >> { %v7348_v6 = vadd.f32 %v1045_v32, %v724_v49 }
 0x114   : >> { %v5771_v14 = vpop.f32.mrf.mxu0  ;;  %v5821_v48 = vpop.f32.mrf.mxu1  ;;  %6070 = vmatmul.mubr.msk.f32.gmra.mxu0 %vm340_vm0, %v5125_v2  ;;  %6120 = vmatmul.mubr.msk.f32.gmra.mxu1 %vm340_vm0, %v5191_v44 }
 0x115   : >> { %v7360_v18 = vadd.f32 %v5821_v48, %v5771_v14  ;;  %6072 = vmatprep.mubr.msk.f32.mxu0 %vm340_vm0, %v5126_v55  ;;  %6122 = vmatprep.mubr.msk.f32.mxu1 %vm340_vm0, %v5192_v60  ;;  %v5298_v60 = vld [vmem:[%s7356_s11 + $0x50] sm:$0xff] }
 0x116   : >> { %v734_v25 = vpop.f32.mrf.mxu0  ;;  %v1055_v1 = vpop.f32.mrf.mxu1 }
 0x117   : >> { %v7367_v52 = vadd.f32 %v1055_v1, %v734_v25  ;;  %v5300_v1 = vld [vmem:[%s7356_s11 + $0x60] sm:$0xff] }
 0x118   : >> { %v5774_v17 = vpop.f32.mrf.mxu0  ;;  %v5824_v40 = vpop.f32.mrf.mxu1  ;;  %6073 = vmatmul.mubr.msk.f32.gmra.mxu0 %vm340_vm0, %v5127_v24  ;;  %6123 = vmatmul.mubr.msk.f32.gmra.mxu1 %vm340_vm0, %v5193_v36  ;;  %v5299_v36 = vld [vmem:[%s7356_s11 + $0x58] sm:$0xff] }
 0x119   : >> { %v7371_v5 = vadd.f32 %v5824_v40, %v5774_v17  ;;  %6127 = vmatprep.mubr.msk.f32.mxu0 %vm340_vm0, %v6778_v13  ;;  %6177 = vmatprep.mubr.msk.f32.mxu1 %vm3830_vm2, %v5294_v26  ;;  %v5297_v13 = vld [vmem:[%s7356_s11 + $0x48] sm:$0xff] }
 0x11a   : >> { %v744_v20 = vpop.f32.mrf.mxu0  ;;  %v1065_v56 = vpop.f32.mrf.mxu1 }
 0x11b   : >> { %v7378_v7 = vadd.f32 %v1065_v56, %v744_v20  ;;  %v5302_v56 = vld [vmem:[%s7356_s11 + $0x70] sm:$0xff] }
 0x11c   : >> { %v5829_v2 = vpop.f32.mrf.mxu0  ;;  %v5879_v44 = vpop.f32.mrf.mxu1  ;;  %6128 = vmatmul.mubr.msk.f32.vlgmr.msra.gmra.mxu0 %vm340_vm0, %v6789_v19  ;;  %6178 = vmatmul.mubr.msk.f32.vlgmr.msra.gmra.mxu1 %vm3830_vm2, %v5295_v39  ;;  %v5301_v39 = vld [vmem:[%s7356_s11 + $0x68] sm:$0xff] }
 0x11d   : >> { %v1432_v49 = vadd.f32 %v5829_v2, %v7173_v47  ;;  %6130 = vmatprep.mubr.msk.f32.mxu0 %vm340_vm0, %v6792_v10  ;;  %6180 = vmatprep.mubr.msk.f32.mxu1 %vm3830_vm2, %v5296_v30 }
 0x11e   : >> { %v1272_v32 = vpop.f32.mrf.mxu0  ;;  %v1661_v55 = vpop.f32.mrf.mxu1 }
 0x11f   : >> { %v7389_v14 = vadd.f32 %v5879_v44, %v1432_v49  ;;  %v1431_v48 = vadd.f32 %v1272_v32, %v7182_v22  ;;  %v5303_v49 = vld [vmem:[%s7356_s11 + $0x78] sm:$0xff] }
 0x120   : >> { %v5832_v19 = vpop.f32.mrf.mxu0  ;;  %v5882_v24 = vpop.f32.mrf.mxu1  ;;  %6131 = vmatmul.mubr.msk.f32.gmra.mxu0 %vm340_vm0, %v6803_v11  ;;  %6181 = vmatmul.mubr.msk.f32.gmra.mxu1 %vm3830_vm2, %v5297_v13  ;;  %v5238_v32 = vld [vmem:[%s6418_s29 + $0x99] sm:$0xff] }
 0x121   : >> { %v7395_v10 = vadd.f32 %v1661_v55, %v1431_v48  ;;  %v1434_v47 = vadd.f32 %v5832_v19, %v7190_v57  ;;  %6133 = vmatprep.mubr.msk.f32.mxu0 %vm340_vm0, %v6806_v27  ;;  %6183 = vmatprep.mubr.msk.f32.mxu1 %vm3830_vm2, %v5298_v60  ;;  %v5304_v55 = vld [vmem:[%s7356_s11 + $0x80] sm:$0xff] }
 0x122   : >> { %v1282_v25 = vpop.f32.mrf.mxu0  ;;  %v1671_v22 = vpop.f32.mrf.mxu1 }
 0x123   : >> { %v7403_v26 = vadd.f32 %v5882_v24, %v1434_v47  ;;  %v1433_v11 = vadd.f32 %v1282_v25, %v7196_v63  ;;  %v5239_v24 = vld [vmem:[%s6418_s29 + $0xa1] sm:$0xff]  ;;  %v5240_v25 = vld [vmem:[%s6418_s29 + $0xa9] sm:$0xff] }
 0x124   : >> { %v5835_v17 = vpop.f32.mrf.mxu0  ;;  %v5885_v40 = vpop.f32.mrf.mxu1  ;;  %6134 = vmatmul.mubr.msk.f32.gmra.mxu0 %vm340_vm0, %v6817_v29  ;;  %6184 = vmatmul.mubr.msk.f32.gmra.mxu1 %vm3830_vm2, %v5299_v36  ;;  %v5305_v47 = vld [vmem:[%s7356_s11 + $0x88] sm:$0xff] }
 0x125   : >> { %v7409_v27 = vadd.f32 %v1671_v22, %v1433_v11  ;;  %v1436_v57 = vadd.f32 %v5835_v17, %v7204_v12  ;;  %6136 = vmatprep.mubr.msk.f32.mxu0 %vm340_vm0, %v6820_v31  ;;  %6186 = vmatprep.mubr.msk.f32.mxu1 %vm3830_vm2, %v5300_v1  ;;  %v5306_v22 = vld [vmem:[%s7356_s11 + $0x90] sm:$0xff] }
 0x126   : >> { %v1292_v20 = vpop.f32.mrf.mxu0  ;;  %v1681_v63 = vpop.f32.mrf.mxu1 }
 0x127   : >> { %v7417_v30 = vadd.f32 %v5885_v40, %v1436_v57  ;;  %v1435_v29 = vadd.f32 %v1292_v20, %v7210_v43  ;;  %v5241_v57 = vld [vmem:[%s6418_s29 + $0xb1] sm:$0xff] }
 0x128   : >> { %v5838_v2 = vpop.f32.mrf.mxu0  ;;  %v5888_v44 = vpop.f32.mrf.mxu1  ;;  %6137 = vmatmul.mubr.msk.f32.gmra.mxu0 %vm340_vm0, %v6831_v33  ;;  %6187 = vmatmul.mubr.msk.f32.gmra.mxu1 %vm3830_vm2, %v5301_v39  ;;  %v5307_v39 = vld [vmem:[%s7356_s11 + $0x98] sm:$0xff] }
 0x129   : >> { %v7423_v31 = vadd.f32 %v1681_v63, %v1435_v29  ;;  %v1438_v12 = vadd.f32 %v5838_v2, %v7218_v51  ;;  %6139 = vmatprep.mubr.msk.f32.mxu0 %vm340_vm0, %v6834_v35  ;;  %6189 = vmatprep.mubr.msk.f32.mxu1 %vm3830_vm2, %v5302_v56  ;;  %v5242_v63 = vld [vmem:[%s6418_s29 + $0xb9] sm:$0xff] }
 0x12a   : >> { %v1302_v43 = vpop.f32.mrf.mxu0  ;;  %v1691_v13 = vpop.f32.mrf.mxu1  ;;  %v5308_v56 = vld [vmem:[%s7356_s11 + $0xa0] sm:$0xff] }
 0x12b   : >> { %v7432_v33 = vadd.f32 %v5888_v44, %v1438_v12  ;;  %v1437_v60 = vadd.f32 %v1302_v43, %v7224_v23  ;;  %v5243_v43 = vld [vmem:[%s6418_s29 + $0xc1] sm:$0xff] }
 0x12c   : >> { %v5841_v48 = vpop.f32.mrf.mxu0  ;;  %v5891_v51 = vpop.f32.mrf.mxu1  ;;  %6140 = vmatmul.mubr.msk.f32.gmra.mxu0 %vm340_vm0, %v6845_v37  ;;  %6190 = vmatmul.mubr.msk.f32.gmra.mxu1 %vm3830_vm2, %v5303_v49 }
 0x12d   : >> { %v7438_v35 = vadd.f32 %v1691_v13, %v1437_v60  ;;  %v1440_v19 = vadd.f32 %v5841_v48, %v7230_v34  ;;  %6142 = vmatprep.mubr.msk.f32.mxu0 %vm340_vm0, %v5238_v32  ;;  %6192 = vmatprep.mubr.msk.f32.mxu1 %vm3830_vm2, %v5304_v55  ;;  %v5309_v13 = vld [vmem:[%s7356_s11 + $0xa8] sm:$0xff]  ;;  %v5310_v60 = vld [vmem:[%s7356_s11 + $0xb0] sm:$0xff] }
 0x12e   : >> { %v1312_v23 = vpop.f32.mrf.mxu0  ;;  %v1701_v36 = vpop.f32.mrf.mxu1  ;;  %v5244_v55 = vld [vmem:[%s6418_s29 + $0xc9] sm:$0xff] }
 0x12f   : >> { %v7447_v37 = vadd.f32 %v5891_v51, %v1440_v19  ;;  %v1439_v1 = vadd.f32 %v1312_v23, %v7236_v8  ;;  %v5245_v23 = vld [vmem:[%s6418_s29 + $0xd1] sm:$0xff] }
 0x130   : >> { %v5844_v11 = vpop.f32.mrf.mxu0  ;;  %v5894_v34 = vpop.f32.mrf.mxu1  ;;  %6143 = vmatmul.mubr.msk.f32.gmra.mxu0 %vm340_vm0, %v5239_v24  ;;  %6193 = vmatmul.mubr.msk.f32.gmra.mxu1 %vm3830_vm2, %v5305_v47 }
 0x131   : >> { %v7452_v17 = vadd.f32 %v1701_v36, %v1439_v1  ;;  %v1442_v40 = vadd.f32 %v5844_v11, %v7242_v38  ;;  %6145 = vmatprep.mubr.msk.f32.mxu0 %vm340_vm0, %v5240_v25  ;;  %6195 = vmatprep.mubr.msk.f32.mxu1 %vm3830_vm2, %v5306_v22  ;;  %v5311_v36 = vld [vmem:[%s7356_s11 + $0xb8] sm:$0xff]  ;;  %v5312_v1 = vld [vmem:[%s7356_s11 + $0xc0] sm:$0xff] }
 0x132   : >> { %v1322_v20 = vpop.f32.mrf.mxu0  ;;  %v1711_v8 = vpop.f32.mrf.mxu1  ;;  %v5246_v22 = vld [vmem:[%s6418_s29 + $0xd9] sm:$0xff] }
 0x133   : >> { %v7461_v29 = vadd.f32 %v5894_v34, %v1442_v40  ;;  %v1441_v2 = vadd.f32 %v1322_v20, %v7248_v41  ;;  %v5247_v20 = vld [vmem:[%s6418_s29 + $0xe1] sm:$0xff] }
 0x134   : >> { %v5847_v44 = vpop.f32.mrf.mxu0  ;;  %v5897_v38 = vpop.f32.mrf.mxu1  ;;  %6146 = vmatmul.mubr.msk.f32.gmra.mxu0 %vm340_vm0, %v5241_v57  ;;  %6196 = vmatmul.mubr.msk.f32.gmra.mxu1 %vm3830_vm2, %v5307_v39 }
 0x135   : >> { %v7466_v12 = vadd.f32 %v1711_v8, %v1441_v2  ;;  %v1444_v49 = vadd.f32 %v5847_v44, %v7254_v42  ;;  %6148 = vmatprep.mubr.msk.f32.mxu0 %vm340_vm0, %v5242_v63  ;;  %6198 = vmatprep.mubr.msk.f32.mxu1 %vm3830_vm2, %v5308_v56  ;;  %v5313_v8 = vld [vmem:[%s7356_s11 + $0xc8] sm:$0xff]  ;;  %v5314_v2 = vld [vmem:[%s7356_s11 + $0xd0] sm:$0xff] }
 0x136   : >> { %v1332_v32 = vpop.f32.mrf.mxu0  ;;  %v1721_v41 = vpop.f32.mrf.mxu1  ;;  %v5248_v56 = vld [vmem:[%s6418_s29 + $0xe9] sm:$0xff] }
 0x137   : >> { %v7475_v48 = vadd.f32 %v5897_v38, %v1444_v49  ;;  %v1443_v51 = vadd.f32 %v1332_v32, %v7260_v53  ;;  %v5249_v32 = vld [vmem:[%s6418_s29 + $0xf1] sm:$0xff] }
 0x138   : >> { %v5850_v19 = vpop.f32.mrf.mxu0  ;;  %v5900_v42 = vpop.f32.mrf.mxu1  ;;  %6149 = vmatmul.mubr.msk.f32.gmra.mxu0 %vm340_vm0, %v5243_v43  ;;  %6199 = vmatmul.mubr.msk.f32.gmra.mxu1 %vm3830_vm2, %v5309_v13 }
 0x139   : >> { %v7480_v24 = vadd.f32 %v1721_v41, %v1443_v51  ;;  %v1446_v47 = vadd.f32 %v5850_v19, %v7266_v46  ;;  %6151 = vmatprep.mubr.msk.f32.mxu0 %vm340_vm0, %v5244_v55  ;;  %6201 = vmatprep.mubr.msk.f32.mxu1 %vm3830_vm2, %v5310_v60  ;;  %v5315_v41 = vld [vmem:[%s7356_s11 + $0xd8] sm:$0xff]  ;;  %v5316_v51 = vld [vmem:[%s7356_s11 + $0xe0] sm:$0xff] }
 0x13a   : >> { %v1342_v25 = vpop.f32.mrf.mxu0  ;;  %v1731_v53 = vpop.f32.mrf.mxu1  ;;  %v5250_v60 = vld [vmem:[%s6418_s29 + $0xf9] sm:$0xff] }
 0x13b   : >> { %v7489_v11 = vadd.f32 %v5900_v42, %v1446_v47  ;;  %v1445_v34 = vadd.f32 %v1342_v25, %v7272_v61  ;;  %v5251_v25 = vld [vmem:[%s6418_s29 + $0x101] sm:$0xff] }
 0x13c   : >> { %v5853_v40 = vpop.f32.mrf.mxu0  ;;  %v5903_v46 = vpop.f32.mrf.mxu1  ;;  %6152 = vmatmul.mubr.msk.f32.gmra.mxu0 %vm340_vm0, %v5245_v23  ;;  %6202 = vmatmul.mubr.msk.f32.gmra.mxu1 %vm3830_vm2, %v5311_v36 }
 0x13d   : >> { %v7494_v57 = vadd.f32 %v1731_v53, %v1445_v34  ;;  %v1448_v39 = vadd.f32 %v5853_v40, %v7278_v50  ;;  %6154 = vmatprep.mubr.msk.f32.mxu0 %vm340_vm0, %v5246_v22  ;;  %6204 = vmatprep.mubr.msk.f32.mxu1 %vm3830_vm2, %v5312_v1  ;;  %v5317_v53 = vld [vmem:[%s7356_s11 + $0xe8] sm:$0xff]  ;;  %v5318_v34 = vld [vmem:[%s7356_s11 + $0xf0] sm:$0xff] }
 0x13e   : >> { %v1352_v63 = vpop.f32.mrf.mxu0  ;;  %v1741_v61 = vpop.f32.mrf.mxu1  ;;  %v5252_v1 = vld [vmem:[%s6418_s29 + $0x109] sm:$0xff] }
 0x13f   : >> { %v7503_v44 = vadd.f32 %v5903_v46, %v1448_v39  ;;  %v1447_v38 = vadd.f32 %v1352_v63, %v7284_v28  ;;  %v5253_v63 = vld [vmem:[%s6418_s29 + $0x111] sm:$0xff] }
 0x140   : >> { %v5856_v49 = vpop.f32.mrf.mxu0  ;;  %v5906_v50 = vpop.f32.mrf.mxu1  ;;  %6155 = vmatmul.mubr.msk.f32.gmra.mxu0 %vm340_vm0, %v5247_v20  ;;  %6205 = vmatmul.mubr.msk.f32.gmra.mxu1 %vm3830_vm2, %v5313_v8 }
 0x141   : >> { %v7508_v43 = vadd.f32 %v1741_v61, %v1447_v38  ;;  %v1450_v13 = vadd.f32 %v5856_v49, %v7290_v54  ;;  %6157 = vmatprep.mubr.msk.f32.mxu0 %vm340_vm0, %v5248_v56  ;;  %6207 = vmatprep.mubr.msk.f32.mxu1 %vm3830_vm2, %v5314_v2  ;;  %v5319_v61 = vld [vmem:[%s7356_s11 + $0xf8] sm:$0xff]  ;;  %v5320_v2 = vld [vmem:[%s7356_s11 + $0x100] sm:$0xff] }
 0x142   : >> { %v1362_v55 = vpop.f32.mrf.mxu0  ;;  %v1751_v28 = vpop.f32.mrf.mxu1 }
 0x143   : >> { %v7517_v19 = vadd.f32 %v5906_v50, %v1450_v13  ;;  %v1449_v42 = vadd.f32 %v1362_v55, %v7296_v21 }
 0x144   : >> { %v5859_v47 = vpop.f32.mrf.mxu0  ;;  %v5909_v54 = vpop.f32.mrf.mxu1  ;;  %6158 = vmatmul.mubr.msk.f32.gmra.mxu0 %vm340_vm0, %v5249_v32  ;;  %6208 = vmatmul.mubr.msk.f32.gmra.mxu1 %vm3830_vm2, %v5315_v41  ;;  %v5321_v41 = vld [vmem:[%s7356_s11 + $0x108] sm:$0xff] }
 0x145   : >> { %v7522_v23 = vadd.f32 %v1751_v28, %v1449_v42  ;;  %v1452_v36 = vadd.f32 %v5859_v47, %v7302_v58  ;;  %6160 = vmatprep.mubr.msk.f32.mxu0 %vm340_vm0, %v5250_v60  ;;  %6210 = vmatprep.mubr.msk.f32.mxu1 %vm3830_vm2, %v5316_v51  ;;  %v5322_v28 = vld [vmem:[%s7356_s11 + $0x110] sm:$0xff] }
 0x146   : >> { %v1372_v22 = vpop.f32.mrf.mxu0  ;;  %v1761_v21 = vpop.f32.mrf.mxu1 }
 0x147   : >> { %v7531_v40 = vadd.f32 %v5909_v54, %v1452_v36  ;;  %v1451_v46 = vadd.f32 %v1372_v22, %v7308_v59  ;;  %v5257_v54 = vld [vmem:[%s6418_s29 + $0x131] sm:$0xff]  ;;  %v5324_v22 = vld [vmem:[%s7356_s11 + $0x120] sm:$0xff] }
 0x148   : >> { %v5862_v39 = vpop.f32.mrf.mxu0  ;;  %v5912_v20 = vpop.f32.mrf.mxu1  ;;  %6161 = vmatmul.mubr.msk.f32.gmra.mxu0 %vm340_vm0, %v5251_v25  ;;  %6211 = vmatmul.mubr.msk.f32.gmra.mxu1 %vm3830_vm2, %v5317_v53  ;;  %v5323_v36 = vld [vmem:[%s7356_s11 + $0x118] sm:$0xff] }
 0x149   : >> { %v7536_v58 = vadd.f32 %v1761_v21, %v1451_v46  ;;  %v1454_v8 = vadd.f32 %v5862_v39, %v7314_v62  ;;  %6163 = vmatprep.mubr.msk.f32.mxu0 %vm340_vm0, %v5252_v1  ;;  %6213 = vmatprep.mubr.msk.f32.mxu1 %vm3830_vm2, %v5318_v34  ;;  %v5258_v53 = vld [vmem:[%s6418_s29 + $0x139] sm:$0xff]  ;;  %v5259_v46 = vld [vmem:[%s6418_s29 + $0x141] sm:$0xff]  ;;  %s7870_s29 = scalar_lea.vmem %s6368_s12, %s6410_s25 }
 0x14a   : >> { %v1382_v56 = vpop.f32.mrf.mxu0  ;;  %v1771_v59 = vpop.f32.mrf.mxu1  ;;  %v5325_v39 = vld [vmem:[%s7356_s11 + $0x128] sm:$0xff] }
 0x14b   : >> { %v7544_v38 = vadd.f32 %v5912_v20, %v1454_v8  ;;  %v1453_v49 = vadd.f32 %v1382_v56, %v7320_v15 }
 0x14c   : >> { %v5865_v50 = vpop.f32.mrf.mxu0  ;;  %v5915_v13 = vpop.f32.mrf.mxu1  ;;  %6164 = vmatmul.mubr.msk.f32.gmra.mxu0 %vm340_vm0, %v5253_v63  ;;  %6214 = vmatmul.mubr.msk.f32.gmra.mxu1 %vm3830_vm2, %v5319_v61 }
 0x14d   : >> { %v7549_v62 = vadd.f32 %v1771_v59, %v1453_v49  ;;  %v1456_v32 = vadd.f32 %v5865_v50, %v7326_v3  ;;  %6166 = vmatprep.mubr.msk.f32.mxu0 %vm340_vm0, %v7133_v0  ;;  %6216 = vmatprep.mubr.msk.f32.mxu1 %vm3830_vm2, %v5320_v2 }
 0x14e   : >> { %v1392_v55 = vpop.f32.mrf.mxu0  ;;  %v1781_v15 = vpop.f32.mrf.mxu1 }
 0x14f   : >> { %v7557_v60 = vadd.f32 %v5915_v13, %v1456_v32  ;;  %v1455_v51 = vadd.f32 %v1392_v55, %v7332_v45 }
 0x150   : >> { %v5868_v42 = vpop.f32.mrf.mxu0  ;;  %v5918_v47 = vpop.f32.mrf.mxu1  ;;  %6167 = vmatmul.mubr.msk.f32.gmra.mxu0 %vm340_vm0, %v7139_v16  ;;  %6217 = vmatmul.mubr.msk.f32.gmra.mxu1 %vm3830_vm2, %v5321_v41 }
 0x151   : >> { %v7563_v0 = vadd.f32 %v1781_v15, %v1455_v51  ;;  %v1458_v3 = vadd.f32 %v5868_v42, %v7338_v4  ;;  %6169 = vmatprep.mubr.msk.f32.mxu0 %vm340_vm0, %v7155_v9  ;;  %6219 = vmatprep.mubr.msk.f32.mxu1 %vm3830_vm2, %v5322_v28 }
 0x152   : >> { %v1402_v45 = vpop.f32.mrf.mxu0  ;;  %v1791_v25 = vpop.f32.mrf.mxu1 }
 0x153   : >> { %v7573_v16 = vadd.f32 %v5918_v47, %v1458_v3  ;;  %v1457_v21 = vadd.f32 %v1402_v45, %v7348_v6 }
 0x154   : >> { %v5871_v1 = vpop.f32.mrf.mxu0  ;;  %v5921_v34 = vpop.f32.mrf.mxu1  ;;  %6170 = vmatmul.mubr.msk.f32.gmra.mxu0 %vm340_vm0, %v5257_v54  ;;  %6220 = vmatmul.mubr.msk.f32.gmra.mxu1 %vm3830_vm2, %v5323_v36 }
 0x155   : >> { %v7578_v9 = vadd.f32 %v1791_v25, %v1457_v21  ;;  %v1460_v4 = vadd.f32 %v5871_v1, %v7360_v18  ;;  %6172 = vmatprep.mubr.msk.f32.mxu0 %vm340_vm0, %v5258_v53  ;;  %6222 = vmatprep.mubr.msk.f32.mxu1 %vm3830_vm2, %v5324_v22 }
 0x156   : >> { %v1412_v20 = vpop.f32.mrf.mxu0  ;;  %v1801_v8 = vpop.f32.mrf.mxu1 }
 0x157   : >> { %v7585_v63 = vadd.f32 %v5921_v34, %v1460_v4  ;;  %v1459_v6 = vadd.f32 %v1412_v20, %v7367_v52 }
 0x158   : >> { %v5874_v61 = vpop.f32.mrf.mxu0  ;;  %v5924_v56 = vpop.f32.mrf.mxu1  ;;  %6173 = vmatmul.mubr.msk.f32.gmra.mxu0 %vm340_vm0, %v5259_v46  ;;  %6223 = vmatmul.mubr.msk.f32.gmra.mxu1 %vm3830_vm2, %v5325_v39 }
 0x159   : >> { %v7590_v59 = vadd.f32 %v1801_v8, %v1459_v6  ;;  %v1462_v18 = vadd.f32 %v5874_v61, %v7371_v5 }
 0x15a   : >> { %v1422_v2 = vpop.f32.mrf.mxu0  ;;  %v1811_v49 = vpop.f32.mrf.mxu1 }
 0x15b   : >> { %v7593_v50 = vadd.f32 %v5924_v56, %v1462_v18  ;;  %v1461_v13 = vadd.f32 %v1422_v2, %v7378_v7 }
 0x15c   : >> { %v5929_v32 = vpop.f32.mrf.mxu0  ;;  %v5979_v41 = vpop.f32.mrf.mxu1 }
 0x15d   : >> { %v7596_v55 = vadd.f32 %v1811_v49, %v1461_v13  ;;  %v2209_v52 = vadd.f32 %v5929_v32, %v7389_v14 }
 0x15e   : >> { %v2049_v15 = vpop.f32.mrf.mxu0  ;;  %v2438_v28 = vpop.f32.mrf.mxu1 }
 0x15f   : >> { %v7599_v51 = vadd.f32 %v5979_v41, %v2209_v52  ;;  %v2208_v42 = vadd.f32 %v2049_v15, %v7395_v10 }
 0x160   : >> { %v5932_v47 = vpop.f32.mrf.mxu0  ;;  %v5982_v5 = vpop.f32.mrf.mxu1 }
 0x161   : >> { %v7602_v3 = vadd.f32 %v2438_v28, %v2208_v42  ;;  %v2211_v54 = vadd.f32 %v5932_v47, %v7403_v26 }
 0x162   : >> { %v2059_v36 = vpop.f32.mrf.mxu0  ;;  %v2448_v7 = vpop.f32.mrf.mxu1 }
 0x163   : >> { %v7605_v45 = vadd.f32 %v5982_v5, %v2211_v54  ;;  %v2210_v25 = vadd.f32 %v2059_v36, %v7409_v27 }
 0x164   : >> { %v5935_v53 = vpop.f32.mrf.mxu0  ;;  %v5985_v14 = vpop.f32.mrf.mxu1 }
 0x165   : >> { %v7608_v22 = vadd.f32 %v2448_v7, %v2210_v25  ;;  %v2213_v21 = vadd.f32 %v5935_v53, %v7417_v30 }
 0x166   : >> { %v2069_v1 = vpop.f32.mrf.mxu0  ;;  %v2458_v10 = vpop.f32.mrf.mxu1 }
 0x167   : >> { %v7611_v34 = vadd.f32 %v5985_v14, %v2213_v21  ;;  %v2212_v4 = vadd.f32 %v2069_v1, %v7423_v31 }
 0x168   : >> { %v5938_v46 = vpop.f32.mrf.mxu0  ;;  %v5988_v26 = vpop.f32.mrf.mxu1 }
 0x169   : >> { %v7614_v39 = vadd.f32 %v2458_v10, %v2212_v4  ;;  %v2215_v20 = vadd.f32 %v5938_v46, %v7432_v33 }
 0x16a   : >> { %v2079_v8 = vpop.f32.mrf.mxu0  ;;  %v2468_v27 = vpop.f32.mrf.mxu1 }
 0x16b   : >> { %v7617_v6 = vadd.f32 %v5988_v26, %v2215_v20  ;;  %v2214_v61 = vadd.f32 %v2079_v8, %v7438_v35 }
 0x16c   : >> { %v5941_v56 = vpop.f32.mrf.mxu0  ;;  %v5991_v30 = vpop.f32.mrf.mxu1 }
 0x16d   : >> { %v7620_v18 = vadd.f32 %v2468_v27, %v2214_v61  ;;  %v2217_v2 = vadd.f32 %v5941_v56, %v7447_v37 }
 0x16e   : >> { %v2089_v49 = vpop.f32.mrf.mxu0  ;;  %v2478_v31 = vpop.f32.mrf.mxu1 }
 0x16f   : >> { %v7623_v13 = vadd.f32 %v5991_v30, %v2217_v2  ;;  %v2216_v32 = vadd.f32 %v2089_v49, %v7452_v17 }
 0x170   : >> { %v5944_v41 = vpop.f32.mrf.mxu0  ;;  %v5994_v33 = vpop.f32.mrf.mxu1 }
 0x171   : >> { %v7626_v52 = vadd.f32 %v2478_v31, %v2216_v32  ;;  %v2219_v15 = vadd.f32 %v5944_v41, %v7461_v29 }
 0x172   : >> { %v2099_v28 = vpop.f32.mrf.mxu0  ;;  %v2488_v35 = vpop.f32.mrf.mxu1 }
 0x173   : >> { %v7629_v42 = vadd.f32 %v5994_v33, %v2219_v15  ;;  %v2218_v47 = vadd.f32 %v2099_v28, %v7466_v12 }
 0x174   : >> { %v5947_v5 = vpop.f32.mrf.mxu0  ;;  %v5997_v37 = vpop.f32.mrf.mxu1 }
 0x175   : >> { %v7632_v54 = vadd.f32 %v2488_v35, %v2218_v47  ;;  %v2221_v36 = vadd.f32 %v5947_v5, %v7475_v48 }
 0x176   : >> { %v2109_v7 = vpop.f32.mrf.mxu0  ;;  %v2498_v17 = vpop.f32.mrf.mxu1 }
 0x177   : >> { %v7635_v25 = vadd.f32 %v5997_v37, %v2221_v36  ;;  %v2220_v53 = vadd.f32 %v2109_v7, %v7480_v24 }
 0x178   : >> { %v5950_v14 = vpop.f32.mrf.mxu0  ;;  %v6000_v29 = vpop.f32.mrf.mxu1 }
 0x179   : >> { %v7638_v21 = vadd.f32 %v2498_v17, %v2220_v53  ;;  %v2223_v1 = vadd.f32 %v5950_v14, %v7489_v11 }
 0x17a   : >> { %v2119_v10 = vpop.f32.mrf.mxu0  ;;  %v2508_v12 = vpop.f32.mrf.mxu1 }
 0x17b   : >> { %v7641_v4 = vadd.f32 %v6000_v29, %v2223_v1  ;;  %v2222_v46 = vadd.f32 %v2119_v10, %v7494_v57 }
 0x17c   : >> { %v5953_v26 = vpop.f32.mrf.mxu0  ;;  %v6003_v48 = vpop.f32.mrf.mxu1 }
 0x17d   : >> { %v7644_v20 = vadd.f32 %v2508_v12, %v2222_v46  ;;  %v2225_v8 = vadd.f32 %v5953_v26, %v7503_v44 }
 0x17e   : >> { %v2129_v27 = vpop.f32.mrf.mxu0  ;;  %v2518_v24 = vpop.f32.mrf.mxu1 }
 0x17f   : >> { %v7647_v61 = vadd.f32 %v6003_v48, %v2225_v8  ;;  %v2224_v56 = vadd.f32 %v2129_v27, %v7508_v43 }
 0x180   : >> { %v5956_v30 = vpop.f32.mrf.mxu0  ;;  %v6006_v11 = vpop.f32.mrf.mxu1 }
 0x181   : >> { %8183 = vst [vmem:[#allocation3_spill] sm:$0xff] %v7647_v61  ;;  %v7650_v2 = vadd.f32 %v2518_v24, %v2224_v56  ;;  %v2227_v49 = vadd.f32 %v5956_v30, %v7517_v19 }
 0x182   : >> { %v2139_v31 = vpop.f32.mrf.mxu0  ;;  %v2528_v57 = vpop.f32.mrf.mxu1 }
 0x183   : >> { %8184 = vst [vmem:[#allocation4_spill] sm:$0xff] %v7650_v2  ;;  %v7653_v32 = vadd.f32 %v6006_v11, %v2227_v49  ;;  %v2226_v41 = vadd.f32 %v2139_v31, %v7522_v23 }
 0x184   : >> { %v5959_v33 = vpop.f32.mrf.mxu0  ;;  %v6009_v44 = vpop.f32.mrf.mxu1 }
 0x185   : >> { %8185 = vst [vmem:[#allocation5_spill] sm:$0xff] %v7653_v32  ;;  %v7656_v15 = vadd.f32 %v2528_v57, %v2226_v41  ;;  %v2229_v28 = vadd.f32 %v5959_v33, %v7531_v40 }
 0x186   : >> { %v2149_v35 = vpop.f32.mrf.mxu0  ;;  %v2538_v43 = vpop.f32.mrf.mxu1 }
 0x187   : >> { %8186 = vst [vmem:[#allocation6_spill] sm:$0xff] %v7656_v15  ;;  %v7659_v47 = vadd.f32 %v6009_v44, %v2229_v28  ;;  %v2228_v5 = vadd.f32 %v2149_v35, %v7536_v58 }
 0x188   : >> { %v5962_v37 = vpop.f32.mrf.mxu0  ;;  %v6012_v19 = vpop.f32.mrf.mxu1 }
 0x189   : >> { %8187 = vst [vmem:[#allocation7_spill] sm:$0xff] %v7659_v47  ;;  %v7662_v36 = vadd.f32 %v2538_v43, %v2228_v5  ;;  %v2231_v7 = vadd.f32 %v5962_v37, %v7544_v38  ;;  %v7780_v47 = vpop.permute.xlu0 %4261 }
 0x18a   : >> { %v2159_v17 = vpop.f32.mrf.mxu0  ;;  %v2548_v23 = vpop.f32.mrf.mxu1 }
 0x18b   : >> { %8188 = vst [vmem:[#allocation8_spill] sm:$0xff] %v7662_v36  ;;  %v7665_v53 = vadd.f32 %v6012_v19, %v2231_v7  ;;  %v2230_v14 = vadd.f32 %v2159_v17, %v7549_v62 }
 0x18c   : >> { %v5965_v29 = vpop.f32.mrf.mxu0  ;;  %v6015_v40 = vpop.f32.mrf.mxu1 }
 0x18d   : >> { %8189 = vst [vmem:[#allocation9_spill] sm:$0xff] %v7665_v53  ;;  %v7668_v1 = vadd.f32 %v2548_v23, %v2230_v14  ;;  %v2233_v10 = vadd.f32 %v5965_v29, %v7557_v60 }
 0x18e   : >> { %v2169_v12 = vpop.f32.mrf.mxu0  ;;  %v2558_v58 = vpop.f32.mrf.mxu1 }
 0x18f   : >> { %8190 = vst [vmem:[#allocation10_spill] sm:$0xff] %v7668_v1  ;;  %v7671_v46 = vadd.f32 %v6015_v40, %v2233_v10  ;;  %v2232_v26 = vadd.f32 %v2169_v12, %v7563_v0  ;;  %v7774_v1 = vpop.permute.xlu1 %4271 }
 0x190   : >> { %v5968_v48 = vpop.f32.mrf.mxu0  ;;  %v6018_v38 = vpop.f32.mrf.mxu1 }
 0x191   : >> { %8191 = vst [vmem:[#allocation11_spill] sm:$0xff] %v7671_v46  ;;  %v7674_v8 = vadd.f32 %v2558_v58, %v2232_v26  ;;  %v2235_v27 = vadd.f32 %v5968_v48, %v7573_v16 }
 0x192   : >> { %v2179_v24 = vpop.f32.mrf.mxu0  ;;  %v2568_v62 = vpop.f32.mrf.mxu1 }
 0x193   : >> { %8192 = vst [vmem:[#allocation12_spill] sm:$0xff] %v7674_v8  ;;  %v7677_v56 = vadd.f32 %v6018_v38, %v2235_v27  ;;  %v2234_v30 = vadd.f32 %v2179_v24, %v7578_v9 }
 0x194   : >> { %v5971_v11 = vpop.f32.mrf.mxu0  ;;  %v6021_v60 = vpop.f32.mrf.mxu1 }
 0x195   : >> { %8193 = vst [vmem:[#allocation13_spill] sm:$0xff] %v7677_v56  ;;  %v7680_v49 = vadd.f32 %v2568_v62, %v2234_v30  ;;  %v2237_v31 = vadd.f32 %v5971_v11, %v7585_v63 }
 0x196   : >> { %v2189_v57 = vpop.f32.mrf.mxu0  ;;  %v2578_v0 = vpop.f32.mrf.mxu1 }
 0x197   : >> { %8194 = vst [vmem:[#allocation14_spill] sm:$0xff] %v7680_v49  ;;  %v7683_v41 = vadd.f32 %v6021_v60, %v2237_v31  ;;  %v2236_v33 = vadd.f32 %v2189_v57, %v7590_v59 }
 0x198   : >> { %v5974_v44 = vpop.f32.mrf.mxu0  ;;  %v6024_v16 = vpop.f32.mrf.mxu1 }
 0x199   : >> { %8195 = vst [vmem:[#allocation15_spill] sm:$0xff] %v7683_v41  ;;  %v7686_v28 = vadd.f32 %v2578_v0, %v2236_v33  ;;  %v2239_v35 = vadd.f32 %v5974_v44, %v7593_v50 }
 0x19a   : >> { %v2199_v43 = vpop.f32.mrf.mxu0  ;;  %v2588_v9 = vpop.f32.mrf.mxu1 }
 0x19b   : >> { %8196 = vst [vmem:[#allocation16_spill] sm:$0xff] %v7686_v28  ;;  %v7689_v5 = vadd.f32 %v6024_v16, %v2239_v35  ;;  %v2238_v37 = vadd.f32 %v2199_v43, %v7596_v55 }
 0x19c   : >> { %v7692_v19 = vpop.f32.mrf.mxu0  ;;  %v7694_v63 = vpop.f32.mrf.mxu1 }
 0x19d   : >> { %8197 = vst [vmem:[#allocation17_spill] sm:$0xff] %v7689_v5  ;;  %v7696_v7 = vadd.f32 %v2588_v9, %v2238_v37 }
 0x19e   : >> { %v7698_v17 = vpop.f32.mrf.mxu0  ;;  %v7700_v59 = vpop.f32.mrf.mxu1 }
 0x19f   : >> { %8198 = vst [vmem:[#allocation18_spill] sm:$0xff] %v7696_v7 }
 0x1a0   : >> { %v7702_v23 = vpop.f32.mrf.mxu0  ;;  %v7704_v14 = vpop.f32.mrf.mxu1 }
 0x1a2   : >> { %v7706_v50 = vpop.f32.mrf.mxu0  ;;  %v7708_v29 = vpop.f32.mrf.mxu1 }
 0x1a4   : >> { %v7710_v40 = vpop.f32.mrf.mxu0  ;;  %v7712_v55 = vpop.f32.mrf.mxu1 }
 0x1a6   : >> { %v7714_v10 = vpop.f32.mrf.mxu0  ;;  %v7716_v12 = vpop.f32.mrf.mxu1 }
 0x1a8   : >> { %v7718_v58 = vpop.f32.mrf.mxu0  ;;  %v7720_v26 = vpop.f32.mrf.mxu1 }
 0x1aa   : >> { %v7722_v48 = vpop.f32.mrf.mxu0  ;;  %v7724_v38 = vpop.f32.mrf.mxu1 }
 0x1ac   : >> { %v7726_v27 = vpop.f32.mrf.mxu0  ;;  %v7728_v24 = vpop.f32.mrf.mxu1 }
 0x1ae   : >> { %v7730_v62 = vpop.f32.mrf.mxu0  ;;  %v7732_v30 = vpop.f32.mrf.mxu1 }
 0x1b0   : >> { %v7734_v11 = vpop.f32.mrf.mxu0  ;;  %v7736_v60 = vpop.f32.mrf.mxu1 }
 0x1b2   : >> { %v7738_v31 = vpop.f32.mrf.mxu0  ;;  %v7740_v57 = vpop.f32.mrf.mxu1 }
 0x1b4   : >> { %v7742_v0 = vpop.f32.mrf.mxu0  ;;  %v7744_v33 = vpop.f32.mrf.mxu1 }
 0x1b6   : >> { %v7746_v44 = vpop.f32.mrf.mxu0  ;;  %v7748_v16 = vpop.f32.mrf.mxu1 }
 0x1b8   : >> { %v7750_v35 = vpop.f32.mrf.mxu0  ;;  %v7752_v43 = vpop.f32.mrf.mxu1 }
 0x1b9   : >> { %8199 = vst [vmem:[#allocation19_spill] sm:$0xff] %v7752_v43 }
 0x1ba   : >> { %v7754_v9 = vpop.f32.mrf.mxu0  ;;  %v7756_v37 = vpop.f32.mrf.mxu1 }
 0x1bb   : >> { %8200 = vst [vmem:[#allocation20_spill] sm:$0xff] %v7754_v9  ;;  %8201 = vst [vmem:[#allocation21_spill] sm:$0xff] %v7756_v37 }
 0x1bc   : >> { %v7758_v7 = vpop.f32.mrf.mxu0  ;;  %v7760_v5 = vpop.f32.mrf.mxu1 }
 0x1bd   : >> { %8202 = vst [vmem:[#allocation22_spill] sm:$0xff] %v7758_v7  ;;  %8203 = vst [vmem:[#allocation23_spill] sm:$0xff] %v7760_v5  ;;  %v4267_v5 = vpop.permute.xlu0 %4266 }
 0x1be   : >> { %v7762_v28 = vpop.f32.mrf.mxu0  ;;  %v7764_v41 = vpop.f32.mrf.mxu1 }
 0x1bf   : >> { %8204 = vst [vmem:[#allocation24_spill] sm:$0xff] %v7762_v28  ;;  %8205 = vst [vmem:[#allocation25_spill] sm:$0xff] %v7764_v41 }
 0x1c0   : >> { %v7766_v49 = vpop.f32.mrf.mxu0  ;;  %v7768_v56 = vpop.f32.mrf.mxu1 }
 0x1c1   : >> { %8206 = vst [vmem:[#allocation26_spill] sm:$0xff] %v7766_v49  ;;  %8207 = vst [vmem:[#allocation27_spill] sm:$0xff] %v7768_v56  ;;  %v7790_v56 = vpop.permute.xlu1 %4276  ;;  %v7810_v2 = vpop.permute.xlu0 %4281 }
 0x1c2   : >> { %v7770_v8 = vpop.f32.mrf.mxu0  ;;  %v7772_v46 = vpop.f32.mrf.mxu1 }
 0x1c3   : >> { %8208 = vst [vmem:[#allocation28_spill] sm:$0xff] %v7770_v8  ;;  %8209 = vst [vmem:[#allocation29_spill] sm:$0xff] %v7772_v46 }
 0x1c4   : >> { %v7776_v53 = vpop.f32.mrf.mxu0  ;;  %v7778_v36 = vpop.f32.mrf.mxu1 }
 0x1c5   : >> { %8210 = vst [vmem:[#allocation30_spill] sm:$0xff] %v7776_v53  ;;  %8211 = vst [vmem:[#allocation31_spill] sm:$0xff] %v7778_v36 }
 0x1c6   : >> { %v7782_v15 = vpop.f32.mrf.mxu0  ;;  %v7784_v32 = vpop.f32.mrf.mxu1 }
 0x1c7   : >> { %8212 = vst [vmem:[#allocation32_spill] sm:$0xff] %v7782_v15  ;;  %8213 = vst [vmem:[#allocation33_spill] sm:$0xff] %v7784_v32  ;;  %v7804_v32 = vpop.permute.xlu1 %4286 }
 0x1c8   : >> { %v7786_v41 = vpop.f32.mrf.mxu0  ;;  %v7788_v49 = vpop.f32.mrf.mxu1 }
 0x1c9   : >> { %8214 = vst [vmem:[#allocation34_spill] sm:$0xff] %v7786_v41  ;;  %8215 = vst [vmem:[#allocation35_spill] sm:$0xff] %v7788_v49 }
 0x1ca   : >> { %v7792_v8 = vpop.f32.mrf.mxu0  ;;  %v7794_v46 = vpop.f32.mrf.mxu1 }
 0x1cb   : >> { %8216 = vst [vmem:[#allocation36_spill] sm:$0xff] %v7792_v8  ;;  %8217 = vst [vmem:[#allocation37_spill] sm:$0xff] %v7794_v46 }
 0x1cc   : >> { %v7796_v53 = vpop.f32.mrf.mxu0  ;;  %v7798_v36 = vpop.f32.mrf.mxu1 }
 0x1cd   : >> { %8218 = vst [vmem:[#allocation38_spill] sm:$0xff] %v7796_v53  ;;  %8219 = vst [vmem:[#allocation39_spill] sm:$0xff] %v7798_v36  ;;  %v7820_v36 = vpop.permute.xlu1 %4296 }
 0x1ce   : >> { %v7800_v28 = vpop.f32.mrf.mxu0  ;;  %v7802_v15 = vpop.f32.mrf.mxu1 }
 0x1cf   : >> { %8220 = vst [vmem:[#allocation40_spill] sm:$0xff] %v7800_v28  ;;  %8221 = vst [vmem:[#allocation41_spill] sm:$0xff] %v7802_v15 }
 0x1d0   : >> { %v7806_v41 = vpop.f32.mrf.mxu0  ;;  %v7808_v49 = vpop.f32.mrf.mxu1 }
 0x1d1   : >> { %8222 = vst [vmem:[#allocation42_spill] sm:$0xff] %v7806_v41  ;;  %8223 = vst [vmem:[#allocation43_spill] sm:$0xff] %v7808_v49  ;;  %v2987_v41 = vadd.f32 %v7692_v19, %v7599_v51  ;;  %v7828_v49 = vpop.permute.xlu0 %4291  ;;  %v7843_v7 = vpop.permute.xlu1 %4306 }
 0x1d2   : >> { %v7812_v8 = vpop.f32.mrf.mxu0  ;;  %v7814_v46 = vpop.f32.mrf.mxu1 }
 0x1d3   : >> { %8224 = vst [vmem:[#allocation44_spill] sm:$0xff] %v7812_v8  ;;  %8225 = vst [vmem:[#allocation45_spill] sm:$0xff] %v7814_v46  ;;  %v2986_v46 = vadd.f32 %v7698_v17, %v7602_v3 }
 0x1d4   : >> { %v7816_v37 = vpop.f32.mrf.mxu0  ;;  %v7818_v53 = vpop.f32.mrf.mxu1 }
 0x1d5   : >> { %8226 = vst [vmem:[#allocation46_spill] sm:$0xff] %v7816_v37  ;;  %8227 = vst [vmem:[#allocation47_spill] sm:$0xff] %v7818_v53  ;;  %v7848_v61 = vpop.permute.xlu0 %4301 }
 0x1d6   : >> { %v7822_v28 = vpop.f32.mrf.mxu0  ;;  %v7824_v15 = vpop.f32.mrf.mxu1 }
 0x1d7   : >> { %8228 = vst [vmem:[#allocation48_spill] sm:$0xff] %v7822_v28  ;;  %8229 = vst [vmem:[#allocation49_spill] sm:$0xff] %v7824_v15  ;;  %v3376_v28 = vadd.f32 %v7694_v63, %v2987_v41  ;;  %v2989_v15 = vadd.f32 %v7702_v23, %v7605_v45  ;;  %v2991_v45 = vadd.f32 %v7710_v40, %v7611_v34 }
 0x1d8   : >> { %v7830_v43 = vpop.f32.mrf.mxu0  ;;  %v7832_v8 = vpop.f32.mrf.mxu1  ;;  %v2990_v23 = vadd.f32 %v7714_v10, %v7614_v39 }
 0x1d9   : >> { %8230 = vst [vmem:[#allocation50_spill] sm:$0xff] %v7830_v43  ;;  %8231 = vst [vmem:[#allocation51_spill] sm:$0xff] %v7832_v8  ;;  %v3375_v43 = vadd.f32 %v7700_v59, %v2986_v46  ;;  %v2988_v8 = vadd.f32 %v7706_v50, %v7608_v22  ;;  %v7856_v22 = vpop.permute.xlu1 %4316  ;;  %v7861_v40 = vpop.permute.xlu0 %4311 }
 0x1da   : >> { %v7836_v37 = vpop.f32.mrf.mxu0  ;;  %v7838_v53 = vpop.f32.mrf.mxu1 }
 0x1db   : >> { %8232 = vst [vmem:[#allocation52_spill] sm:$0xff] %v7836_v37  ;;  %8233 = vst [vmem:[#allocation53_spill] sm:$0xff] %v7838_v53  ;;  %v3378_v53 = vadd.f32 %v7704_v14, %v2989_v15  ;;  %v3377_v59 = vadd.f32 %v7708_v29, %v2988_v8  ;;  %v2993_v14 = vadd.f32 %v7718_v58, %v7617_v6 }
 0x1dc   : >> { %v6129_v51 = vpop.f32.mrf.mxu0  ;;  %v6179_v19 = vpop.f32.mrf.mxu1  ;;  %v3380_v29 = vadd.f32 %v7712_v55, %v2991_v45  ;;  %v2995_v55 = vadd.f32 %v7726_v27, %v7623_v13 }
 0x1dd   : >> { %v3765_v3 = vadd.f32 %v6129_v51, %v3376_v28  ;;  %v8234_v28 = vld [vmem:[#allocation2_spill] sm:$0xff]  ;;  %v7884_v13 = vpop.permute.xlu0 %4321 }
 0x1de   : >> { %v3605_v17 = vpop.f32.mrf.mxu0  ;;  %v3997_v37 = vpop.f32.mrf.mxu1 }
 0x1df   : >> { %v4157_v41 = vadd.f32 %v6179_v19, %v3765_v3  ;;  %v3764_v63 = vadd.f32 %v3605_v17, %v3375_v43  ;;  %v3379_v3 = vadd.f32 %v7716_v12, %v2990_v23 }
 0x1e0   : >> { %v6132_v9 = vpop.f32.mrf.mxu0  ;;  %v6182_v46 = vpop.f32.mrf.mxu1 }
 0x1e1   : >> { %v4195_v50 = vadd.f32 %v8234_v28, %v4157_v41  ;;  %v4156_v51 = vadd.f32 %v3997_v37, %v3764_v63  ;;  %v3767_v15 = vadd.f32 %v6132_v9, %v3378_v53  ;;  %v2992_v37 = vadd.f32 %v7722_v48, %v7620_v18  ;;  %v7877_v48 = vpop.permute.xlu1 %4326 }
 0x1e2   : >> { %v3615_v43 = vpop.f32.mrf.mxu0  ;;  %v4007_v34 = vpop.f32.mrf.mxu1  ;;  %v3382_v41 = vadd.f32 %v7720_v26, %v2993_v14 }
 0x1e3   : >> { %v4420_v39 = vmul.f32 %v4267_v5, %v4195_v50  ;;  %v4194_v10 = vadd.f32 %v8234_v28, %v4156_v51  ;;  %v4159_v19 = vadd.f32 %v6182_v46, %v3767_v15  ;;  %v3766_v8 = vadd.f32 %v3615_v43, %v3377_v59 }
 0x1e4   : >> { %v6135_v6 = vpop.f32.mrf.mxu0  ;;  %v6185_v53 = vpop.f32.mrf.mxu1  ;;  %v3381_v59 = vadd.f32 %v7724_v38, %v2992_v37  ;;  %v2997_v38 = vadd.f32 %v7734_v11, %v7629_v42 }
 0x1e5   : >> { %v4452_v58 = vmax.f32 %v4420_v39, 0.0  ;;  %v4419_v9 = vmul.f32 %v7780_v47, %v4194_v10  ;;  %v4197_v5 = vadd.f32 %v8234_v28, %v4159_v19  ;;  %v4158_v17 = vadd.f32 %v4007_v34, %v3766_v8 }
 0x1e6   : >> { %v3769_v12 = vadd.f32 %v6135_v6, %v3380_v29  ;;  %v3625_v63 = vpop.f32.mrf.mxu0  ;;  %v4017_v18 = vpop.f32.mrf.mxu1  ;;  %v2994_v34 = vadd.f32 %v7730_v62, %v7626_v52 }
 0x1e7   : >> { %5362 = vst.msk [vmem:[%s7870_s29 + $0x38] sm:$0xff] %vm340_vm0, %v4452_v58  ;;  %v4451_v45 = vmax.f32 %v4419_v9, 0.0  ;;  %v4422_v23 = vmul.f32 %v7790_v56, %v4197_v5  ;;  %v4196_v47 = vadd.f32 %v8234_v28, %v4158_v17  ;;  %v3768_v46 = vadd.f32 %v3625_v63, %v3379_v3  ;;  %v7901_v6 = vpop.permute.xlu1 %4336 }
 0x1e8   : >> { %v4161_v26 = vadd.f32 %v6185_v53, %v3769_v12  ;;  %v6138_v50 = vpop.f32.mrf.mxu0  ;;  %v6188_v51 = vpop.f32.mrf.mxu1  ;;  %v3384_v56 = vadd.f32 %v7728_v24, %v2995_v55  ;;  %v2996_v24 = vadd.f32 %v7738_v31, %v7632_v54  ;;  %v3383_v9 = vadd.f32 %v7732_v30, %v2994_v34 }
 0x1e9   : >> { %5361 = vst.msk [vmem:[%s7870_s29 + $0x30] sm:$0xff] %vm340_vm0, %v4451_v45  ;;  %v4454_v27 = vmax.f32 %v4422_v23, 0.0  ;;  %v4421_v15 = vmul.f32 %v7774_v1, %v4196_v47  ;;  %v4160_v14 = vadd.f32 %v4017_v18, %v3768_v46  ;;  %v3771_v43 = vadd.f32 %v6138_v50, %v3382_v41  ;;  %v7911_v41 = vpop.permute.xlu0 %4331 }
 0x1ea   : >> { %v4199_v39 = vadd.f32 %v8234_v28, %v4161_v26  ;;  %v3635_v10 = vpop.f32.mrf.mxu0  ;;  %v4027_v19 = vpop.f32.mrf.mxu1  ;;  %v3386_v5 = vadd.f32 %v7736_v60, %v2997_v38  ;;  %v2999_v54 = vadd.f32 %v7742_v0, %v7635_v25  ;;  %v3385_v18 = vadd.f32 %v7740_v57, %v2996_v24 }
 0x1eb   : >> { %5364 = vst.msk [vmem:[%s7870_s29 + $0x48] sm:$0xff] %vm340_vm0, %v4454_v27  ;;  %v4453_v8 = vmax.f32 %v4421_v15, 0.0  ;;  %v4198_v1 = vadd.f32 %v8234_v28, %v4160_v14  ;;  %v4163_v29 = vadd.f32 %v6188_v51, %v3771_v43  ;;  %v3770_v3 = vadd.f32 %v3635_v10, %v3381_v59 }
 0x1ec   : >> { %v4424_v37 = vmul.f32 %v7804_v32, %v4199_v39  ;;  %v6141_v52 = vpop.f32.mrf.mxu0  ;;  %v6191_v62 = vpop.f32.mrf.mxu1  ;;  %v2998_v30 = vadd.f32 %v7746_v44, %v7638_v21  ;;  %v3388_v46 = vadd.f32 %v7744_v33, %v2999_v54  ;;  %v3001_v15 = vadd.f32 %v7750_v35, %v7641_v4  ;;  %v8235_v33 = vld [vmem:[#allocation20_spill] sm:$0xff] }
 0x1ed   : >> { %5363 = vst.msk [vmem:[%s7870_s29 + $0x40] sm:$0xff] %vm340_vm0, %v4453_v8  ;;  %v4423_v42 = vmul.f32 %v7810_v2, %v4198_v1  ;;  %v4201_v11 = vadd.f32 %v8234_v28, %v4163_v29  ;;  %v4162_v53 = vadd.f32 %v4027_v19, %v3770_v3  ;;  %v3773_v58 = vadd.f32 %v6141_v52, %v3384_v56  ;;  %v7925_v21 = vpop.permute.xlu1 %4346  ;;  %v7936_v38 = vpop.permute.xlu0 %4341  ;;  %v8236_v19 = vld [vmem:[#allocation3_spill] sm:$0xff]  ;;  %v8237_v8 = vld [vmem:[#allocation22_spill] sm:$0xff] }
 0x1ee   : >> { %v4456_v32 = vmax.f32 %v4424_v37, 0.0  ;;  %v3645_v31 = vpop.f32.mrf.mxu0  ;;  %v4037_v17 = vpop.f32.mrf.mxu1  ;;  %v3000_v14 = vadd.f32 %v8235_v33, %v7644_v20  ;;  %v3003_v1 = vadd.f32 %v8237_v8, %v8236_v19  ;;  %v8238_v52 = vld [vmem:[#allocation19_spill] sm:$0xff] }
 0x1ef   : >> { %v4455_v55 = vmax.f32 %v4423_v42, 0.0  ;;  %v4426_v2 = vmul.f32 %v7820_v36, %v4201_v11  ;;  %v4200_v12 = vadd.f32 %v8234_v28, %v4162_v53  ;;  %v4165_v63 = vadd.f32 %v6191_v62, %v3773_v58  ;;  %v8239_v42 = vld [vmem:[#allocation21_spill] sm:$0xff]  ;;  %v8240_v53 = vld [vmem:[#allocation4_spill] sm:$0xff] }
 0x1f0   : >> { %5366 = vst.msk [vmem:[%s7870_s29 + $0x58] sm:$0xff] %vm340_vm0, %v4456_v32  ;;  %v3772_v25 = vadd.f32 %v3645_v31, %v3383_v9  ;;  %v6144_v60 = vpop.f32.mrf.mxu0  ;;  %v6194_v0 = vpop.f32.mrf.mxu1  ;;  %v3390_v62 = vadd.f32 %v8238_v52, %v3001_v15  ;;  %v3389_v11 = vadd.f32 %v8239_v42, %v3000_v14  ;;  %v8241_v58 = vld [vmem:[#allocation24_spill] sm:$0xff]  ;;  %v8246_v15 = vld [vmem:[#allocation27_spill] sm:$0xff]  ;;  %v8247_v14 = vld [vmem:[#allocation6_spill] sm:$0xff] }
 0x1f1   : >> { %5365 = vst.msk [vmem:[%s7870_s29 + $0x50] sm:$0xff] %vm340_vm0, %v4455_v55  ;;  %v4458_v45 = vmax.f32 %v4426_v2, 0.0  ;;  %v4425_v23 = vmul.f32 %v7828_v49, %v4200_v12  ;;  %v4203_v36 = vadd.f32 %v8234_v28, %v4165_v63  ;;  %v3775_v47 = vadd.f32 %v6144_v60, %v3386_v5  ;;  %v7952_v32 = vpop.permute.xlu1 %4356  ;;  %v8242_v2 = vld [vmem:[#allocation23_spill] sm:$0xff]  ;;  %v8243_v63 = vld [vmem:[#allocation5_spill] sm:$0xff] }
 0x1f2   : >> { %v4164_v57 = vadd.f32 %v4037_v17, %v3772_v25  ;;  %v3655_v59 = vpop.f32.mrf.mxu0  ;;  %v4047_v26 = vpop.f32.mrf.mxu1  ;;  %v3387_v49 = vadd.f32 %v7748_v16, %v2998_v30  ;;  %v3002_v9 = vadd.f32 %v8241_v58, %v8240_v53  ;;  %v3392_v12 = vadd.f32 %v8242_v2, %v3003_v1  ;;  %v8253_v58 = vld [vmem:[#allocation29_spill] sm:$0xff] }
 0x1f3   : >> { %5368 = vst.msk [vmem:[%s7870_s29 + $0x68] sm:$0xff] %vm340_vm0, %v4458_v45  ;;  %v4457_v44 = vmax.f32 %v4425_v23, 0.0  ;;  %v4428_v50 = vmul.f32 %v7843_v7, %v4203_v36  ;;  %v4167_v51 = vadd.f32 %v6194_v0, %v3775_v47  ;;  %v3774_v27 = vadd.f32 %v3655_v59, %v3385_v18  ;;  %v8244_v18 = vld [vmem:[#allocation26_spill] sm:$0xff]  ;;  %v7961_v45 = vpop.permute.xlu0 %4351 }
 0x1f4   : >> { %v4202_v43 = vadd.f32 %v8234_v28, %v4164_v57  ;;  %v6147_v56 = vpop.f32.mrf.mxu0  ;;  %v6197_v34 = vpop.f32.mrf.mxu1  ;;  %v3005_v30 = vadd.f32 %v8244_v18, %v8243_v63  ;;  %v8257_v18 = vld [vmem:[#allocation33_spill] sm:$0xff] }
 0x1f5   : >> { %5367 = vst.msk [vmem:[%s7870_s29 + $0x60] sm:$0xff] %vm340_vm0, %v4457_v44  ;;  %v4460_v7 = vmax.f32 %v4428_v50, 0.0  ;;  %v4205_v39 = vadd.f32 %v8234_v28, %v4167_v51  ;;  %v4166_v10 = vadd.f32 %v4047_v26, %v3774_v27  ;;  %v3777_v16 = vadd.f32 %v6147_v56, %v3388_v46  ;;  %v8245_v46 = vld [vmem:[#allocation25_spill] sm:$0xff]  ;;  %v8249_v56 = vld [vmem:[#allocation7_spill] sm:$0xff]  ;;  %v7977_v19 = vpop.permute.xlu1 %4366 }
 0x1f6   : >> { %v4427_v4 = vmul.f32 %v7848_v61, %v4202_v43  ;;  %v3665_v35 = vpop.f32.mrf.mxu0  ;;  %v4057_v20 = vpop.f32.mrf.mxu1  ;;  %v3391_v57 = vadd.f32 %v8245_v46, %v3002_v9  ;;  %v3394_v33 = vadd.f32 %v8246_v15, %v3005_v30 }
 0x1f7   : >> { %5370 = vst.msk [vmem:[%s7870_s29 + $0x78] sm:$0xff] %vm340_vm0, %v4460_v7  ;;  %v4430_v29 = vmul.f32 %v7856_v22, %v4205_v39  ;;  %v4204_v3 = vadd.f32 %v8234_v28, %v4166_v10  ;;  %v4169_v24 = vadd.f32 %v6197_v34, %v3777_v16  ;;  %v3776_v37 = vadd.f32 %v3665_v35, %v3387_v49  ;;  %v8250_v34 = vld [vmem:[#allocation30_spill] sm:$0xff]  ;;  %v8251_v35 = vld [vmem:[#allocation8_spill] sm:$0xff]  ;;  %v7985_v52 = vpop.permute.xlu0 %4361 }
 0x1f8   : >> { %v4459_v61 = vmax.f32 %v4427_v4, 0.0  ;;  %v6150_v5 = vpop.f32.mrf.mxu0  ;;  %v6200_v54 = vpop.f32.mrf.mxu1  ;;  %v3007_v7 = vadd.f32 %v8250_v34, %v8249_v56  ;;  %v8263_v34 = vld [vmem:[#allocation38_spill] sm:$0xff] }
 0x1f9   : >> { %v4462_v31 = vmax.f32 %v4430_v29, 0.0  ;;  %v4429_v22 = vmul.f32 %v7861_v40, %v4204_v3  ;;  %v4207_v17 = vadd.f32 %v8234_v28, %v4169_v24  ;;  %v4168_v55 = vadd.f32 %v4057_v20, %v3776_v37  ;;  %v8252_v20 = vld [vmem:[#allocation32_spill] sm:$0xff] }
 0x1fa   : >> { %5369 = vst.msk [vmem:[%s7870_s29 + $0x70] sm:$0xff] %vm340_vm0, %v4459_v61  ;;  %v3779_v25 = vadd.f32 %v6150_v5, %v3390_v62  ;;  %v3675_v60 = vpop.f32.mrf.mxu0  ;;  %v4067_v0 = vpop.f32.mrf.mxu1  ;;  %v3006_v29 = vadd.f32 %v8252_v20, %v8251_v35  ;;  %v8254_v61 = vld [vmem:[#allocation31_spill] sm:$0xff] }
 0x1fb   : >> { %5372 = vst.msk [vmem:[%s7870_s29 + $0x88] sm:$0xff] %vm340_vm0, %v4462_v31  ;;  %v4461_v23 = vmax.f32 %v4429_v22, 0.0  ;;  %v4432_v40 = vmul.f32 %v7877_v48, %v4207_v17  ;;  %v4206_v36 = vadd.f32 %v8234_v28, %v4168_v55  ;;  %v3778_v47 = vadd.f32 %v3675_v60, %v3389_v11  ;;  %v8248_v48 = vld [vmem:[#allocation28_spill] sm:$0xff]  ;;  %v8256_v31 = vld [vmem:[#allocation34_spill] sm:$0xff] }
 0x1fc   : >> { %v4171_v59 = vadd.f32 %v6200_v54, %v3779_v25  ;;  %v6153_v26 = vpop.f32.mrf.mxu0  ;;  %v6203_v44 = vpop.f32.mrf.mxu1  ;;  %v3004_v43 = vadd.f32 %v8248_v48, %v8247_v14  ;;  %v3396_v5 = vadd.f32 %v8254_v61, %v3007_v7  ;;  %v8255_v54 = vld [vmem:[#allocation9_spill] sm:$0xff]  ;;  %v3395_v30 = vadd.f32 %v8257_v18, %v3006_v29  ;;  %v8258_v25 = vld [vmem:[#allocation10_spill] sm:$0xff]  ;;  %v8259_v60 = vld [vmem:[#allocation36_spill] sm:$0xff] }
 0x1fd   : >> { %5371 = vst.msk [vmem:[%s7870_s29 + $0x80] sm:$0xff] %vm340_vm0, %v4461_v23  ;;  %v4464_v50 = vmax.f32 %v4432_v40, 0.0  ;;  %v4431_v51 = vmul.f32 %v7884_v13, %v4206_v36  ;;  %v4170_v27 = vadd.f32 %v4067_v0, %v3778_v47  ;;  %v3781_v49 = vadd.f32 %v6153_v26, %v3392_v12  ;;  %v4377_v47 = vpop.permute.xlu1 %4376  ;;  %v8260_v26 = vld [vmem:[#allocation35_spill] sm:$0xff]  ;;  %v8266_v29 = vld [vmem:[#allocation13_spill] sm:$0xff] }
 0x1fe   : >> { %v4209_v39 = vadd.f32 %v8234_v28, %v4171_v59  ;;  %v3685_v10 = vpop.f32.mrf.mxu0  ;;  %v4077_v16 = vpop.f32.mrf.mxu1  ;;  %v3393_v9 = vadd.f32 %v8253_v58, %v3004_v43  ;;  %v3008_v0 = vadd.f32 %v8259_v60, %v8258_v25  ;;  %v8261_v43 = vld [vmem:[#allocation37_spill] sm:$0xff]  ;;  %v8272_v25 = vld [vmem:[#allocation43_spill] sm:$0xff] }
 0x1ff   : >> { %5374 = vst.msk [vmem:[%s7870_s29 + $0x98] sm:$0xff] %vm340_vm0, %v4464_v50  ;;  %v4463_v13 = vmax.f32 %v4431_v51, 0.0  ;;  %v4208_v8 = vadd.f32 %v8234_v28, %v4170_v27  ;;  %v4173_v1 = vadd.f32 %v6203_v44, %v3781_v49  ;;  %v3780_v4 = vadd.f32 %v3685_v10, %v3391_v57  ;;  %v4372_v49 = vpop.permute.xlu0 %4371  ;;  %v8265_v10 = vld [vmem:[#allocation40_spill] sm:$0xff] }
 0x200   : >> { %v4434_v3 = vmul.f32 %v7901_v6, %v4209_v39  ;;  %v6156_v24 = vpop.f32.mrf.mxu0  ;;  %v6206_v37 = vpop.f32.mrf.mxu1  ;;  %v3009_v6 = vadd.f32 %v8256_v31, %v8255_v54  ;;  %v3397_v56 = vadd.f32 %v8261_v43, %v3008_v0  ;;  %v8264_v39 = vld [vmem:[#allocation12_spill] sm:$0xff]  ;;  %v8269_v31 = vld [vmem:[#allocation41_spill] sm:$0xff]  ;;  %v8273_v0 = vld [vmem:[#allocation15_spill] sm:$0xff] }
 0x201   : >> { %5373 = vst.msk [vmem:[%s7870_s29 + $0x90] sm:$0xff] %vm340_vm0, %v4463_v13  ;;  %v4433_v62 = vmul.f32 %v7911_v41, %v4208_v8  ;;  %v4211_v42 = vadd.f32 %v8234_v28, %v4173_v1  ;;  %v4172_v11 = vadd.f32 %v4077_v16, %v3780_v4  ;;  %v3783_v53 = vadd.f32 %v6156_v24, %v3394_v33 }
 0x202   : >> { %v4466_v22 = vmax.f32 %v4434_v3, 0.0  ;;  %v3695_v17 = vpop.f32.mrf.mxu0  ;;  %v4087_v55 = vpop.f32.mrf.mxu1  ;;  %v3398_v44 = vadd.f32 %v8260_v26, %v3009_v6  ;;  %v3010_v16 = vadd.f32 %v8265_v10, %v8264_v39  ;;  %v8267_v3 = vld [vmem:[#allocation42_spill] sm:$0xff]  ;;  %v8279_v10 = vld [vmem:[#allocation17_spill] sm:$0xff] }
 0x203   : >> { %v4465_v2 = vmax.f32 %v4433_v62, 0.0  ;;  %v4436_v12 = vmul.f32 %v7925_v21, %v4211_v42  ;;  %v4210_v41 = vadd.f32 %v8234_v28, %v4172_v11  ;;  %v4175_v63 = vadd.f32 %v6206_v37, %v3783_v53  ;;  %v4387_v11 = vpop.permute.xlu1 %4386 }
 0x204   : >> { %5376 = vst.msk [vmem:[%s7870_s29 + $0xa8] sm:$0xff] %vm340_vm0, %v4466_v22  ;;  %v3782_v23 = vadd.f32 %v3695_v17, %v3393_v9  ;;  %v6159_v40 = vpop.f32.mrf.mxu0  ;;  %v6209_v36 = vpop.f32.mrf.mxu1  ;;  %v3013_v24 = vadd.f32 %v8267_v3, %v8266_v29  ;;  %v3399_v6 = vadd.f32 %v8269_v31, %v3010_v16  ;;  %v8270_v22 = vld [vmem:[#allocation14_spill] sm:$0xff]  ;;  %v8271_v17 = vld [vmem:[#allocation44_spill] sm:$0xff] }
 0x205   : >> { %5375 = vst.msk [vmem:[%s7870_s29 + $0xa0] sm:$0xff] %vm340_vm0, %v4465_v2  ;;  %v4468_v46 = vmax.f32 %v4436_v12, 0.0  ;;  %v4435_v21 = vmul.f32 %v7936_v38, %v4210_v41  ;;  %v4213_v57 = vadd.f32 %v8234_v28, %v4175_v63  ;;  %v3785_v59 = vadd.f32 %v6159_v40, %v3396_v5  ;;  %v8262_v38 = vld [vmem:[#allocation11_spill] sm:$0xff]  ;;  %v4382_v41 = vpop.permute.xlu0 %4381  ;;  %v8280_v16 = vld [vmem:[#allocation50_spill] sm:$0xff] }
 0x206   : >> { %v4174_v50 = vadd.f32 %v4087_v55, %v3782_v23  ;;  %v3705_v51 = vpop.f32.mrf.mxu0  ;;  %v4097_v27 = vpop.f32.mrf.mxu1  ;;  %v3011_v7 = vadd.f32 %v8263_v34, %v8262_v38  ;;  %v8268_v5 = vld [vmem:[#allocation39_spill] sm:$0xff]  ;;  %v3402_v60 = vadd.f32 %v8272_v25, %v3013_v24  ;;  %v8274_v23 = vld [vmem:[#allocation46_spill] sm:$0xff]  ;;  %v8282_v24 = vld [vmem:[#allocation52_spill] sm:$0xff] }
 0x207   : >> { %5378 = vst.msk [vmem:[%s7870_s29 + $0xb8] sm:$0xff] %vm340_vm0, %v4468_v46  ;;  %v4467_v15 = vmax.f32 %v4435_v21, 0.0  ;;  %v4438_v33 = vmul.f32 %v7952_v32, %v4213_v57  ;;  %v4177_v14 = vadd.f32 %v6209_v36, %v3785_v59  ;;  %v3784_v48 = vadd.f32 %v3705_v51, %v3395_v30  ;;  %v8276_v38 = vld [vmem:[#allocation47_spill] sm:$0xff]  ;;  %v8281_v3 = vld [vmem:[#allocation18_spill] sm:$0xff] }
 0x208   : >> { %v4212_v13 = vadd.f32 %v8234_v28, %v4174_v50  ;;  %v6162_v8 = vpop.f32.mrf.mxu0  ;;  %v6212_v1 = vpop.f32.mrf.mxu1  ;;  %v3400_v54 = vadd.f32 %v8268_v5, %v3011_v7  ;;  %v3015_v40 = vadd.f32 %v8274_v23, %v8273_v0  ;;  %v8277_v7 = vld [vmem:[#allocation16_spill] sm:$0xff] }
 0x209   : >> { %5377 = vst.msk [vmem:[%s7870_s29 + $0xb0] sm:$0xff] %vm340_vm0, %v4467_v15  ;;  %v4470_v4 = vmax.f32 %v4438_v33, 0.0  ;;  %v4215_v32 = vadd.f32 %v8234_v28, %v4177_v14  ;;  %v4176_v35 = vadd.f32 %v4097_v27, %v3784_v48  ;;  %v3787_v20 = vadd.f32 %v6162_v8, %v3398_v44  ;;  %v8275_v44 = vld [vmem:[#allocation45_spill] sm:$0xff]  ;;  %v4397_v33 = vpop.permute.xlu1 %4396 }
 0x20a   : >> { %v4437_v37 = vmul.f32 %v7961_v45, %v4212_v13  ;;  %v3715_v62 = vpop.f32.mrf.mxu0  ;;  %v4107_v42 = vpop.f32.mrf.mxu1  ;;  %v3012_v45 = vadd.f32 %v8271_v17, %v8270_v22  ;;  %v3404_v34 = vadd.f32 %v8276_v38, %v3015_v40  ;;  %v3017_v13 = vadd.f32 %v8280_v16, %v8279_v10 }
 0x20b   : >> { %5380 = vst.msk [vmem:[%s7870_s29 + $0xc8] sm:$0xff] %vm340_vm0, %v4470_v4  ;;  %v4440_v53 = vmul.f32 %v7977_v19, %v4215_v32  ;;  %v4214_v58 = vadd.f32 %v8234_v28, %v4176_v35  ;;  %v4179_v9 = vadd.f32 %v6212_v1, %v3787_v20  ;;  %v3786_v61 = vadd.f32 %v3715_v62, %v3397_v56  ;;  %v4392_v32 = vpop.permute.xlu0 %4391 }
 0x20c   : >> { %v4469_v55 = vmax.f32 %v4437_v37, 0.0  ;;  %v6165_v2 = vpop.f32.mrf.mxu0  ;;  %v6215_v12 = vpop.f32.mrf.mxu1  ;;  %v3401_v50 = vadd.f32 %v8275_v44, %v3012_v45  ;;  %v3016_v37 = vadd.f32 %v8282_v24, %v8281_v3 }
 0x20d   : >> { %v4472_v63 = vmax.f32 %v4440_v53, 0.0  ;;  %v4439_v19 = vmul.f32 %v7985_v52, %v4214_v58  ;;  %v4217_v18 = vadd.f32 %v8234_v28, %v4179_v9  ;;  %v4178_v30 = vadd.f32 %v4107_v42, %v3786_v61 }
 0x20e   : >> { %5379 = vst.msk [vmem:[%s7870_s29 + $0xc0] sm:$0xff] %vm340_vm0, %v4469_v55  ;;  %v3789_v36 = vadd.f32 %v6165_v2, %v3400_v54  ;;  %v3725_v46 = vpop.f32.mrf.mxu0  ;;  %v4117_v21 = vpop.f32.mrf.mxu1  ;;  %v8283_v54 = vld [vmem:[#allocation49_spill] sm:$0xff] }
 0x20f   : >> { %5382 = vst.msk [vmem:[%s7870_s29 + $0xd8] sm:$0xff] %vm340_vm0, %v4472_v63  ;;  %v4471_v57 = vmax.f32 %v4439_v19, 0.0  ;;  %v4442_v59 = vmul.f32 %v4377_v47, %v4217_v18  ;;  %v4216_v52 = vadd.f32 %v8234_v28, %v4178_v30  ;;  %v3788_v26 = vadd.f32 %v3725_v46, %v3399_v6  ;;  %v8278_v47 = vld [vmem:[#allocation48_spill] sm:$0xff]  ;;  %v8284_v6 = vld [vmem:[#allocation51_spill] sm:$0xff]  ;;  %v4407_v2 = vpop.permute.xlu1 %4406  ;;  %v4402_v46 = vpop.permute.xlu0 %4401 }
 0x210   : >> { %v4181_v51 = vadd.f32 %v6215_v12, %v3789_v36  ;;  %v6168_v27 = vpop.f32.mrf.mxu0  ;;  %v6218_v15 = vpop.f32.mrf.mxu1  ;;  %v3014_v39 = vadd.f32 %v8278_v47, %v8277_v7  ;;  %v3406_v22 = vadd.f32 %v8284_v6, %v3017_v13 }
 0x211   : >> { %5381 = vst.msk [vmem:[%s7870_s29 + $0xd0] sm:$0xff] %vm340_vm0, %v4471_v57  ;;  %v4474_v14 = vmax.f32 %v4442_v59, 0.0  ;;  %v4441_v48 = vmul.f32 %v4372_v49, %v4216_v52  ;;  %v4180_v43 = vadd.f32 %v4117_v21, %v3788_v26  ;;  %v3791_v56 = vadd.f32 %v6168_v27, %v3402_v60 }
 0x212   : >> { %v4219_v8 = vadd.f32 %v8234_v28, %v4181_v51  ;;  %v3735_v1 = vpop.f32.mrf.mxu0  ;;  %v4127_v4 = vpop.f32.mrf.mxu1  ;;  %v3403_v31 = vadd.f32 %v8283_v54, %v3014_v39 }
 0x213   : >> { %5384 = vst.msk [vmem:[%s7870_s29 + $0xe8] sm:$0xff] %vm340_vm0, %v4474_v14  ;;  %v4473_v35 = vmax.f32 %v4441_v48, 0.0  ;;  %v4218_v49 = vadd.f32 %v8234_v28, %v4180_v43  ;;  %v4183_v20 = vadd.f32 %v6218_v15, %v3791_v56  ;;  %v3790_v29 = vadd.f32 %v3735_v1, %v3401_v50  ;;  %v4417_v14 = vpop.permute.xlu1 %4416  ;;  %v4412_v38 = vpop.permute.xlu0 %4411 }
 0x214   : >> { %v4444_v62 = vmul.f32 %v4387_v11, %v4219_v8  ;;  %v6171_v42 = vpop.f32.mrf.mxu0  ;;  %v6221_v53 = vpop.f32.mrf.mxu1 }
 0x215   : >> { %5383 = vst.msk [vmem:[%s7870_s29 + $0xe0] sm:$0xff] %vm340_vm0, %v4473_v35  ;;  %v4443_v58 = vmul.f32 %v4382_v41, %v4218_v49  ;;  %v4221_v9 = vadd.f32 %v8234_v28, %v4183_v20  ;;  %v4182_v61 = vadd.f32 %v4127_v4, %v3790_v29  ;;  %v3793_v5 = vadd.f32 %v6171_v42, %v3404_v34  ;;  %v8285_v41 = vld [vmem:[#allocation53_spill] sm:$0xff] }
 0x216   : >> { %v4476_v17 = vmax.f32 %v4444_v62, 0.0  ;;  %v3745_v45 = vpop.f32.mrf.mxu0  ;;  %v4137_v55 = vpop.f32.mrf.mxu1  ;;  %v3405_v18 = vadd.f32 %v8285_v41, %v3016_v37 }
 0x217   : >> { %v4475_v11 = vmax.f32 %v4443_v58, 0.0  ;;  %v4446_v12 = vmul.f32 %v4397_v33, %v4221_v9  ;;  %v4220_v63 = vadd.f32 %v8234_v28, %v4182_v61  ;;  %v4185_v19 = vadd.f32 %v6221_v53, %v3793_v5 }
 0x218   : >> { %5386 = vst.msk [vmem:[%s7870_s29 + $0xf8] sm:$0xff] %vm340_vm0, %v4476_v17  ;;  %v3792_v30 = vadd.f32 %v3745_v45, %v3403_v31  ;;  %v6174_v25 = vpop.f32.mrf.mxu0  ;;  %v6224_v60 = vpop.f32.mrf.mxu1 }
 0x219   : >> { %5385 = vst.msk [vmem:[%s7870_s29 + $0xf0] sm:$0xff] %vm340_vm0, %v4475_v11  ;;  %v4478_v0 = vmax.f32 %v4446_v12, 0.0  ;;  %v4445_v23 = vmul.f32 %v4392_v32, %v4220_v63  ;;  %v4223_v40 = vadd.f32 %v8234_v28, %v4185_v19  ;;  %v3795_v36 = vadd.f32 %v6174_v25, %v3406_v22 }
 0x21a   : >> { %v4184_v21 = vadd.f32 %v4137_v55, %v3792_v30  ;;  %v3755_v57 = vpop.f32.mrf.mxu0  ;;  %v4147_v51 = vpop.f32.mrf.mxu1 }
 0x21b   : >> { %5388 = vst.msk [vmem:[%s7870_s29 + $0x108] sm:$0xff] %vm340_vm0, %v4478_v0  ;;  %v4477_v59 = vmax.f32 %v4445_v23, 0.0  ;;  %v4448_v52 = vmul.f32 %v4407_v2, %v4223_v40  ;;  %v4187_v26 = vadd.f32 %v6224_v60, %v3795_v36  ;;  %v3794_v44 = vadd.f32 %v3755_v57, %v3405_v18 }
 0x21c   : >> { %v4222_v50 = vadd.f32 %v8234_v28, %v4184_v21 }
 0x21d   : >> { %5387 = vst.msk [vmem:[%s7870_s29 + $0x100] sm:$0xff] %vm340_vm0, %v4477_v59  ;;  %v4480_v27 = vmax.f32 %v4448_v52, 0.0  ;;  %v4225_v15 = vadd.f32 %v8234_v28, %v4187_v26  ;;  %v4186_v33 = vadd.f32 %v4147_v51, %v3794_v44 }
 0x21e   : >> { %v4447_v48 = vmul.f32 %v4402_v46, %v4222_v50 }
 0x21f   : >> { %5390 = vst.msk [vmem:[%s7870_s29 + $0x118] sm:$0xff] %vm340_vm0, %v4480_v27  ;;  %v4450_v43 = vmul.f32 %v4417_v14, %v4225_v15  ;;  %v4224_v56 = vadd.f32 %v8234_v28, %v4186_v33 }
 0x220   : >> { %v4479_v34 = vmax.f32 %v4447_v48, 0.0 }
 0x221   : >> { %v4482_v7 = vmax.f32 %v4450_v43, 0.0  ;;  %v4449_v47 = vmul.f32 %v4412_v38, %v4224_v56  ;;  %357 = sbr.rel (!%p355_p5) target bundleno = 23 (0x17), region = 113 }
 0x222   : >> { %5389 = vst.msk [vmem:[%s7870_s29 + $0x110] sm:$0xff] %vm340_vm0, %v4479_v34 }
 0x223   : >> { %5392 = vst.msk [vmem:[%s7870_s29 + $0x128] sm:$0xff] %vm340_vm0, %v4482_v7  ;;  %v4481_v39 = vmax.f32 %v4449_v47, 0.0 }
 0x225   : >> { %5391 = vst.msk [vmem:[%s7870_s29 + $0x120] sm:$0xff] %vm340_vm0, %v4481_v39 }
 0x226 PF: > { %s16_s23 = sadd.s32 1, %s6288_s23   ;;  %s8286_s21 = smov %s6284_s22 }
 0x227   : > { %p13_p6 = scmp.ge.s32.totalorder %s16_s23, 4   ;;  %s8287_s22 = smov %s8289_s24 }
 0x229   :  { %15 = sbr.rel (!%p13_p6) target bundleno = 2 (0x2), region = 124 }

</bundles_post_ra>
